<compile_context>
chip_gen: v5e
topology: v5e:2x2
jax: 0.10.0
libtpu: 0.0.40
codegen_flags: <defaults>
</compile_context>

<pallas_src>
import math
import jax
import jax.numpy as jnp
from jax.experimental import pallas as pl
from jax.experimental.pallas import tpu as pltpu

_NEG_SLOPE = 0.01  # nn.LeakyReLU() default negative_slope


# ----------------------------------------------------------------------------
# Fused conv3x3(+bias)[+residual]+LeakyReLU kernel
# ----------------------------------------------------------------------------
def _make_conv3x3_fused_kernel(fuse_residual: bool, negative_slope: float):
    def kernel(*refs):
        if fuse_residual:
            x_ref, res_ref, w_ref, b_ref, o_ref, xp_ref = refs
        else:
            x_ref, w_ref, b_ref, o_ref, xp_ref = refs
            res_ref = None

        TH, W, Cout = o_ref.shape[1], o_ref.shape[2], o_ref.shape[3]
        Cin = x_ref.shape[3]
        t = pl.program_id(1)
        r0 = pl.multiple_of(t * TH, TH)

        # Build the zero-padded (TH+2, W+2, Cin) input slab in VMEM.
        # (Only the border strictly needs the re-zeroing; it is cheap.)
        xp_ref[...] = jnp.zeros_like(xp_ref)
        xp_ref[1:TH + 1, 1:W + 1, :] = x_ref[0, pl.ds(r0, TH), :, :]

        @pl.when(t > 0)
        def _():  # halo row above this row tile
            xp_ref[0:1, 1:W + 1, :] = x_ref[0, pl.ds(r0 - 1, 1), :, :]

        @pl.when(t < pl.num_programs(1) - 1)
        def _():  # halo row below this row tile
            xp_ref[TH + 1:TH + 2, 1:W + 1, :] = x_ref[0, pl.ds(r0 + TH, 1), :, :]

        acc = jnp.zeros((TH * W, Cout), jnp.float32)
        for dw in range(3):
            # One sublane-shifted slab per dw; the dh taps below are aligned
            # row slices of its flattened view (W is a multiple of 8).
            xs = xp_ref[:, dw:dw + W, :].reshape((TH + 2) * W, Cin)
            for dh in range(3):
                patch = xs[dh * W:dh * W + TH * W, :]
                acc = acc + jnp.dot(patch, w_ref[dh, dw],
                                    preferred_element_type=jnp.float32)

        acc = acc + b_ref[...]
        if fuse_residual:
            acc = acc + res_ref[0].reshape(TH * W, Cout).astype(jnp.float32)
        acc = jnp.where(acc >= 0.0, acc, acc * negative_slope)  # LeakyReLU
        o_ref[0] = acc.reshape(TH, W, Cout).astype(o_ref.dtype)

    return kernel


def conv3x3_lrelu(x, w, b, residual=None, *, negative_slope=_NEG_SLOPE,
                  row_tile=8):
    """Fused 3x3 'same' conv (+bias) [+residual add] + LeakyReLU.  NHWC layout."""
    N, H, W, C = x.shape
    Cout = w.shape[-1]
    TH = min(row_tile, H)
    while H % TH:  # pick a row-tile height that divides H
        TH -= 1
    T = H // TH

    kernel = _make_conv3x3_fused_kernel(residual is not None, negative_slope)

    # Conv input: full image per batch element (index map ignores the row-tile
    # axis, so it is not re-fetched between row tiles of the same image).
    in_specs = [pl.BlockSpec((1, H, W, C), lambda n, t: (n, 0, 0, 0))]
    args = [x]
    if residual is not None:
        in_specs.append(pl.BlockSpec((1, TH, W, Cout), lambda n, t: (n, t, 0, 0)))
        args.append(residual)
    in_specs.append(pl.BlockSpec((3, 3, C, Cout), lambda n, t: (0, 0, 0, 0)))
    in_specs.append(pl.BlockSpec((1, Cout), lambda n, t: (0, 0)))
    args.extend([w, b.reshape(1, Cout)])

    return pl.pallas_call(
        kernel,
        out_shape=jax.ShapeDtypeStruct((N, H, W, Cout), x.dtype),
        grid_spec=pltpu.PrefetchScalarGridSpec(
            num_scalar_prefetch=0,
            grid=(N, T),
            in_specs=in_specs,
            out_specs=pl.BlockSpec((1, TH, W, Cout), lambda n, t: (n, t, 0, 0)),
            scratch_shapes=[pltpu.VMEM((TH + 2, W + 2, C), jnp.float32)],
        ),
        compiler_params=pltpu.CompilerParams(
            dimension_semantics=("parallel", "parallel")),
    )(*args)


# ----------------------------------------------------------------------------
# ResnetBlock forward: LeakyReLU(x + conv2(LeakyReLU(conv1(x))))
# ----------------------------------------------------------------------------
@jax.jit
def resnet_block_forward(params, x_nchw):
    x = jnp.transpose(x_nchw, (0, 2, 3, 1)).astype(jnp.float32)  # NCHW -> NHWC
    h = conv3x3_lrelu(x, params["w1"], params["b1"])                   # conv1+act
    y = conv3x3_lrelu(h, params["w2"], params["b2"], residual=x)       # conv2+add+act
    return jnp.transpose(y, (0, 3, 1, 2))                         # NHWC -> NCHW


# Pure-JAX reference (for in-script validation)
def resnet_block_reference(params, x_nchw):
    x = jnp.transpose(x_nchw, (0, 2, 3, 1)).astype(jnp.float32)
    dn = jax.lax.conv_dimension_numbers(x.shape, params["w1"].shape,
                                        ("NHWC", "HWIO", "NHWC"))

    def conv(v, w, b):
        return jax.lax.conv_general_dilated(
            v, w, window_strides=(1, 1), padding="SAME",
            dimension_numbers=dn, precision=jax.lax.Precision.HIGHEST) + b

    def lrelu(v):
        return jnp.where(v >= 0.0, v, v * _NEG_SLOPE)

    h = lrelu(conv(x, params["w1"], params["b1"]))
    y = lrelu(x + conv(h, params["w2"], params["b2"]))
    return jnp.transpose(y, (0, 3, 1, 2))


# ----------------------------------------------------------------------------
if __name__ == "__main__":
    N, dim, H, W = 2, 128, 32, 32   # small but TPU-friendly (channels -> 128 lanes)

    key = jax.random.PRNGKey(0)
    kw1, kb1, kw2, kb2, kx = jax.random.split(key, 5)
    std = 1.0 / math.sqrt(9 * dim)
    params = {
        "w1": std * jax.random.normal(kw1, (3, 3, dim, dim), jnp.float32),
        "b1": 0.1 * jax.random.normal(kb1, (dim,), jnp.float32),
        "w2": std * jax.random.normal(kw2, (3, 3, dim, dim), jnp.float32),
        "b2": 0.1 * jax.random.normal(kb2, (dim,), jnp.float32),
    }
    x = jax.random.normal(kx, (N, dim, H, W), jnp.float32)

    out = resnet_block_forward(params, x)
    out = jax.block_until_ready(out)

    assert out.shape == (N, dim, H, W), out.shape
    assert bool(jnp.all(jnp.isfinite(out)))

    ref = resnet_block_reference(params, x)
    max_err = float(jnp.max(jnp.abs(out - ref)))
    assert max_err < 5e-2, f"max abs error vs reference: {max_err}"

    print("KERNEL_OK")
</pallas_src>

<mosaic_0001>
module attributes {stable_mosaic.version = 11 : i64} {
  func.func @kernel(%arg0: i32, %arg1: i32, %arg2: memref<1x32x32x128xf32, #tpu.memory_space<vmem>>, %arg3: memref<3x3x128x128xf32, #tpu.memory_space<vmem>>, %arg4: memref<1x128xf32, #tpu.memory_space<vmem>>, %arg5: memref<1x8x32x128xf32, #tpu.memory_space<vmem>>, %arg6: memref<10x34x128xf32, #tpu.memory_space<vmem>>) attributes {dimension_semantics = [#tpu.dimension_semantics<parallel>, #tpu.dimension_semantics<parallel>], iteration_bounds = array<i64: 2, 4>, scalar_prefetch = 0 : i64, scratch_operands = 1 : i64, tpu.core_type = #tpu.core_type<tc>, window_params = [{transform_indices = @transform_0, window_bounds = array<i64: 1, 32, 32, 128>}, {pipeline_mode = #tpu.pipeline_mode<synchronous>, transform_indices = @transform_1, window_bounds = array<i64: 3, 3, 128, 128>}, {pipeline_mode = #tpu.pipeline_mode<synchronous>, transform_indices = @transform_2, window_bounds = array<i64: 1, 128>}, {transform_indices = @transform_3, window_bounds = array<i64: 1, 8, 32, 128>}]} {
    %c8_i32 = arith.constant 8 : i32
    %0 = arith.muli %arg1, %c8_i32 : i32
    %1 = tpu.assume_multiple %0, 8 : i32
    %cst = arith.constant 0.000000e+00 : f32
    %2 = vector.broadcast %cst : f32 to vector<10x34x128xf32>
    %c0 = arith.constant 0 : index
    %c0_0 = arith.constant 0 : index
    %c0_1 = arith.constant 0 : index
    %3 = vector.load %arg6[%c0, %c0_0, %c0_1] : memref<10x34x128xf32, #tpu.memory_space<vmem>>, vector<10x34x128xf32>
    tpu.vector_store %arg6[%c0, %c0_0, %c0_1], %2 {strides = array<i32>} : memref<10x34x128xf32, #tpu.memory_space<vmem>>, vector<10x34x128xf32>,
    %c0_2 = arith.constant 0 : index
    %4 = arith.index_cast %1 : i32 to index
    %c0_3 = arith.constant 0 : index
    %c0_4 = arith.constant 0 : index
    %5 = vector.load %arg2[%c0_2, %4, %c0_3, %c0_4] : memref<1x32x32x128xf32, #tpu.memory_space<vmem>>, vector<1x8x32x128xf32>
    %6 = vector.shape_cast %5 : vector<1x8x32x128xf32> to vector<8x32x128xf32>
    %c1 = arith.constant 1 : index
    %c1_5 = arith.constant 1 : index
    %c0_6 = arith.constant 0 : index
    %7 = vector.load %arg6[%c1, %c1_5, %c0_6] : memref<10x34x128xf32, #tpu.memory_space<vmem>>, vector<8x32x128xf32>
    tpu.vector_store %arg6[%c1, %c1_5, %c0_6], %6 {strides = array<i32>} : memref<10x34x128xf32, #tpu.memory_space<vmem>>, vector<8x32x128xf32>,
    %c0_i32 = arith.constant 0 : i32
    %8 = arith.cmpi sgt, %arg1, %c0_i32 : i32
    %9 = arith.extui %8 : i1 to i32
    %c0_i32_7 = arith.constant 0 : i32
    %10 = arith.cmpi ne, %9, %c0_i32_7 : i32
    scf.if %10 {
      %c1_i32 = arith.constant 1 : i32
      %78 = arith.subi %1, %c1_i32 : i32
      %c0_71 = arith.constant 0 : index
      %79 = arith.index_cast %78 : i32 to index
      %c0_72 = arith.constant 0 : index
      %c0_73 = arith.constant 0 : index
      %80 = vector.load %arg2[%c0_71, %79, %c0_72, %c0_73] : memref<1x32x32x128xf32, #tpu.memory_space<vmem>>, vector<1x1x32x128xf32>
      %81 = vector.shape_cast %80 : vector<1x1x32x128xf32> to vector<1x32x128xf32>
      %c0_74 = arith.constant 0 : index
      %c1_75 = arith.constant 1 : index
      %c0_76 = arith.constant 0 : index
      %82 = vector.load %arg6[%c0_74, %c1_75, %c0_76] : memref<10x34x128xf32, #tpu.memory_space<vmem>>, vector<1x32x128xf32>
      tpu.vector_store %arg6[%c0_74, %c1_75, %c0_76], %81 {strides = array<i32>} : memref<10x34x128xf32, #tpu.memory_space<vmem>>, vector<1x32x128xf32>,
    } else {
    }
    %c3_i32 = arith.constant 3 : i32
    %11 = arith.cmpi slt, %arg1, %c3_i32 : i32
    %12 = arith.extui %11 : i1 to i32
    %c0_i32_8 = arith.constant 0 : i32
    %13 = arith.cmpi ne, %12, %c0_i32_8 : i32
    scf.if %13 {
      %c8_i32_71 = arith.constant 8 : i32
      %78 = arith.addi %1, %c8_i32_71 : i32
      %c0_72 = arith.constant 0 : index
      %79 = arith.index_cast %78 : i32 to index
      %c0_73 = arith.constant 0 : index
      %c0_74 = arith.constant 0 : index
      %80 = vector.load %arg2[%c0_72, %79, %c0_73, %c0_74] : memref<1x32x32x128xf32, #tpu.memory_space<vmem>>, vector<1x1x32x128xf32>
      %81 = vector.shape_cast %80 : vector<1x1x32x128xf32> to vector<1x32x128xf32>
      %c9 = arith.constant 9 : index
      %c1_75 = arith.constant 1 : index
      %c0_76 = arith.constant 0 : index
      %82 = vector.load %arg6[%c9, %c1_75, %c0_76] : memref<10x34x128xf32, #tpu.memory_space<vmem>>, vector<1x32x128xf32>
      tpu.vector_store %arg6[%c9, %c1_75, %c0_76], %81 {strides = array<i32>} : memref<10x34x128xf32, #tpu.memory_space<vmem>>, vector<1x32x128xf32>,
    } else {
    }
    %cst_9 = arith.constant 0.000000e+00 : f32
    %14 = vector.broadcast %cst_9 : f32 to vector<256x128xf32>
    %c0_10 = arith.constant 0 : index
    %c0_11 = arith.constant 0 : index
    %c0_12 = arith.constant 0 : index
    %15 = vector.load %arg6[%c0_10, %c0_11, %c0_12] : memref<10x34x128xf32, #tpu.memory_space<vmem>>, vector<10x32x128xf32>
    %16 = vector.shape_cast %15 : vector<10x32x128xf32> to vector<320x128xf32>
    %17 = vector.extract_strided_slice %16 {offsets = [0, 0], sizes = [256, 128], strides = [1, 1]} : vector<320x128xf32> to vector<256x128xf32>
    %c0_13 = arith.constant 0 : index
    %c0_14 = arith.constant 0 : index
    %c0_15 = arith.constant 0 : index
    %c0_16 = arith.constant 0 : index
    %18 = vector.load %arg3[%c0_13, %c0_14, %c0_15, %c0_16] : memref<3x3x128x128xf32, #tpu.memory_space<vmem>>, vector<1x1x128x128xf32>
    %19 = vector.shape_cast %18 : vector<1x1x128x128xf32> to vector<128x128xf32>
    %cst_17 = arith.constant dense<0.000000e+00> : vector<256x128xf32>
    %20 = tpu.matmul %17, %19, %cst_17 {dimension_numbers = #tpu.dot_dimension_numbers<[1], [0], [0], [1], [0, 0, 1, 1], [], []>} : vector<256x128xf32>, vector<128x128xf32>, vector<256x128xf32> -> vector<256x128xf32>
    %21 = arith.addf %14, %20 : vector<256x128xf32>
    %22 = vector.extract_strided_slice %16 {offsets = [32, 0], sizes = [256, 128], strides = [1, 1]} : vector<320x128xf32> to vector<256x128xf32>
    %c1_18 = arith.constant 1 : index
    %c0_19 = arith.constant 0 : index
    %c0_20 = arith.constant 0 : index
    %c0_21 = arith.constant 0 : index
    %23 = vector.load %arg3[%c1_18, %c0_19, %c0_20, %c0_21] : memref<3x3x128x128xf32, #tpu.memory_space<vmem>>, vector<1x1x128x128xf32>
    %24 = vector.shape_cast %23 : vector<1x1x128x128xf32> to vector<128x128xf32>
    %cst_22 = arith.constant dense<0.000000e+00> : vector<256x128xf32>
    %25 = tpu.matmul %22, %24, %cst_22 {dimension_numbers = #tpu.dot_dimension_numbers<[1], [0], [0], [1], [0, 0, 1, 1], [], []>} : vector<256x128xf32>, vector<128x128xf32>, vector<256x128xf32> -> vector<256x128xf32>
    %26 = arith.addf %21, %25 : vector<256x128xf32>
    %27 = vector.extract_strided_slice %16 {offsets = [64, 0], sizes = [256, 128], strides = [1, 1]} : vector<320x128xf32> to vector<256x128xf32>
    %c2 = arith.constant 2 : index
    %c0_23 = arith.constant 0 : index
    %c0_24 = arith.constant 0 : index
    %c0_25 = arith.constant 0 : index
    %28 = vector.load %arg3[%c2, %c0_23, %c0_24, %c0_25] : memref<3x3x128x128xf32, #tpu.memory_space<vmem>>, vector<1x1x128x128xf32>
    %29 = vector.shape_cast %28 : vector<1x1x128x128xf32> to vector<128x128xf32>
    %cst_26 = arith.constant dense<0.000000e+00> : vector<256x128xf32>
    %30 = tpu.matmul %27, %29, %cst_26 {dimension_numbers = #tpu.dot_dimension_numbers<[1], [0], [0], [1], [0, 0, 1, 1], [], []>} : vector<256x128xf32>, vector<128x128xf32>, vector<256x128xf32> -> vector<256x128xf32>
    %31 = arith.addf %26, %30 : vector<256x128xf32>
    %c0_27 = arith.constant 0 : index
    %c1_28 = arith.constant 1 : index
    %c0_29 = arith.constant 0 : index
    %32 = vector.load %arg6[%c0_27, %c1_28, %c0_29] : memref<10x34x128xf32, #tpu.memory_space<vmem>>, vector<10x32x128xf32>
    %33 = vector.shape_cast %32 : vector<10x32x128xf32> to vector<320x128xf32>
    %34 = vector.extract_strided_slice %33 {offsets = [0, 0], sizes = [256, 128], strides = [1, 1]} : vector<320x128xf32> to vector<256x128xf32>
    %c0_30 = arith.constant 0 : index
    %c1_31 = arith.constant 1 : index
    %c0_32 = arith.constant 0 : index
    %c0_33 = arith.constant 0 : index
    %35 = vector.load %arg3[%c0_30, %c1_31, %c0_32, %c0_33] : memref<3x3x128x128xf32, #tpu.memory_space<vmem>>, vector<1x1x128x128xf32>
    %36 = vector.shape_cast %35 : vector<1x1x128x128xf32> to vector<128x128xf32>
    %cst_34 = arith.constant dense<0.000000e+00> : vector<256x128xf32>
    %37 = tpu.matmul %34, %36, %cst_34 {dimension_numbers = #tpu.dot_dimension_numbers<[1], [0], [0], [1], [0, 0, 1, 1], [], []>} : vector<256x128xf32>, vector<128x128xf32>, vector<256x128xf32> -> vector<256x128xf32>
    %38 = arith.addf %31, %37 : vector<256x128xf32>
    %39 = vector.extract_strided_slice %33 {offsets = [32, 0], sizes = [256, 128], strides = [1, 1]} : vector<320x128xf32> to vector<256x128xf32>
    %c1_35 = arith.constant 1 : index
    %c1_36 = arith.constant 1 : index
    %c0_37 = arith.constant 0 : index
    %c0_38 = arith.constant 0 : index
    %40 = vector.load %arg3[%c1_35, %c1_36, %c0_37, %c0_38] : memref<3x3x128x128xf32, #tpu.memory_space<vmem>>, vector<1x1x128x128xf32>
    %41 = vector.shape_cast %40 : vector<1x1x128x128xf32> to vector<128x128xf32>
    %cst_39 = arith.constant dense<0.000000e+00> : vector<256x128xf32>
    %42 = tpu.matmul %39, %41, %cst_39 {dimension_numbers = #tpu.dot_dimension_numbers<[1], [0], [0], [1], [0, 0, 1, 1], [], []>} : vector<256x128xf32>, vector<128x128xf32>, vector<256x128xf32> -> vector<256x128xf32>
    %43 = arith.addf %38, %42 : vector<256x128xf32>
    %44 = vector.extract_strided_slice %33 {offsets = [64, 0], sizes = [256, 128], strides = [1, 1]} : vector<320x128xf32> to vector<256x128xf32>
    %c2_40 = arith.constant 2 : index
    %c1_41 = arith.constant 1 : index
    %c0_42 = arith.constant 0 : index
    %c0_43 = arith.constant 0 : index
    %45 = vector.load %arg3[%c2_40, %c1_41, %c0_42, %c0_43] : memref<3x3x128x128xf32, #tpu.memory_space<vmem>>, vector<1x1x128x128xf32>
    %46 = vector.shape_cast %45 : vector<1x1x128x128xf32> to vector<128x128xf32>
    %cst_44 = arith.constant dense<0.000000e+00> : vector<256x128xf32>
    %47 = tpu.matmul %44, %46, %cst_44 {dimension_numbers = #tpu.dot_dimension_numbers<[1], [0], [0], [1], [0, 0, 1, 1], [], []>} : vector<256x128xf32>, vector<128x128xf32>, vector<256x128xf32> -> vector<256x128xf32>
    %48 = arith.addf %43, %47 : vector<256x128xf32>
    %c0_45 = arith.constant 0 : index
    %c2_46 = arith.constant 2 : index
    %c0_47 = arith.constant 0 : index
    %49 = vector.load %arg6[%c0_45, %c2_46, %c0_47] : memref<10x34x128xf32, #tpu.memory_space<vmem>>, vector<10x32x128xf32>
    %50 = vector.shape_cast %49 : vector<10x32x128xf32> to vector<320x128xf32>
    %51 = vector.extract_strided_slice %50 {offsets = [0, 0], sizes = [256, 128], strides = [1, 1]} : vector<320x128xf32> to vector<256x128xf32>
    %c0_48 = arith.constant 0 : index
    %c2_49 = arith.constant 2 : index
    %c0_50 = arith.constant 0 : index
    %c0_51 = arith.constant 0 : index
    %52 = vector.load %arg3[%c0_48, %c2_49, %c0_50, %c0_51] : memref<3x3x128x128xf32, #tpu.memory_space<vmem>>, vector<1x1x128x128xf32>
    %53 = vector.shape_cast %52 : vector<1x1x128x128xf32> to vector<128x128xf32>
    %cst_52 = arith.constant dense<0.000000e+00> : vector<256x128xf32>
    %54 = tpu.matmul %51, %53, %cst_52 {dimension_numbers = #tpu.dot_dimension_numbers<[1], [0], [0], [1], [0, 0, 1, 1], [], []>} : vector<256x128xf32>, vector<128x128xf32>, vector<256x128xf32> -> vector<256x128xf32>
    %55 = arith.addf %48, %54 : vector<256x128xf32>
    %56 = vector.extract_strided_slice %50 {offsets = [32, 0], sizes = [256, 128], strides = [1, 1]} : vector<320x128xf32> to vector<256x128xf32>
    %c1_53 = arith.constant 1 : index
    %c2_54 = arith.constant 2 : index
    %c0_55 = arith.constant 0 : index
    %c0_56 = arith.constant 0 : index
    %57 = vector.load %arg3[%c1_53, %c2_54, %c0_55, %c0_56] : memref<3x3x128x128xf32, #tpu.memory_space<vmem>>, vector<1x1x128x128xf32>
    %58 = vector.shape_cast %57 : vector<1x1x128x128xf32> to vector<128x128xf32>
    %cst_57 = arith.constant dense<0.000000e+00> : vector<256x128xf32>
    %59 = tpu.matmul %56, %58, %cst_57 {dimension_numbers = #tpu.dot_dimension_numbers<[1], [0], [0], [1], [0, 0, 1, 1], [], []>} : vector<256x128xf32>, vector<128x128xf32>, vector<256x128xf32> -> vector<256x128xf32>
    %60 = arith.addf %55, %59 : vector<256x128xf32>
    %61 = vector.extract_strided_slice %50 {offsets = [64, 0], sizes = [256, 128], strides = [1, 1]} : vector<320x128xf32> to vector<256x128xf32>
    %c2_58 = arith.constant 2 : index
    %c2_59 = arith.constant 2 : index
    %c0_60 = arith.constant 0 : index
    %c0_61 = arith.constant 0 : index
    %62 = vector.load %arg3[%c2_58, %c2_59, %c0_60, %c0_61] : memref<3x3x128x128xf32, #tpu.memory_space<vmem>>, vector<1x1x128x128xf32>
    %63 = vector.shape_cast %62 : vector<1x1x128x128xf32> to vector<128x128xf32>
    %cst_62 = arith.constant dense<0.000000e+00> : vector<256x128xf32>
    %64 = tpu.matmul %61, %63, %cst_62 {dimension_numbers = #tpu.dot_dimension_numbers<[1], [0], [0], [1], [0, 0, 1, 1], [], []>} : vector<256x128xf32>, vector<128x128xf32>, vector<256x128xf32> -> vector<256x128xf32>
    %65 = arith.addf %60, %64 : vector<256x128xf32>
    %c0_63 = arith.constant 0 : index
    %c0_64 = arith.constant 0 : index
    %66 = vector.load %arg4[%c0_63, %c0_64] : memref<1x128xf32, #tpu.memory_space<vmem>>, vector<1x128xf32>
    %67 = vector.broadcast %66 : vector<1x128xf32> to vector<256x128xf32>
    %68 = arith.addf %65, %67 : vector<256x128xf32>
    %cst_65 = arith.constant 0.000000e+00 : f32
    %69 = vector.broadcast %cst_65 : f32 to vector<256x128xf32>
    %70 = arith.cmpf oge, %68, %69 : vector<256x128xf32>
    %cst_66 = arith.constant 0.00999999977 : f32
    %71 = vector.broadcast %cst_66 : f32 to vector<256x128xf32>
    %72 = arith.mulf %68, %71 : vector<256x128xf32>
    %73 = arith.select %70, %68, %72 : vector<256x128xi1>, vector<256x128xf32>
    %74 = vector.shape_cast %73 : vector<256x128xf32> to vector<8x32x128xf32>
    %c0_67 = arith.constant 0 : index
    %c0_68 = arith.constant 0 : index
    %c0_69 = arith.constant 0 : index
    %c0_70 = arith.constant 0 : index
    %75 = vector.load %arg5[%c0_67, %c0_68, %c0_69, %c0_70] : memref<1x8x32x128xf32, #tpu.memory_space<vmem>>, vector<1x8x32x128xf32>
    %76 = vector.shape_cast %75 : vector<1x8x32x128xf32> to vector<8x32x128xf32>
    %77 = vector.shape_cast %74 : vector<8x32x128xf32> to vector<1x8x32x128xf32>
    tpu.vector_store %arg5[%c0_67, %c0_68, %c0_69, %c0_70], %77 {strides = array<i32>} : memref<1x8x32x128xf32, #tpu.memory_space<vmem>>, vector<1x8x32x128xf32>,
    return
  }
  func.func @transform_0(%arg0: i32, %arg1: i32) -> (i32, i32, i32, i32) {
    %c0_i32 = arith.constant 0 : i32
    %c0_i32_0 = arith.constant 0 : i32
    %c0_i32_1 = arith.constant 0 : i32
    %c0_i32_2 = arith.constant 0 : i32
    return %arg0, %c0_i32, %c0_i32_0, %c0_i32_1 : i32, i32, i32, i32
  }
  func.func @transform_1(%arg0: i32, %arg1: i32) -> (i32, i32, i32, i32) {
    %c0_i32 = arith.constant 0 : i32
    %c0_i32_0 = arith.constant 0 : i32
    %c0_i32_1 = arith.constant 0 : i32
    %c0_i32_2 = arith.constant 0 : i32
    %c0_i32_3 = arith.constant 0 : i32
    return %c0_i32, %c0_i32_0, %c0_i32_1, %c0_i32_2 : i32, i32, i32, i32
  }
  func.func @transform_2(%arg0: i32, %arg1: i32) -> (i32, i32) {
    %c0_i32 = arith.constant 0 : i32
    %c0_i32_0 = arith.constant 0 : i32
    %c0_i32_1 = arith.constant 0 : i32
    return %c0_i32, %c0_i32_0 : i32, i32
  }
  func.func @transform_3(%arg0: i32, %arg1: i32) -> (i32, i32, i32, i32) {
    %c0_i32 = arith.constant 0 : i32
    %c0_i32_0 = arith.constant 0 : i32
    %c0_i32_1 = arith.constant 0 : i32
    return %arg0, %arg1, %c0_i32, %c0_i32_0 : i32, i32, i32, i32
  }
}

module attributes {stable_mosaic.version = 11 : i64} {
  func.func @kernel(%arg0: i32, %arg1: i32, %arg2: memref<1x32x32x128xf32, #tpu.memory_space<vmem>>, %arg3: memref<1x8x32x128xf32, #tpu.memory_space<vmem>>, %arg4: memref<3x3x128x128xf32, #tpu.memory_space<vmem>>, %arg5: memref<1x128xf32, #tpu.memory_space<vmem>>, %arg6: memref<1x8x32x128xf32, #tpu.memory_space<vmem>>, %arg7: memref<10x34x128xf32, #tpu.memory_space<vmem>>) attributes {dimension_semantics = [#tpu.dimension_semantics<parallel>, #tpu.dimension_semantics<parallel>], iteration_bounds = array<i64: 2, 4>, scalar_prefetch = 0 : i64, scratch_operands = 1 : i64, tpu.core_type = #tpu.core_type<tc>, window_params = [{transform_indices = @transform_0, window_bounds = array<i64: 1, 32, 32, 128>}, {transform_indices = @transform_1, window_bounds = array<i64: 1, 8, 32, 128>}, {pipeline_mode = #tpu.pipeline_mode<synchronous>, transform_indices = @transform_2, window_bounds = array<i64: 3, 3, 128, 128>}, {pipeline_mode = #tpu.pipeline_mode<synchronous>, transform_indices = @transform_3, window_bounds = array<i64: 1, 128>}, {transform_indices = @transform_4, window_bounds = array<i64: 1, 8, 32, 128>}]} {
    %c8_i32 = arith.constant 8 : i32
    %0 = arith.muli %arg1, %c8_i32 : i32
    %1 = tpu.assume_multiple %0, 8 : i32
    %cst = arith.constant 0.000000e+00 : f32
    %2 = vector.broadcast %cst : f32 to vector<10x34x128xf32>
    %c0 = arith.constant 0 : index
    %c0_0 = arith.constant 0 : index
    %c0_1 = arith.constant 0 : index
    %3 = vector.load %arg7[%c0, %c0_0, %c0_1] : memref<10x34x128xf32, #tpu.memory_space<vmem>>, vector<10x34x128xf32>
    tpu.vector_store %arg7[%c0, %c0_0, %c0_1], %2 {strides = array<i32>} : memref<10x34x128xf32, #tpu.memory_space<vmem>>, vector<10x34x128xf32>,
    %c0_2 = arith.constant 0 : index
    %4 = arith.index_cast %1 : i32 to index
    %c0_3 = arith.constant 0 : index
    %c0_4 = arith.constant 0 : index
    %5 = vector.load %arg2[%c0_2, %4, %c0_3, %c0_4] : memref<1x32x32x128xf32, #tpu.memory_space<vmem>>, vector<1x8x32x128xf32>
    %6 = vector.shape_cast %5 : vector<1x8x32x128xf32> to vector<8x32x128xf32>
    %c1 = arith.constant 1 : index
    %c1_5 = arith.constant 1 : index
    %c0_6 = arith.constant 0 : index
    %7 = vector.load %arg7[%c1, %c1_5, %c0_6] : memref<10x34x128xf32, #tpu.memory_space<vmem>>, vector<8x32x128xf32>
    tpu.vector_store %arg7[%c1, %c1_5, %c0_6], %6 {strides = array<i32>} : memref<10x34x128xf32, #tpu.memory_space<vmem>>, vector<8x32x128xf32>,
    %c0_i32 = arith.constant 0 : i32
    %8 = arith.cmpi sgt, %arg1, %c0_i32 : i32
    %9 = arith.extui %8 : i1 to i32
    %c0_i32_7 = arith.constant 0 : i32
    %10 = arith.cmpi ne, %9, %c0_i32_7 : i32
    scf.if %10 {
      %c1_i32 = arith.constant 1 : i32
      %82 = arith.subi %1, %c1_i32 : i32
      %c0_75 = arith.constant 0 : index
      %83 = arith.index_cast %82 : i32 to index
      %c0_76 = arith.constant 0 : index
      %c0_77 = arith.constant 0 : index
      %84 = vector.load %arg2[%c0_75, %83, %c0_76, %c0_77] : memref<1x32x32x128xf32, #tpu.memory_space<vmem>>, vector<1x1x32x128xf32>
      %85 = vector.shape_cast %84 : vector<1x1x32x128xf32> to vector<1x32x128xf32>
      %c0_78 = arith.constant 0 : index
      %c1_79 = arith.constant 1 : index
      %c0_80 = arith.constant 0 : index
      %86 = vector.load %arg7[%c0_78, %c1_79, %c0_80] : memref<10x34x128xf32, #tpu.memory_space<vmem>>, vector<1x32x128xf32>
      tpu.vector_store %arg7[%c0_78, %c1_79, %c0_80], %85 {strides = array<i32>} : memref<10x34x128xf32, #tpu.memory_space<vmem>>, vector<1x32x128xf32>,
    } else {
    }
    %c3_i32 = arith.constant 3 : i32
    %11 = arith.cmpi slt, %arg1, %c3_i32 : i32
    %12 = arith.extui %11 : i1 to i32
    %c0_i32_8 = arith.constant 0 : i32
    %13 = arith.cmpi ne, %12, %c0_i32_8 : i32
    scf.if %13 {
      %c8_i32_75 = arith.constant 8 : i32
      %82 = arith.addi %1, %c8_i32_75 : i32
      %c0_76 = arith.constant 0 : index
      %83 = arith.index_cast %82 : i32 to index
      %c0_77 = arith.constant 0 : index
      %c0_78 = arith.constant 0 : index
      %84 = vector.load %arg2[%c0_76, %83, %c0_77, %c0_78] : memref<1x32x32x128xf32, #tpu.memory_space<vmem>>, vector<1x1x32x128xf32>
      %85 = vector.shape_cast %84 : vector<1x1x32x128xf32> to vector<1x32x128xf32>
      %c9 = arith.constant 9 : index
      %c1_79 = arith.constant 1 : index
      %c0_80 = arith.constant 0 : index
      %86 = vector.load %arg7[%c9, %c1_79, %c0_80] : memref<10x34x128xf32, #tpu.memory_space<vmem>>, vector<1x32x128xf32>
      tpu.vector_store %arg7[%c9, %c1_79, %c0_80], %85 {strides = array<i32>} : memref<10x34x128xf32, #tpu.memory_space<vmem>>, vector<1x32x128xf32>,
    } else {
    }
    %cst_9 = arith.constant 0.000000e+00 : f32
    %14 = vector.broadcast %cst_9 : f32 to vector<256x128xf32>
    %c0_10 = arith.constant 0 : index
    %c0_11 = arith.constant 0 : index
    %c0_12 = arith.constant 0 : index
    %15 = vector.load %arg7[%c0_10, %c0_11, %c0_12] : memref<10x34x128xf32, #tpu.memory_space<vmem>>, vector<10x32x128xf32>
    %16 = vector.shape_cast %15 : vector<10x32x128xf32> to vector<320x128xf32>
    %17 = vector.extract_strided_slice %16 {offsets = [0, 0], sizes = [256, 128], strides = [1, 1]} : vector<320x128xf32> to vector<256x128xf32>
    %c0_13 = arith.constant 0 : index
    %c0_14 = arith.constant 0 : index
    %c0_15 = arith.constant 0 : index
    %c0_16 = arith.constant 0 : index
    %18 = vector.load %arg4[%c0_13, %c0_14, %c0_15, %c0_16] : memref<3x3x128x128xf32, #tpu.memory_space<vmem>>, vector<1x1x128x128xf32>
    %19 = vector.shape_cast %18 : vector<1x1x128x128xf32> to vector<128x128xf32>
    %cst_17 = arith.constant dense<0.000000e+00> : vector<256x128xf32>
    %20 = tpu.matmul %17, %19, %cst_17 {dimension_numbers = #tpu.dot_dimension_numbers<[1], [0], [0], [1], [0, 0, 1, 1], [], []>} : vector<256x128xf32>, vector<128x128xf32>, vector<256x128xf32> -> vector<256x128xf32>
    %21 = arith.addf %14, %20 : vector<256x128xf32>
    %22 = vector.extract_strided_slice %16 {offsets = [32, 0], sizes = [256, 128], strides = [1, 1]} : vector<320x128xf32> to vector<256x128xf32>
    %c1_18 = arith.constant 1 : index
    %c0_19 = arith.constant 0 : index
    %c0_20 = arith.constant 0 : index
    %c0_21 = arith.constant 0 : index
    %23 = vector.load %arg4[%c1_18, %c0_19, %c0_20, %c0_21] : memref<3x3x128x128xf32, #tpu.memory_space<vmem>>, vector<1x1x128x128xf32>
    %24 = vector.shape_cast %23 : vector<1x1x128x128xf32> to vector<128x128xf32>
    %cst_22 = arith.constant dense<0.000000e+00> : vector<256x128xf32>
    %25 = tpu.matmul %22, %24, %cst_22 {dimension_numbers = #tpu.dot_dimension_numbers<[1], [0], [0], [1], [0, 0, 1, 1], [], []>} : vector<256x128xf32>, vector<128x128xf32>, vector<256x128xf32> -> vector<256x128xf32>
    %26 = arith.addf %21, %25 : vector<256x128xf32>
    %27 = vector.extract_strided_slice %16 {offsets = [64, 0], sizes = [256, 128], strides = [1, 1]} : vector<320x128xf32> to vector<256x128xf32>
    %c2 = arith.constant 2 : index
    %c0_23 = arith.constant 0 : index
    %c0_24 = arith.constant 0 : index
    %c0_25 = arith.constant 0 : index
    %28 = vector.load %arg4[%c2, %c0_23, %c0_24, %c0_25] : memref<3x3x128x128xf32, #tpu.memory_space<vmem>>, vector<1x1x128x128xf32>
    %29 = vector.shape_cast %28 : vector<1x1x128x128xf32> to vector<128x128xf32>
    %cst_26 = arith.constant dense<0.000000e+00> : vector<256x128xf32>
    %30 = tpu.matmul %27, %29, %cst_26 {dimension_numbers = #tpu.dot_dimension_numbers<[1], [0], [0], [1], [0, 0, 1, 1], [], []>} : vector<256x128xf32>, vector<128x128xf32>, vector<256x128xf32> -> vector<256x128xf32>
    %31 = arith.addf %26, %30 : vector<256x128xf32>
    %c0_27 = arith.constant 0 : index
    %c1_28 = arith.constant 1 : index
    %c0_29 = arith.constant 0 : index
    %32 = vector.load %arg7[%c0_27, %c1_28, %c0_29] : memref<10x34x128xf32, #tpu.memory_space<vmem>>, vector<10x32x128xf32>
    %33 = vector.shape_cast %32 : vector<10x32x128xf32> to vector<320x128xf32>
    %34 = vector.extract_strided_slice %33 {offsets = [0, 0], sizes = [256, 128], strides = [1, 1]} : vector<320x128xf32> to vector<256x128xf32>
    %c0_30 = arith.constant 0 : index
    %c1_31 = arith.constant 1 : index
    %c0_32 = arith.constant 0 : index
    %c0_33 = arith.constant 0 : index
    %35 = vector.load %arg4[%c0_30, %c1_31, %c0_32, %c0_33] : memref<3x3x128x128xf32, #tpu.memory_space<vmem>>, vector<1x1x128x128xf32>
    %36 = vector.shape_cast %35 : vector<1x1x128x128xf32> to vector<128x128xf32>
    %cst_34 = arith.constant dense<0.000000e+00> : vector<256x128xf32>
    %37 = tpu.matmul %34, %36, %cst_34 {dimension_numbers = #tpu.dot_dimension_numbers<[1], [0], [0], [1], [0, 0, 1, 1], [], []>} : vector<256x128xf32>, vector<128x128xf32>, vector<256x128xf32> -> vector<256x128xf32>
    %38 = arith.addf %31, %37 : vector<256x128xf32>
    %39 = vector.extract_strided_slice %33 {offsets = [32, 0], sizes = [256, 128], strides = [1, 1]} : vector<320x128xf32> to vector<256x128xf32>
    %c1_35 = arith.constant 1 : index
    %c1_36 = arith.constant 1 : index
    %c0_37 = arith.constant 0 : index
    %c0_38 = arith.constant 0 : index
    %40 = vector.load %arg4[%c1_35, %c1_36, %c0_37, %c0_38] : memref<3x3x128x128xf32, #tpu.memory_space<vmem>>, vector<1x1x128x128xf32>
    %41 = vector.shape_cast %40 : vector<1x1x128x128xf32> to vector<128x128xf32>
    %cst_39 = arith.constant dense<0.000000e+00> : vector<256x128xf32>
    %42 = tpu.matmul %39, %41, %cst_39 {dimension_numbers = #tpu.dot_dimension_numbers<[1], [0], [0], [1], [0, 0, 1, 1], [], []>} : vector<256x128xf32>, vector<128x128xf32>, vector<256x128xf32> -> vector<256x128xf32>
    %43 = arith.addf %38, %42 : vector<256x128xf32>
    %44 = vector.extract_strided_slice %33 {offsets = [64, 0], sizes = [256, 128], strides = [1, 1]} : vector<320x128xf32> to vector<256x128xf32>
    %c2_40 = arith.constant 2 : index
    %c1_41 = arith.constant 1 : index
    %c0_42 = arith.constant 0 : index
    %c0_43 = arith.constant 0 : index
    %45 = vector.load %arg4[%c2_40, %c1_41, %c0_42, %c0_43] : memref<3x3x128x128xf32, #tpu.memory_space<vmem>>, vector<1x1x128x128xf32>
    %46 = vector.shape_cast %45 : vector<1x1x128x128xf32> to vector<128x128xf32>
    %cst_44 = arith.constant dense<0.000000e+00> : vector<256x128xf32>
    %47 = tpu.matmul %44, %46, %cst_44 {dimension_numbers = #tpu.dot_dimension_numbers<[1], [0], [0], [1], [0, 0, 1, 1], [], []>} : vector<256x128xf32>, vector<128x128xf32>, vector<256x128xf32> -> vector<256x128xf32>
    %48 = arith.addf %43, %47 : vector<256x128xf32>
    %c0_45 = arith.constant 0 : index
    %c2_46 = arith.constant 2 : index
    %c0_47 = arith.constant 0 : index
    %49 = vector.load %arg7[%c0_45, %c2_46, %c0_47] : memref<10x34x128xf32, #tpu.memory_space<vmem>>, vector<10x32x128xf32>
    %50 = vector.shape_cast %49 : vector<10x32x128xf32> to vector<320x128xf32>
    %51 = vector.extract_strided_slice %50 {offsets = [0, 0], sizes = [256, 128], strides = [1, 1]} : vector<320x128xf32> to vector<256x128xf32>
    %c0_48 = arith.constant 0 : index
    %c2_49 = arith.constant 2 : index
    %c0_50 = arith.constant 0 : index
    %c0_51 = arith.constant 0 : index
    %52 = vector.load %arg4[%c0_48, %c2_49, %c0_50, %c0_51] : memref<3x3x128x128xf32, #tpu.memory_space<vmem>>, vector<1x1x128x128xf32>
    %53 = vector.shape_cast %52 : vector<1x1x128x128xf32> to vector<128x128xf32>
    %cst_52 = arith.constant dense<0.000000e+00> : vector<256x128xf32>
    %54 = tpu.matmul %51, %53, %cst_52 {dimension_numbers = #tpu.dot_dimension_numbers<[1], [0], [0], [1], [0, 0, 1, 1], [], []>} : vector<256x128xf32>, vector<128x128xf32>, vector<256x128xf32> -> vector<256x128xf32>
    %55 = arith.addf %48, %54 : vector<256x128xf32>
    %56 = vector.extract_strided_slice %50 {offsets = [32, 0], sizes = [256, 128], strides = [1, 1]} : vector<320x128xf32> to vector<256x128xf32>
    %c1_53 = arith.constant 1 : index
    %c2_54 = arith.constant 2 : index
    %c0_55 = arith.constant 0 : index
    %c0_56 = arith.constant 0 : index
    %57 = vector.load %arg4[%c1_53, %c2_54, %c0_55, %c0_56] : memref<3x3x128x128xf32, #tpu.memory_space<vmem>>, vector<1x1x128x128xf32>
    %58 = vector.shape_cast %57 : vector<1x1x128x128xf32> to vector<128x128xf32>
    %cst_57 = arith.constant dense<0.000000e+00> : vector<256x128xf32>
    %59 = tpu.matmul %56, %58, %cst_57 {dimension_numbers = #tpu.dot_dimension_numbers<[1], [0], [0], [1], [0, 0, 1, 1], [], []>} : vector<256x128xf32>, vector<128x128xf32>, vector<256x128xf32> -> vector<256x128xf32>
    %60 = arith.addf %55, %59 : vector<256x128xf32>
    %61 = vector.extract_strided_slice %50 {offsets = [64, 0], sizes = [256, 128], strides = [1, 1]} : vector<320x128xf32> to vector<256x128xf32>
    %c2_58 = arith.constant 2 : index
    %c2_59 = arith.constant 2 : index
    %c0_60 = arith.constant 0 : index
    %c0_61 = arith.constant 0 : index
    %62 = vector.load %arg4[%c2_58, %c2_59, %c0_60, %c0_61] : memref<3x3x128x128xf32, #tpu.memory_space<vmem>>, vector<1x1x128x128xf32>
    %63 = vector.shape_cast %62 : vector<1x1x128x128xf32> to vector<128x128xf32>
    %cst_62 = arith.constant dense<0.000000e+00> : vector<256x128xf32>
    %64 = tpu.matmul %61, %63, %cst_62 {dimension_numbers = #tpu.dot_dimension_numbers<[1], [0], [0], [1], [0, 0, 1, 1], [], []>} : vector<256x128xf32>, vector<128x128xf32>, vector<256x128xf32> -> vector<256x128xf32>
    %65 = arith.addf %60, %64 : vector<256x128xf32>
    %c0_63 = arith.constant 0 : index
    %c0_64 = arith.constant 0 : index
    %66 = vector.load %arg5[%c0_63, %c0_64] : memref<1x128xf32, #tpu.memory_space<vmem>>, vector<1x128xf32>
    %67 = vector.broadcast %66 : vector<1x128xf32> to vector<256x128xf32>
    %68 = arith.addf %65, %67 : vector<256x128xf32>
    %c0_65 = arith.constant 0 : index
    %c0_66 = arith.constant 0 : index
    %c0_67 = arith.constant 0 : index
    %c0_68 = arith.constant 0 : index
    %69 = vector.load %arg3[%c0_65, %c0_66, %c0_67, %c0_68] : memref<1x8x32x128xf32, #tpu.memory_space<vmem>>, vector<1x8x32x128xf32>
    %70 = vector.shape_cast %69 : vector<1x8x32x128xf32> to vector<8x32x128xf32>
    %71 = vector.shape_cast %70 : vector<8x32x128xf32> to vector<256x128xf32>
    %72 = arith.addf %68, %71 : vector<256x128xf32>
    %cst_69 = arith.constant 0.000000e+00 : f32
    %73 = vector.broadcast %cst_69 : f32 to vector<256x128xf32>
    %74 = arith.cmpf oge, %72, %73 : vector<256x128xf32>
    %cst_70 = arith.constant 0.00999999977 : f32
    %75 = vector.broadcast %cst_70 : f32 to vector<256x128xf32>
    %76 = arith.mulf %72, %75 : vector<256x128xf32>
    %77 = arith.select %74, %72, %76 : vector<256x128xi1>, vector<256x128xf32>
    %78 = vector.shape_cast %77 : vector<256x128xf32> to vector<8x32x128xf32>
    %c0_71 = arith.constant 0 : index
    %c0_72 = arith.constant 0 : index
    %c0_73 = arith.constant 0 : index
    %c0_74 = arith.constant 0 : index
    %79 = vector.load %arg6[%c0_71, %c0_72, %c0_73, %c0_74] : memref<1x8x32x128xf32, #tpu.memory_space<vmem>>, vector<1x8x32x128xf32>
    %80 = vector.shape_cast %79 : vector<1x8x32x128xf32> to vector<8x32x128xf32>
    %81 = vector.shape_cast %78 : vector<8x32x128xf32> to vector<1x8x32x128xf32>
    tpu.vector_store %arg6[%c0_71, %c0_72, %c0_73, %c0_74], %81 {strides = array<i32>} : memref<1x8x32x128xf32, #tpu.memory_space<vmem>>, vector<1x8x32x128xf32>,
    return
  }
  func.func @transform_0(%arg0: i32, %arg1: i32) -> (i32, i32, i32, i32) {
    %c0_i32 = arith.constant 0 : i32
    %c0_i32_0 = arith.constant 0 : i32
    %c0_i32_1 = arith.constant 0 : i32
    %c0_i32_2 = arith.constant 0 : i32
    return %arg0, %c0_i32, %c0_i32_0, %c0_i32_1 : i32, i32, i32, i32
  }
  func.func @transform_1(%arg0: i32, %arg1: i32) -> (i32, i32, i32, i32) {
    %c0_i32 = arith.constant 0 : i32
    %c0_i32_0 = arith.constant 0 : i32
    %c0_i32_1 = arith.constant 0 : i32
    return %arg0, %arg1, %c0_i32, %c0_i32_0 : i32, i32, i32, i32
  }
  func.func @transform_2(%arg0: i32, %arg1: i32) -> (i32, i32, i32, i32) {
    %c0_i32 = arith.constant 0 : i32
    %c0_i32_0 = arith.constant 0 : i32
    %c0_i32_1 = arith.constant 0 : i32
    %c0_i32_2 = arith.constant 0 : i32
    %c0_i32_3 = arith.constant 0 : i32
    return %c0_i32, %c0_i32_0, %c0_i32_1, %c0_i32_2 : i32, i32, i32, i32
  }
  func.func @transform_3(%arg0: i32, %arg1: i32) -> (i32, i32) {
    %c0_i32 = arith.constant 0 : i32
    %c0_i32_0 = arith.constant 0 : i32
    %c0_i32_1 = arith.constant 0 : i32
    return %c0_i32, %c0_i32_0 : i32, i32
  }
  func.func @transform_4(%arg0: i32, %arg1: i32) -> (i32, i32, i32, i32) {
    %c0_i32 = arith.constant 0 : i32
    %c0_i32_0 = arith.constant 0 : i32
    %c0_i32_1 = arith.constant 0 : i32
    return %arg0, %arg1, %c0_i32, %c0_i32_0 : i32, i32, i32, i32
  }
}

</mosaic_0001>

<bundles_post_ra>
// kernel: resnet_block_forward.3
= control target key start
LH: loop header
LB: loop body
LE: loop exit
PB: predicated region body
PF: predicated region fallthrough
CT: control target
= control target key end

     0   :  { %s3636_s0 = inlined_call_operand.vmem [shape: f32[2,32,32,128], index: 0, kind: input, shape index: {}]   ;;  %s3637_s1 = inlined_call_operand.hbm [shape: f32[2,32,32,128], index: 1, kind: input, shape index: {}]   ;;  %s3638_s2 = inlined_call_operand.hbm [shape: f32[3,3,128,128], index: 2, kind: input, shape index: {}]   ;;  %s3639_s3 = inlined_call_operand.vmem [shape: f32[1,128], index: 3, kind: input, shape index: {}]   ;;  %s3640_s4 = inlined_call_operand.hbm [shape: f32[2,32,32,128], index: 4, kind: output, shape index: {}]  }
   0x1   :  { %3652 = sst [smem:[#allocation31_spill]] %s3638_s2 }
   0x2   :  { %3653 = sst [smem:[#allocation32_spill]] %s3640_s4 }
   0x3   :  { %9 = vsyncpa [#allocation4], 0 }
   0x4   :  { %11 = vsyncpa [#allocation4 + $0x1], 0 }
   0x5   :  { %12 = vsyncpa [#allocation7], 0 }
   0x6   :  { %13 = vsyncpa [#allocation5], 0 }
   0x7   :  { %15 = vsyncpa [#allocation5 + $0x1], 0  ;;  %s2688_s15 = smov 0   ;;  %s2690_s16 = smov 0  }
   0x8   :  { %s2692_s17 = smov 0   ;;  %s2694_s18 = smov 0  }
   0x9   :  { %s2696_s19 = smov 0   ;;  %s2698_s20 = smov 0  }
   0xa   :  { %s2700_s21 = smov 0   ;;  %s2702_s22 = smov 0  }
   0xb LB: > { %3654 = sst [smem:[#allocation12_spill]] %s2627_s15  ;;  %s2305_s23 = sadd.s32 4294967295, %s2655_s22   ;;  %s2655_s22 = sphi %s2702_s22, %s21_s22   ;;  %s2651_s21 = sphi %s2700_s21, %s3708_s21   ;;  %s2647_s20 = sphi %s2698_s20, %s3707_s20   ;;  %s2643_s19 = sphi %s2696_s19, %s3706_s19   ;;  %s2639_s18 = sphi %s2694_s18, %s3705_s18   ;;  %s2635_s17 = sphi %s2692_s17, %s3704_s17   ;;  %s2631_s16 = sphi %s2690_s16, %s3703_s16   ;;  %s2627_s15 = sphi %s2688_s15, %s3702_s15  }
   0xc   : > { %s2306_s24 = sadd.s32 4294967294, %s2655_s22   ;;  %p81_p0 = scmp.ne.s32.totalorder %s2631_s16, %s2627_s15 }
   0xd   : > { %p2732_p1 = scmp.eq.s32.totalorder %s2305_s23, 0  ;;  %p155_p2 = scmp.eq.s32.totalorder %s2306_s24, 7 }
   0xe   : > { %p2307_p4 = scmp.ge.s32.totalorder %s2655_s22, 1  ;;  %p162_p6 = scmp.lt.s32.totalorder %s2655_s22, 9 }
   0xf   : > { %p2738_p3 = por %p2732_p1, %p81_p0  ;;  %p2743_p5 = por %p155_p2, %p81_p0 }
  0x10   : > { %s3659_s2 = sld [smem:[#allocation31_spill]]  ;;  %p2751_p7 = pnand %p2307_p4, %p162_p6 }
  0x11   : > { %s3657_s27 = scalar_select %p2743_p5, 1, 0 }
  0x12   : > { %p2401_p8 = pneg %p2751_p7  ;;  %s2657_s6 = smov [#allocation6]  }
  0x13   : > { %3658 = sst [smem:[#allocation13_spill]] %s3657_s27  ;;  %s175_s7 = sshll.u32 %s2657_s6, 4  ;;  %s176_s7 = int_to_ptr.vmem [resolvable:$true] %s175_s7 }
  0x14   : > { %p2402_p9 = pnand %p2401_p8, %p2732_p1  ;;  %s3641_s8 = smov 128  }
  0x15   : > { %s3642_s9 = smov 8   ;;  %s30_s10 = sadd.s32 1, %s2647_s20 }
  0x16   : > { %s173_s30 = sshll.u32 %s3659_s2, 4  ;;  %p31_p10 = scmp.ge.s32.totalorder %s30_s10, 4  ;;  %s174_s30 = int_to_ptr.hbm [resolvable:$true] %s173_s30 }
  0x17   : > { %2404 = dma.hbm_to_vmem [thread:$0]  (!%p2402_p9), %s174_s30, 18432, %s176_s7, [#allocation7], %s3641_s8, %s3641_s8, %s3642_s9  }
  0x18   : > { %s33_s11 = sadd.s32 1, %s2651_s21  ;;  %p149_p11 = scmp.eq.s32.totalorder %s2305_s23, 7 }
  0x19   : > { %p75_p12 = scmp.ne.s32.totalorder %s2635_s17, %s2631_s16  ;;  %s3710_s10 = smov (%p31_p10, %s30_s10), 0 }
  0x1a   : > { %3661 = sst [smem:[#allocation14_spill]] %s3710_s10  ;;  %s3712_s11 = smov (!%p31_p10, %s33_s11), %s2651_s21 }
  0x1b   : > { %s68_s12 = sadd.s32 1, %s2635_s17  ;;  %p76_p13 = scmp.eq.s32.totalorder %s2655_s22, 0 }
  0x1c   : > { %p35_p0 = scmp.ge.s32.totalorder %s3712_s11, 2  ;;  %p2771_p2 = por %p149_p11, %p75_p12 }
  0x1d   : > { %s64_s14 = ssub.s32 %s2647_s20, %s3710_s10  ;;  %p2777_p4 = por %p76_p13, %p75_p12 }
  0x1e   : > { %s3662_s13 = scalar_select %p2771_p2, 1, 0 }
  0x1f   : > { %s3714_s11 = smov (%p35_p0, %s3712_s11), 0  ;;  %p2414_p6 = scmp.lt.s32.totalorder %s2655_s22, 8 }
  0x20   : > { %3663 = sst [smem:[#allocation15_spill]] %s3662_s13  ;;  %s200_s23 = sand.u32 1, %s2635_s17  }
  0x21   : > { %3665 = sst [smem:[#allocation16_spill]] %s3714_s11  ;;  %s63_s28 = ssub.s32 %s2651_s21, %s3714_s11 }
  0x22   : > { %s2340_s29 = sshll.u32 %s2647_s20, 5  ;;  %s65_s30 = sor.u32 %s64_s14, %s63_s28 }
  0x23   : > { %s2310_s6 = sshll.u32 %s200_s23, 8  ;;  %p66_p8 = scmp.eq.s32.totalorder %s65_s30, 0 }
  0x24   : > { %s2313_s7 = sshll.u32 %s2651_s21, 7  ;;  %s204_s8 = scalar_lea.vmem [#allocation3], %s2310_s6 }
  0x25   : > { %s215_s9 = sshll.u32 %s204_s8, 4  ;;  %s210_s10 = sadd.s32 %s2340_s29, %s2313_s7  ;;  %s216_s9 = int_to_ptr.vmem [resolvable:$true] %s215_s9 }
  0x26   : > { %s2790_s2 = scalar_select %p66_p8, %s2635_s17, %s68_s12  }
  0x27   : > { %s2314_s27 = sshll.u32 %s210_s10, 3  ;;  %p2406_p9 = pnand %p2414_p6, %p2777_p4 }
  0x28   : > { %s212_s4 = scalar_lea.hbm %s3637_s1, %s2314_s27  ;;  %s201_s14 = scalar_lea.sflag [#allocation4], %s200_s23 }
  0x29   : > { %s213_s11 = sshll.u32 %s212_s4, 4  ;;  %s3666_s28 = smov 8   ;;  %s214_s11 = int_to_ptr.hbm [resolvable:$true] %s213_s11 }
  0x2a   : > { %s3667_s30 = smov 128   ;;  %227 = sbr.rel (%p2751_p7) target bundleno = 902 (0x386), region = 36 }
  0x2b   : > { %2408 = dma.hbm_to_vmem [thread:$0]  (!%p2406_p9), %s214_s11, 4096, %s216_s9, %s201_s14, %s3667_s30, %s3667_s30, %s3666_s28  }
  0x2f   : > { %s2805_s8 = sand.u32 1, %s2631_s16  }
  0x30   : > { %s2316_s15 = sshll.u32 %s2805_s8, 8  ;;  %s230_s27 = scalar_lea.sflag [#allocation4], %s2805_s8 }
  0x31   : > { %s2811_s4 = scalar_lea.vmem [#allocation3], %s2316_s15 }
  0x32   : > { %2614 = dma.done.wait (%p2738_p3), %s230_s27, 4096  }
  0x33   : > { %2616 = vsyncadd (%p2738_p3), %s230_s27, 4294963200 }
  0x34   : > { %2618 = dma.done.wait (%p2732_p1), [#allocation7], 18432  }
  0x35   : > { %2620 = vsyncadd (%p2732_p1), [#allocation7], 4294948864  ;;  %s2321_s5 = sshll.u32 %s2639_s18, 3  ;;  %v2660_v0 = vmov 0.0   ;;  %p269_p1 = scmp.lt.s32.totalorder %s2643_s19, 1 }
  0x36   : > { %282 = vst [vmem:[#allocation2 + $0x28] sm:$0xff] %v2660_v0  ;;  %s2342_s12 = sshll.u32 %s2639_s18, 8  ;;  %s2867_s24 = scalar_lea.vmem [#allocation8], %s2316_s15 }
  0x37   : > { %277 = vst [vmem:[#allocation2] sm:$0xff] %v2660_v0  ;;  %s270_s25 = scalar_select %p269_p1, %s2643_s19, 1 }
  0x38   : > { %278 = vst [vmem:[#allocation2 + $0x8] sm:$0xff] %v2660_v0  ;;  %p2323_p3 = scmp.le.s32.totalorder %s2639_s18, 0 }
  0x39   : > { %279 = vst [vmem:[#allocation2 + $0x10] sm:$0xff] %v2660_v0  ;;  %s2341_s26 = sshll.u32 %s270_s25, 10  ;;  %s2324_s23 = sadd.s32 (!%p2323_p3), 4294967295, %s2321_s5 }
  0x3a   : > { %280 = vst [vmem:[#allocation2 + $0x18] sm:$0xff] %v2660_v0  ;;  %s2827_s11 = scalar_lea.vmem %s3636_s0, %s2341_s26  ;;  %s2325_s29 = sshll.u32 (!%p2323_p3), %s2324_s23, 5 }
  0x3b   : > { %281 = vst [vmem:[#allocation2 + $0x20] sm:$0x3] %v2660_v0  ;;  %s2831_s13 = scalar_lea.vmem %s2827_s11, %s2342_s12  ;;  %s400_s6 = scalar_lea.vmem (!%p2323_p3), %s2827_s11, %s2325_s29 }
  0x3c   : > { %283 = vst [vmem:[#allocation2 + $0x30] sm:$0xff] %v2660_v0  ;;  %v329_v1 = vld [vmem:[%s2831_s13] sm:$0xff]  ;;  %v330_v2 = vld [vmem:[%s2831_s13 + $0x8] sm:$0xff]  ;;  %v331_v3 = vld [vmem:[%s2831_s13 + $0x10] sm:$0xff] }
  0x3d   : > { %284 = vst [vmem:[#allocation2 + $0x38] sm:$0xff] %v2660_v0  ;;  %v332_v4 = vld [vmem:[%s2831_s13 + $0x18] sm:$0xff]  ;;  %v333_v5 = vld [vmem:[%s2831_s13 + $0x20] sm:$0xff]  ;;  %v334_v6 = vld [vmem:[%s2831_s13 + $0x28] sm:$0xff] }
  0x3e   : > { %285 = vst [vmem:[#allocation2 + $0x40] sm:$0xff] %v2660_v0  ;;  %v335_v7 = vld [vmem:[%s2831_s13 + $0x30] sm:$0xff]  ;;  %v336_v8 = vld [vmem:[%s2831_s13 + $0x38] sm:$0xff]  ;;  %v337_v9 = vld [vmem:[%s2831_s13 + $0x40] sm:$0xff] }
  0x3f   : > { %286 = vst [vmem:[#allocation2 + $0x48] sm:$0x3] %v2660_v0  ;;  %v338_v10 = vld [vmem:[%s2831_s13 + $0x48] sm:$0xff]  ;;  %v339_v11 = vld [vmem:[%s2831_s13 + $0x50] sm:$0xff]  ;;  %v340_v12 = vld [vmem:[%s2831_s13 + $0x58] sm:$0xff] }
  0x40   : > { %287 = vst [vmem:[#allocation2 + $0x50] sm:$0xff] %v2660_v0  ;;  %v341_v13 = vld [vmem:[%s2831_s13 + $0x60] sm:$0xff]  ;;  %v342_v14 = vld [vmem:[%s2831_s13 + $0x68] sm:$0xff]  ;;  %v343_v15 = vld [vmem:[%s2831_s13 + $0x70] sm:$0xff] }
  0x41   : > { %288 = vst [vmem:[#allocation2 + $0x58] sm:$0xff] %v2660_v0  ;;  %v344_v16 = vld [vmem:[%s2831_s13 + $0x78] sm:$0xff]  ;;  %v345_v17 = vld [vmem:[%s2831_s13 + $0x80] sm:$0xff]  ;;  %v346_v18 = vld [vmem:[%s2831_s13 + $0x88] sm:$0xff] }
  0x42   : > { %289 = vst [vmem:[#allocation2 + $0x60] sm:$0xff] %v2660_v0  ;;  %v347_v19 = vld [vmem:[%s2831_s13 + $0x90] sm:$0xff]  ;;  %v348_v20 = vld [vmem:[%s2831_s13 + $0x98] sm:$0xff]  ;;  %v349_v21 = vld [vmem:[%s2831_s13 + $0xa0] sm:$0xff] }
  0x43   : > { %290 = vst [vmem:[#allocation2 + $0x68] sm:$0xff] %v2660_v0  ;;  %v350_v22 = vld [vmem:[%s2831_s13 + $0xa8] sm:$0xff]  ;;  %v351_v23 = vld [vmem:[%s2831_s13 + $0xb0] sm:$0xff]  ;;  %v352_v24 = vld [vmem:[%s2831_s13 + $0xb8] sm:$0xff] }
  0x44   : > { %291 = vst [vmem:[#allocation2 + $0x70] sm:$0x3] %v2660_v0  ;;  %v353_v25 = vld [vmem:[%s2831_s13 + $0xc0] sm:$0xff]  ;;  %v354_v26 = vld [vmem:[%s2831_s13 + $0xc8] sm:$0xff]  ;;  %v355_v27 = vld [vmem:[%s2831_s13 + $0xd0] sm:$0xff] }
  0x45   : > { %292 = vst [vmem:[#allocation2 + $0x78] sm:$0xff] %v2660_v0  ;;  %v356_v28 = vld [vmem:[%s2831_s13 + $0xd8] sm:$0xff]  ;;  %v357_v29 = vld [vmem:[%s2831_s13 + $0xe0] sm:$0xff]  ;;  %v358_v30 = vld [vmem:[%s2831_s13 + $0xe8] sm:$0xff] }
  0x46   : > { %293 = vst [vmem:[#allocation2 + $0x80] sm:$0xff] %v2660_v0  ;;  %v359_v31 = vld [vmem:[%s2831_s13 + $0xf0] sm:$0xff]  ;;  %v360_v32 = vld [vmem:[%s2831_s13 + $0xf8] sm:$0xff] }
  0x47   : > { %294 = vst [vmem:[#allocation2 + $0x88] sm:$0xff] %v2660_v0 }
  0x48   : > { %295 = vst [vmem:[#allocation2 + $0x90] sm:$0xff] %v2660_v0 }
  0x49   : > { %296 = vst [vmem:[#allocation2 + $0x98] sm:$0x3] %v2660_v0 }
  0x4a   : > { %297 = vst [vmem:[#allocation2 + $0xa0] sm:$0xff] %v2660_v0 }
  0x4b   : > { %298 = vst [vmem:[#allocation2 + $0xa8] sm:$0xff] %v2660_v0 }
  0x4c   : > { %299 = vst [vmem:[#allocation2 + $0xb0] sm:$0xff] %v2660_v0 }
  0x4d   : > { %300 = vst [vmem:[#allocation2 + $0xb8] sm:$0xff] %v2660_v0 }
  0x4e   : > { %301 = vst [vmem:[#allocation2 + $0xc0] sm:$0x3] %v2660_v0 }
  0x4f   : > { %302 = vst [vmem:[#allocation2 + $0xc8] sm:$0xff] %v2660_v0 }
  0x50   : > { %303 = vst [vmem:[#allocation2 + $0xd0] sm:$0xff] %v2660_v0 }
  0x51   : > { %304 = vst [vmem:[#allocation2 + $0xd8] sm:$0xff] %v2660_v0 }
  0x52   : > { %305 = vst [vmem:[#allocation2 + $0xe0] sm:$0xff] %v2660_v0 }
  0x53   : > { %306 = vst [vmem:[#allocation2 + $0xe8] sm:$0x3] %v2660_v0 }
  0x54   : > { %307 = vst [vmem:[#allocation2 + $0xf0] sm:$0xff] %v2660_v0 }
  0x55   : > { %308 = vst [vmem:[#allocation2 + $0xf8] sm:$0xff] %v2660_v0 }
  0x56   : > { %309 = vst [vmem:[#allocation2 + $0x100] sm:$0xff] %v2660_v0 }
  0x57   : > { %310 = vst [vmem:[#allocation2 + $0x108] sm:$0xff] %v2660_v0 }
  0x58   : > { %311 = vst [vmem:[#allocation2 + $0x110] sm:$0x3] %v2660_v0 }
  0x59   : > { %312 = vst [vmem:[#allocation2 + $0x118] sm:$0xff] %v2660_v0 }
  0x5a   : > { %313 = vst [vmem:[#allocation2 + $0x120] sm:$0xff] %v2660_v0 }
  0x5b   : > { %314 = vst [vmem:[#allocation2 + $0x128] sm:$0xff] %v2660_v0 }
  0x5c   : > { %315 = vst [vmem:[#allocation2 + $0x130] sm:$0xff] %v2660_v0 }
  0x5d   : > { %316 = vst [vmem:[#allocation2 + $0x138] sm:$0x3] %v2660_v0 }
  0x5e   : > { %317 = vst [vmem:[#allocation2 + $0x140] sm:$0xff] %v2660_v0 }
  0x5f   : > { %318 = vst [vmem:[#allocation2 + $0x148] sm:$0xff] %v2660_v0 }
  0x60   : > { %319 = vst [vmem:[#allocation2 + $0x150] sm:$0xff] %v2660_v0 }
  0x61   : > { %320 = vst [vmem:[#allocation2 + $0x158] sm:$0xff] %v2660_v0 }
  0x62   : > { %321 = vst [vmem:[#allocation2 + $0x160] sm:$0x3] %v2660_v0 }
  0x63   : > { %322 = vst [vmem:[#allocation2 + $0x168] sm:$0xff] %v2660_v0 }
  0x64   : > { %323 = vst [vmem:[#allocation2 + $0x170] sm:$0xff] %v2660_v0 }
  0x65   : > { %324 = vst [vmem:[#allocation2 + $0x178] sm:$0xff] %v2660_v0 }
  0x66   : > { %325 = vst [vmem:[#allocation2 + $0x180] sm:$0xff] %v2660_v0 }
  0x67   : > { %326 = vst [vmem:[#allocation2 + $0x188] sm:$0x3] %v2660_v0 }
  0x68   : > { %362 = vst [vmem:[#allocation2 + $0x29] sm:$0xff] %v329_v1 }
  0x69   : > { %363 = vst [vmem:[#allocation2 + $0x31] sm:$0xff] %v330_v2 }
  0x6a   : > { %364 = vst [vmem:[#allocation2 + $0x39] sm:$0xff] %v331_v3 }
  0x6b   : > { %365 = vst [vmem:[#allocation2 + $0x41] sm:$0xff] %v332_v4 }
  0x6c   : > { %366 = vst [vmem:[#allocation2 + $0x51] sm:$0xff] %v333_v5 }
  0x6d   : > { %367 = vst [vmem:[#allocation2 + $0x59] sm:$0xff] %v334_v6 }
  0x6e   : > { %368 = vst [vmem:[#allocation2 + $0x61] sm:$0xff] %v335_v7 }
  0x6f   : > { %369 = vst [vmem:[#allocation2 + $0x69] sm:$0xff] %v336_v8 }
  0x70   : > { %370 = vst [vmem:[#allocation2 + $0x79] sm:$0xff] %v337_v9 }
  0x71   : > { %371 = vst [vmem:[#allocation2 + $0x81] sm:$0xff] %v338_v10 }
  0x72   : > { %372 = vst [vmem:[#allocation2 + $0x89] sm:$0xff] %v339_v11 }
  0x73   : > { %373 = vst [vmem:[#allocation2 + $0x91] sm:$0xff] %v340_v12 }
  0x74   : > { %374 = vst [vmem:[#allocation2 + $0xa1] sm:$0xff] %v341_v13 }
  0x75   : > { %375 = vst [vmem:[#allocation2 + $0xa9] sm:$0xff] %v342_v14 }
  0x76   : > { %376 = vst [vmem:[#allocation2 + $0xb1] sm:$0xff] %v343_v15 }
  0x77   : > { %377 = vst [vmem:[#allocation2 + $0xb9] sm:$0xff] %v344_v16 }
  0x78   : > { %378 = vst [vmem:[#allocation2 + $0xc9] sm:$0xff] %v345_v17 }
  0x79   : > { %379 = vst [vmem:[#allocation2 + $0xd1] sm:$0xff] %v346_v18 }
  0x7a   : > { %380 = vst [vmem:[#allocation2 + $0xd9] sm:$0xff] %v347_v19 }
  0x7b   : > { %381 = vst [vmem:[#allocation2 + $0xe1] sm:$0xff] %v348_v20 }
  0x7c   : > { %382 = vst [vmem:[#allocation2 + $0xf1] sm:$0xff] %v349_v21 }
  0x7d   : > { %383 = vst [vmem:[#allocation2 + $0xf9] sm:$0xff] %v350_v22 }
  0x7e   : > { %384 = vst [vmem:[#allocation2 + $0x101] sm:$0xff] %v351_v23 }
  0x7f   : > { %385 = vst [vmem:[#allocation2 + $0x109] sm:$0xff] %v352_v24 }
  0x80   : > { %386 = vst [vmem:[#allocation2 + $0x119] sm:$0xff] %v353_v25 }
  0x81   : > { %387 = vst [vmem:[#allocation2 + $0x121] sm:$0xff] %v354_v26 }
  0x82   : > { %388 = vst [vmem:[#allocation2 + $0x129] sm:$0xff] %v355_v27 }
  0x83   : > { %389 = vst [vmem:[#allocation2 + $0x131] sm:$0xff] %v356_v28  ;;  %397 = sbr.rel (%p2323_p3) target bundleno = 141 (0x8d), region = 48 }
  0x84   : > { %390 = vst [vmem:[#allocation2 + $0x141] sm:$0xff] %v357_v29 }
  0x85   : > { %391 = vst [vmem:[#allocation2 + $0x149] sm:$0xff] %v358_v30 }
  0x86   : > { %392 = vst [vmem:[#allocation2 + $0x151] sm:$0xff] %v359_v31 }
  0x87   : > { %393 = vst [vmem:[#allocation2 + $0x159] sm:$0xff] %v360_v32 }
  0x88   : > { %v401_v33 = vld [vmem:[%s400_s6] sm:$0xff]  ;;  %v402_v34 = vld [vmem:[%s400_s6 + $0x8] sm:$0xff]  ;;  %v403_v35 = vld [vmem:[%s400_s6 + $0x10] sm:$0xff] }
  0x89   : > { %405 = vst [vmem:[#allocation2 + $0x1] sm:$0xff] %v401_v33  ;;  %v404_v36 = vld [vmem:[%s400_s6 + $0x18] sm:$0xff] }
  0x8a   : > { %406 = vst [vmem:[#allocation2 + $0x9] sm:$0xff] %v402_v34 }
  0x8b   : > { %407 = vst [vmem:[#allocation2 + $0x11] sm:$0xff] %v403_v35 }
  0x8c   : > { %408 = vst [vmem:[#allocation2 + $0x19] sm:$0xff] %v404_v36 }
  0x8d PF: > { %p2326_p7 = scmp.ge.s32.totalorder %s2639_s18, 3 }
  0x8f   : > { %412 = sbr.rel (%p2326_p7) target bundleno = 153 (0x99), region = 52 }
  0x94   : > { %v2329_v37 = vld [vmem:[%s2831_s13 + $0x100] sm:$0xff]  ;;  %v2330_v38 = vld [vmem:[%s2831_s13 + $0x108] sm:$0xff]  ;;  %v2331_v39 = vld [vmem:[%s2831_s13 + $0x110] sm:$0xff] }
  0x95   : > { %421 = vst [vmem:[#allocation2 + $0x169] sm:$0xff] %v2329_v37  ;;  %v2332_v40 = vld [vmem:[%s2831_s13 + $0x118] sm:$0xff] }
  0x96   : > { %422 = vst [vmem:[#allocation2 + $0x171] sm:$0xff] %v2330_v38 }
  0x97   : > { %423 = vst [vmem:[#allocation2 + $0x179] sm:$0xff] %v2331_v39 }
  0x98   : > { %424 = vst [vmem:[#allocation2 + $0x181] sm:$0xff] %v2332_v40 }
  0x99 PF: > { %v497_v41 = vld [vmem:[#allocation6 + $0x1f8] sm:$0xff]  ;;  %v496_v42 = vld [vmem:[#allocation6 + $0x1f0] sm:$0xff]  ;;  %v495_v43 = vld [vmem:[#allocation6 + $0x1e8] sm:$0xff]  ;;  %s2344_s15 = sshll.u32 %s2639_s18, 5  ;;  %s2336_s27 = sshll.u32 %s2643_s19, 7 }
  0x9a   : > { %2345 = vmatpush.msra.mxu1 %v497_v41  ;;  %2346 = vmatpush.msra.mxu2 %v497_v41  ;;  %v494_v44 = vld [vmem:[#allocation6 + $0x1e0] sm:$0xff]  ;;  %v493_v45 = vld [vmem:[#allocation6 + $0x1d8] sm:$0xff]  ;;  %v492_v46 = vld [vmem:[#allocation6 + $0x1d0] sm:$0xff]  ;;  %s2179_s5 = sadd.s32 %s2344_s15, %s2336_s27  ;;  %s3696_s26 = sld [smem:[#allocation32_spill]] }
  0x9b   : > { %2347 = vmatpush.msra.mxu3 %v497_v41  ;;  %498 = vmatpush.msra.mxu0 %v497_v41  ;;  %v491_v47 = vld [vmem:[#allocation6 + $0x1c8] sm:$0xff]  ;;  %v490_v48 = vld [vmem:[#allocation6 + $0x1c0] sm:$0xff]  ;;  %v489_v49 = vld [vmem:[#allocation6 + $0x1b8] sm:$0xff]  ;;  %s2337_s25 = sshll.u32 %s2179_s5, 3  ;;  %s2182_s11 = sshll.u32 %s2867_s24, 4  ;;  %s2183_s11 = int_to_ptr.vmem [resolvable:$true] %s2182_s11 }
  0x9c   : > { %2348 = vmatpush.msra.mxu1 %v496_v42  ;;  %2349 = vmatpush.msra.mxu2 %v496_v42  ;;  %v488_v50 = vld [vmem:[#allocation6 + $0x1b0] sm:$0xff]  ;;  %v487_v51 = vld [vmem:[#allocation6 + $0x1a8] sm:$0xff]  ;;  %v486_v52 = vld [vmem:[#allocation6 + $0x1a0] sm:$0xff]  ;;  %s2167_s13 = scalar_lea.sflag [#allocation5], %s2805_s8 }
  0x9d   : > { %2350 = vmatpush.msra.mxu3 %v496_v42  ;;  %499 = vmatpush.msra.mxu0 %v496_v42  ;;  %v485_v53 = vld [vmem:[#allocation6 + $0x198] sm:$0xff]  ;;  %v484_v54 = vld [vmem:[#allocation6 + $0x190] sm:$0xff]  ;;  %v483_v55 = vld [vmem:[#allocation6 + $0x188] sm:$0xff] }
  0x9e   : > { %2351 = vmatpush.msra.mxu1 %v495_v43  ;;  %2352 = vmatpush.msra.mxu2 %v495_v43  ;;  %v482_v56 = vld [vmem:[#allocation6 + $0x180] sm:$0xff]  ;;  %v2878_v57 = vld [vmem:[#allocation2 + $0x78] sm:$0xff]  ;;  %v2880_v58 = vld [vmem:[#allocation2 + $0xc8] sm:$0xff] }
  0x9f   : > { %2353 = vmatpush.msra.mxu3 %v495_v43  ;;  %500 = vmatpush.msra.mxu0 %v495_v43  ;;  %v740_v59 = vld [vmem:[#allocation6 + $0x378] sm:$0xff]  ;;  %v2882_v60 = vld [vmem:[#allocation2 + $0x118] sm:$0xff]  ;;  %v739_v63 = vld [vmem:[#allocation6 + $0x370] sm:$0xff] }
  0xa0   : > { %2354 = vmatpush.msra.mxu1 %v494_v44  ;;  %2355 = vmatpush.msra.mxu2 %v494_v44  ;;  %v480_v61 = vld [vmem:[#allocation6 + $0x78] sm:$0xff]  ;;  %v479_v0 = vld [vmem:[#allocation6 + $0x70] sm:$0xff]  ;;  %v738_v2 = vld [vmem:[#allocation6 + $0x368] sm:$0xff]  ;;  %s2181_s9 = scalar_lea.hbm %s3696_s26, %s2337_s25  ;;  %s2573_s7 = scalar_lea.hbm %s3696_s26, 2048 }
  0xa1   : > { %2356 = vmatpush.msra.mxu3 %v494_v44  ;;  %501 = vmatpush.msra.mxu0 %v494_v44  ;;  %v942_v62 = vld [vmem:[#allocation6 + $0xf8] sm:$0xff]  ;;  %v941_v1 = vld [vmem:[#allocation6 + $0xf0] sm:$0xff]  ;;  %v478_v4 = vld [vmem:[#allocation6 + $0x68] sm:$0xff]  ;;  %s2184_s12 = sshll.u32 %s2181_s9, 4  ;;  %s2185_s12 = int_to_ptr.hbm [resolvable:$true] %s2184_s12 }
  0xa2   : > { %2357 = vmatpush.msra.mxu1 %v493_v45  ;;  %2358 = vmatpush.msra.mxu2 %v493_v45  ;;  %v2887_v3 = vld [vmem:[#allocation2 + $0x28] sm:$0xff]  ;;  %v940_v5 = vld [vmem:[#allocation6 + $0xe8] sm:$0xff]  ;;  %v2889_v7 = vld [vmem:[#allocation2 + $0x80] sm:$0xff]  ;;  %s2567_s23 = sshra.s32 %s2185_s12, 4  ;;  %s2568_s23 = int_to_ptr.hbm [resolvable:$true] %s2567_s23 }
  0xa3   : > { %2359 = vmatpush.msra.mxu3 %v493_v45  ;;  %502 = vmatpush.msra.mxu0 %v493_v45  ;;  %v1104_v6 = vld [vmem:[#allocation6 + $0x278] sm:$0xff]  ;;  %v2891_v8 = vld [vmem:[#allocation2 + $0xd0] sm:$0xff]  ;;  %v2894_v11 = vld [vmem:[#allocation2 + $0x120] sm:$0xff]  ;;  %s2569_s29 = scalar_lea.hbm %s2568_s23, 256  ;;  %p2574_p13 = scmp.lt.s32.totalorder %s2568_s23, %s3696_s26 }
  0xa4   : > { %2360 = vmatpush.msra.mxu1 %v492_v46  ;;  %2361 = vmatpush.msra.mxu2 %v492_v46  ;;  %v737_v9 = vld [vmem:[#allocation6 + $0x360] sm:$0xff]  ;;  %v1103_v12 = vld [vmem:[#allocation6 + $0x270] sm:$0xff]  ;;  %v736_v14 = vld [vmem:[#allocation6 + $0x358] sm:$0xff]  ;;  %p2570_p10 = scmp.ne.s32.totalorder %s2568_s23, %s2569_s29  ;;  %p2575_p0 = scmp.lt.s32.totalorder %s2573_s7, %s2569_s29 }
  0xa5   : > { %2362 = vmatpush.msra.mxu3 %v492_v46  ;;  %503 = vmatpush.msra.mxu0 %v492_v46  ;;  %v939_v10 = vld [vmem:[#allocation6 + $0xe0] sm:$0xff]  ;;  %v938_v15 = vld [vmem:[#allocation6 + $0xd8] sm:$0xff]  ;;  %v1102_v16 = vld [vmem:[#allocation6 + $0x268] sm:$0xff] }
  0xa6   : > { %2363 = vmatpush.msra.mxu1 %v491_v47  ;;  %2364 = vmatpush.msra.mxu2 %v491_v47  ;;  %v477_v13 = vld [vmem:[#allocation6 + $0x60] sm:$0xff]  ;;  %v476_v17 = vld [vmem:[#allocation6 + $0x58] sm:$0xff]  ;;  %v735_v18 = vld [vmem:[#allocation6 + $0x350] sm:$0xff]  ;;  %p2571_p11 = pnand %p2570_p10, %p2771_p2  ;;  %p2576_p4 = por %p2575_p0, %p2574_p13 }
  0xa7   : > { %2365 = vmatpush.msra.mxu3 %v491_v47  ;;  %504 = vmatpush.msra.mxu0 %v491_v47  ;;  %v2899_v19 = vld [vmem:[#allocation2 + $0x30] sm:$0xff]  ;;  %v937_v20 = vld [vmem:[#allocation6 + $0xd0] sm:$0xff]  ;;  %v2901_v23 = vld [vmem:[#allocation2 + $0x88] sm:$0xff] }
  0xa8   : > { %2366 = vmatpush.msra.mxu1 %v490_v48  ;;  %2367 = vmatpush.msra.mxu2 %v490_v48  ;;  %v1101_v21 = vld [vmem:[#allocation6 + $0x260] sm:$0xff]  ;;  %v475_v22 = vld [vmem:[#allocation6 + $0x50] sm:$0xff]  ;;  %v2903_v24 = vld [vmem:[#allocation2 + $0xd8] sm:$0xff]  ;;  %p2572_p12 = pneg %p2571_p11 }
  0xa9   : > { %2368 = vmatpush.msra.mxu3 %v490_v48  ;;  %505 = vmatpush.msra.mxu0 %v490_v48  ;;  %v734_v25 = vld [vmem:[#allocation6 + $0x348] sm:$0xff]  ;;  %v2906_v27 = vld [vmem:[#allocation2 + $0x128] sm:$0xff]  ;;  %v733_v30 = vld [vmem:[#allocation6 + $0x340] sm:$0xff] }
  0xaa   : > { %2369 = vmatpush.msra.mxu1 %v489_v49  ;;  %2370 = vmatpush.msra.mxu2 %v489_v49  ;;  %v936_v26 = vld [vmem:[#allocation6 + $0xc8] sm:$0xff]  ;;  %v1100_v28 = vld [vmem:[#allocation6 + $0x258] sm:$0xff]  ;;  %v935_v31 = vld [vmem:[#allocation6 + $0xc0] sm:$0xff]  ;;  %p2577_p6 = pnand %p2576_p4, %p2572_p12 }
  0xab   : > { %2371 = vmatpush.msra.mxu3 %v489_v49  ;;  %506 = vmatpush.msra.mxu0 %v489_v49  ;;  %v474_v29 = vld [vmem:[#allocation6 + $0x48] sm:$0xff]  ;;  %v1099_v32 = vld [vmem:[#allocation6 + $0x250] sm:$0xff]  ;;  %v473_v33 = vld [vmem:[#allocation6 + $0x40] sm:$0xff] }
  0xac   : > { %2372 = vmatpush.msra.mxu1 %v488_v50  ;;  %2373 = vmatpush.msra.mxu2 %v488_v50  ;;  %v732_v34 = vld [vmem:[#allocation6 + $0x338] sm:$0xff]  ;;  %v2911_v35 = vld [vmem:[#allocation2 + $0x38] sm:$0xff]  ;;  %v2913_v39 = vld [vmem:[#allocation2 + $0x90] sm:$0xff] }
  0xad   : > { %2374 = vmatpush.msra.mxu3 %v488_v50  ;;  %507 = vmatpush.msra.mxu0 %v488_v50  ;;  %v934_v36 = vld [vmem:[#allocation6 + $0xb8] sm:$0xff]  ;;  %v1098_v37 = vld [vmem:[#allocation6 + $0x248] sm:$0xff]  ;;  %v2915_v40 = vld [vmem:[#allocation2 + $0xe0] sm:$0xff] }
  0xae   : > { %2375 = vmatpush.msra.mxu1 %v487_v51  ;;  %2376 = vmatpush.msra.mxu2 %v487_v51  ;;  %v472_v38 = vld [vmem:[#allocation6 + $0x38] sm:$0xff]  ;;  %v731_v41 = vld [vmem:[#allocation6 + $0x330] sm:$0xff]  ;;  %v2918_v43 = vld [vmem:[#allocation2 + $0x130] sm:$0xff] }
  0xaf   : > { %2377 = vmatpush.msra.mxu3 %v487_v51  ;;  %508 = vmatpush.msra.mxu0 %v487_v51  ;;  %v933_v42 = vld [vmem:[#allocation6 + $0xb0] sm:$0xff]  ;;  %v1097_v44 = vld [vmem:[#allocation6 + $0x240] sm:$0xff]  ;;  %v730_v46 = vld [vmem:[#allocation6 + $0x328] sm:$0xff] }
  0xb0   : > { %2378 = vmatpush.msra.mxu1 %v486_v52  ;;  %2379 = vmatpush.msra.mxu2 %v486_v52  ;;  %v471_v45 = vld [vmem:[#allocation6 + $0x30] sm:$0xff]  ;;  %v932_v47 = vld [vmem:[#allocation6 + $0xa8] sm:$0xff]  ;;  %v1096_v48 = vld [vmem:[#allocation6 + $0x238] sm:$0xff] }
  0xb1   : > { %2380 = vmatpush.msra.mxu3 %v486_v52  ;;  %509 = vmatpush.msra.mxu0 %v486_v52  ;;  %v470_v49 = vld [vmem:[#allocation6 + $0x28] sm:$0xff]  ;;  %v729_v50 = vld [vmem:[#allocation6 + $0x320] sm:$0xff]  ;;  %v2923_v51 = vld [vmem:[#allocation2 + $0x40] sm:$0xff] }
  0xb2   : > { %2381 = vmatpush.msra.mxu1 %v485_v53  ;;  %2382 = vmatpush.msra.mxu2 %v485_v53  ;;  %v931_v52 = vld [vmem:[#allocation6 + $0xa0] sm:$0xff] }
  0xb3   : > { %2383 = vmatpush.msra.mxu3 %v485_v53  ;;  %510 = vmatpush.msra.mxu0 %v485_v53  ;;  %v1095_v53 = vld [vmem:[#allocation6 + $0x230] sm:$0xff] }
  0xb4   : > { %2384 = vmatpush.msra.mxu1 %v484_v54  ;;  %2385 = vmatpush.msra.mxu2 %v484_v54 }
  0xb5   : > { %2386 = vmatpush.msra.mxu3 %v484_v54  ;;  %511 = vmatpush.msra.mxu0 %v484_v54  ;;  %v469_v54 = vld [vmem:[#allocation6 + $0x20] sm:$0xff] }
  0xb6   : > { %2387 = vmatpush.msra.mxu1 %v483_v55  ;;  %2388 = vmatpush.msra.mxu2 %v483_v55 }
  0xb7   : > { %2389 = vmatpush.msra.mxu3 %v483_v55  ;;  %512 = vmatpush.msra.mxu0 %v483_v55  ;;  %v2925_v55 = vld [vmem:[#allocation2 + $0xa0] sm:$0xff] }
  0xb8   : > { %2390 = vmatpush.msra.mxu1 %v482_v56  ;;  %2391 = vmatpush.msra.mxu2 %v482_v56 }
  0xb9   : > { %538 = vmatmul.f32.vlgmr.msra.gmra.mxu1 %v2878_v57  ;;  %562 = vmatmul.f32.vlgmr.msra.gmra.mxu2 %v2880_v58 }
  0xba   : > { %741 = vmatpush.msrb.mxu2 %v740_v59  ;;  %2392 = vmatpush.msra.mxu3 %v482_v56  ;;  %v728_v59 = vld [vmem:[#allocation6 + $0x318] sm:$0xff] }
  0xbb   : > { %586 = vmatmul.f32.vlgmr.msra.gmra.mxu3 %v2882_v60  ;;  %611 = vmatpush.msrb.mxu1 %v480_v61  ;;  %v930_v61 = vld [vmem:[#allocation6 + $0x98] sm:$0xff] }
  0xbc   : > { %943 = vmatpush.msrb.mxu3 %v942_v62  ;;  %742 = vmatpush.msrb.mxu2 %v739_v63  ;;  %v2930_v62 = vld [vmem:[#allocation2 + $0x140] sm:$0xff]  ;;  %v1094_v63 = vld [vmem:[#allocation6 + $0x228] sm:$0xff] }
  0xbd   : > { %612 = vmatpush.msrb.mxu1 %v479_v0  ;;  %513 = vmatpush.msra.mxu0 %v482_v56  ;;  %v2927_v56 = vld [vmem:[#allocation2 + $0xf0] sm:$0xff]  ;;  %v468_v0 = vld [vmem:[#allocation6 + $0x18] sm:$0xff] }
  0xbe   : > { %944 = vmatpush.msrb.mxu3 %v941_v1  ;;  %743 = vmatpush.msrb.mxu2 %v738_v2  ;;  %v727_v1 = vld [vmem:[#allocation6 + $0x310] sm:$0xff] }
  0xbf   : > { %514 = vmatmul.f32.vlgmr.msra.gmra.mxu0 %v2887_v3  ;;  %613 = vmatpush.msrb.mxu1 %v478_v4  ;;  %v929_v2 = vld [vmem:[#allocation6 + $0x90] sm:$0xff]  ;;  %v1093_v4 = vld [vmem:[#allocation6 + $0x220] sm:$0xff] }
  0xc0   : > { %945 = vmatpush.msrb.mxu3 %v940_v5  ;;  %1105 = vmatpush.msrb.mxu0 %v1104_v6  ;;  %v467_v5 = vld [vmem:[#allocation6 + $0x10] sm:$0xff]  ;;  %v726_v6 = vld [vmem:[#allocation6 + $0x308] sm:$0xff] }
  0xc1   : > { %541 = vmatmul.f32.gmra.mxu1 %v2889_v7  ;;  %565 = vmatmul.f32.gmra.mxu2 %v2891_v8 }
  0xc2   : > { %744 = vmatpush.msrb.mxu2 %v737_v9  ;;  %946 = vmatpush.msrb.mxu3 %v939_v10  ;;  %v2935_v9 = vld [vmem:[#allocation2 + $0x50] sm:$0xff]  ;;  %v928_v10 = vld [vmem:[#allocation6 + $0x88] sm:$0xff] }
  0xc3   : > { %589 = vmatmul.f32.gmra.mxu3 %v2894_v11  ;;  %1106 = vmatpush.msrb.mxu0 %v1103_v12  ;;  %v1092_v12 = vld [vmem:[#allocation6 + $0x218] sm:$0xff] }
  0xc4   : > { %614 = vmatpush.msrb.mxu1 %v477_v13  ;;  %745 = vmatpush.msrb.mxu2 %v736_v14  ;;  %v466_v13 = vld [vmem:[#allocation6 + $0x8] sm:$0xff]  ;;  %v2937_v14 = vld [vmem:[#allocation2 + $0xa8] sm:$0xff] }
  0xc5   : > { %947 = vmatpush.msrb.mxu3 %v938_v15  ;;  %1107 = vmatpush.msrb.mxu0 %v1102_v16  ;;  %v2939_v15 = vld [vmem:[#allocation2 + $0xf8] sm:$0xff]  ;;  %v725_v16 = vld [vmem:[#allocation6 + $0x300] sm:$0xff] }
  0xc6   : > { %615 = vmatpush.msrb.mxu1 %v476_v17  ;;  %746 = vmatpush.msrb.mxu2 %v735_v18  ;;  %v927_v17 = vld [vmem:[#allocation6 + $0x80] sm:$0xff]  ;;  %v2942_v18 = vld [vmem:[#allocation2 + $0x148] sm:$0xff] }
  0xc7   : > { %517 = vmatmul.f32.gmra.mxu0 %v2899_v19  ;;  %948 = vmatpush.msrb.mxu3 %v937_v20  ;;  %v1091_v20 = vld [vmem:[#allocation6 + $0x210] sm:$0xff] }
  0xc8   : > { %1108 = vmatpush.msrb.mxu0 %v1101_v21  ;;  %616 = vmatpush.msrb.mxu1 %v475_v22  ;;  %v465_v21 = vld [vmem:[#allocation6] sm:$0xff]  ;;  %v1468_v22 = vld [vmem:[#allocation6 + $0x178] sm:$0xff] }
  0xc9   : > { %544 = vmatmul.f32.gmra.mxu1 %v2901_v23  ;;  %568 = vmatmul.f32.gmra.mxu2 %v2903_v24 }
  0xca   : > { %747 = vmatpush.msrb.mxu2 %v734_v25  ;;  %949 = vmatpush.msrb.mxu3 %v936_v26  ;;  %v1090_v25 = vld [vmem:[#allocation6 + $0x208] sm:$0xff]  ;;  %v1630_v26 = vld [vmem:[#allocation6 + $0x2f8] sm:$0xff] }
  0xcb   : > { %592 = vmatmul.f32.gmra.mxu3 %v2906_v27  ;;  %1109 = vmatpush.msrb.mxu0 %v1100_v28  ;;  %v1266_v28 = vld [vmem:[#allocation6 + $0x3f8] sm:$0xff] }
  0xcc   : > { %617 = vmatpush.msrb.mxu1 %v474_v29  ;;  %748 = vmatpush.msrb.mxu2 %v733_v30  ;;  %v2947_v29 = vld [vmem:[#allocation2 + $0x58] sm:$0xff]  ;;  %v1089_v30 = vld [vmem:[#allocation6 + $0x200] sm:$0xff] }
  0xcd   : > { %950 = vmatpush.msrb.mxu3 %v935_v31  ;;  %1110 = vmatpush.msrb.mxu0 %v1099_v32  ;;  %v2949_v31 = vld [vmem:[#allocation2 + $0xb0] sm:$0xff]  ;;  %v2951_v32 = vld [vmem:[#allocation2 + $0x100] sm:$0xff] }
  0xce   : > { %618 = vmatpush.msrb.mxu1 %v473_v33  ;;  %749 = vmatpush.msrb.mxu2 %v732_v34  ;;  %v1792_v33 = vld [vmem:[#allocation6 + $0x478] sm:$0xff]  ;;  %v2954_v34 = vld [vmem:[#allocation2 + $0x150] sm:$0xff] }
  0xcf   : > { %520 = vmatmul.f32.gmra.mxu0 %v2911_v35  ;;  %951 = vmatpush.msrb.mxu3 %v934_v36  ;;  %v1467_v36 = vld [vmem:[#allocation6 + $0x170] sm:$0xff] }
  0xd0   : > { %1111 = vmatpush.msrb.mxu0 %v1098_v37  ;;  %619 = vmatpush.msrb.mxu1 %v472_v38  ;;  %v1629_v37 = vld [vmem:[#allocation6 + $0x2f0] sm:$0xff] }
  0xd1   : > { %547 = vmatmul.f32.gmra.mxu1 %v2913_v39  ;;  %571 = vmatmul.f32.gmra.mxu2 %v2915_v40  ;;  %v1265_v38 = vld [vmem:[#allocation6 + $0x3f0] sm:$0xff] }
  0xd2   : > { %750 = vmatpush.msrb.mxu2 %v731_v41  ;;  %952 = vmatpush.msrb.mxu3 %v933_v42  ;;  %v2959_v41 = vld [vmem:[#allocation2 + $0x60] sm:$0xff]  ;;  %v2961_v42 = vld [vmem:[#allocation2 + $0xb8] sm:$0xff] }
  0xd3   : > { %595 = vmatmul.f32.gmra.mxu3 %v2918_v43  ;;  %1112 = vmatpush.msrb.mxu0 %v1097_v44  ;;  %v2963_v44 = vld [vmem:[#allocation2 + $0x108] sm:$0xff] }
  0xd4   : > { %620 = vmatpush.msrb.mxu1 %v471_v45  ;;  %751 = vmatpush.msrb.mxu2 %v730_v46  ;;  %v2966_v45 = vld [vmem:[#allocation2 + $0x158] sm:$0xff]  ;;  %v1791_v46 = vld [vmem:[#allocation6 + $0x470] sm:$0xff] }
  0xd5   : > { %953 = vmatpush.msrb.mxu3 %v932_v47  ;;  %1113 = vmatpush.msrb.mxu0 %v1096_v48  ;;  %v2971_v47 = vld [vmem:[#allocation2 + $0x68] sm:$0xff]  ;;  %v425_v48 = vld [vmem:[#allocation2] sm:$0xff] }
  0xd6   : > { %621 = vmatpush.msrb.mxu1 %v470_v49  ;;  %752 = vmatpush.msrb.mxu2 %v729_v50  ;;  %v886_v49 = vld [vmem:[#allocation2 + $0x1] sm:$0xff]  ;;  %v1466_v50 = vld [vmem:[#allocation6 + $0x168] sm:$0xff] }
  0xd7   : > { %523 = vmatmul.f32.gmra.mxu0 %v2923_v51  ;;  %954 = vmatpush.msrb.mxu3 %v931_v52  ;;  %v1628_v52 = vld [vmem:[#allocation6 + $0x2e8] sm:$0xff] }
  0xd8   : > { %1114 = vmatpush.msrb.mxu0 %v1095_v53  ;;  %622 = vmatpush.msrb.mxu1 %v469_v54  ;;  %v1264_v53 = vld [vmem:[#allocation6 + $0x3e8] sm:$0xff]  ;;  %v890_v54 = vld [vmem:[#allocation2 + $0x29] sm:$0xff] }
  0xd9   : > { %550 = vmatmul.f32.gmra.mxu1 %v2925_v55  ;;  %574 = vmatmul.f32.gmra.mxu2 %v2927_v56 }
  0xda   : > { %753 = vmatpush.msrb.mxu2 %v728_v59  ;;  %955 = vmatpush.msrb.mxu3 %v930_v61  ;;  %v426_v59 = vld [vmem:[#allocation2 + $0x8] sm:$0xff] }
  0xdb   : > { %598 = vmatmul.f32.gmra.mxu3 %v2930_v62  ;;  %1115 = vmatpush.msrb.mxu0 %v1094_v63  ;;  %v887_v61 = vld [vmem:[#allocation2 + $0x9] sm:$0xff]  ;;  %v1790_v63 = vld [vmem:[#allocation6 + $0x468] sm:$0xff] }
  0xdc   : > { %623 = vmatpush.msrb.mxu1 %v468_v0  ;;  %754 = vmatpush.msrb.mxu2 %v727_v1  ;;  %v891_v0 = vld [vmem:[#allocation2 + $0x31] sm:$0xff] }
  0xdd   : > { %956 = vmatpush.msrb.mxu3 %v929_v2  ;;  %1116 = vmatpush.msrb.mxu0 %v1093_v4  ;;  %v427_v1 = vld [vmem:[#allocation2 + $0x10] sm:$0xff] }
  0xde   : > { %624 = vmatpush.msrb.mxu1 %v467_v5  ;;  %755 = vmatpush.msrb.mxu2 %v726_v6  ;;  %v888_v2 = vld [vmem:[#allocation2 + $0x11] sm:$0xff] }
  0xdf   : > { %526 = vmatmul.f32.gmra.mxu0 %v2935_v9  ;;  %957 = vmatpush.msrb.mxu3 %v928_v10  ;;  %v1465_v4 = vld [vmem:[#allocation6 + $0x160] sm:$0xff]  ;;  %v892_v10 = vld [vmem:[#allocation2 + $0x39] sm:$0xff] }
  0xe0   : > { %1117 = vmatpush.msrb.mxu0 %v1092_v12  ;;  %625 = vmatpush.msrb.mxu1 %v466_v13  ;;  %v1627_v5 = vld [vmem:[#allocation6 + $0x2e0] sm:$0xff]  ;;  %v428_v12 = vld [vmem:[#allocation2 + $0x18] sm:$0xff] }
  0xe1   : > { %553 = vmatmul.f32.gmra.mxu1 %v2937_v14  ;;  %577 = vmatmul.f32.gmra.mxu2 %v2939_v15  ;;  %v1263_v6 = vld [vmem:[#allocation6 + $0x3e0] sm:$0xff]  ;;  %v889_v13 = vld [vmem:[#allocation2 + $0x19] sm:$0xff] }
  0xe2   : > { %756 = vmatpush.msrb.mxu2 %v725_v16  ;;  %958 = vmatpush.msrb.mxu3 %v927_v17  ;;  %v1789_v16 = vld [vmem:[#allocation6 + $0x460] sm:$0xff]  ;;  %v893_v17 = vld [vmem:[#allocation2 + $0x41] sm:$0xff] }
  0xe3   : > { %601 = vmatmul.f32.gmra.mxu3 %v2942_v18  ;;  %1118 = vmatpush.msrb.mxu0 %v1091_v20  ;;  %v1464_v20 = vld [vmem:[#allocation6 + $0x158] sm:$0xff] }
  0xe4   : > { %626 = vmatpush.msrb.mxu1 %v465_v21  ;;  %1469 = vmatpush.msra.mxu2 %v1468_v22  ;;  %v1626_v21 = vld [vmem:[#allocation6 + $0x2d8] sm:$0xff]  ;;  %v2980_v22 = vld [vmem:[#allocation2 + $0x51] sm:$0xff] }
  0xe5   : > { %1119 = vmatpush.msrb.mxu0 %v1090_v25  ;;  %1631 = vmatpush.msra.mxu3 %v1630_v26  ;;  %v1262_v25 = vld [vmem:[#allocation6 + $0x3d8] sm:$0xff] }
  0xe6   : > { %1267 = vmatpush.msra.mxu1 %v1266_v28  ;;  %1470 = vmatpush.msra.mxu2 %v1467_v36  ;;  %v1788_v26 = vld [vmem:[#allocation6 + $0x458] sm:$0xff]  ;;  %v1463_v28 = vld [vmem:[#allocation6 + $0x150] sm:$0xff] }
  0xe7   : > { %529 = vmatmul.f32.gmra.mxu0 %v2947_v29  ;;  %1632 = vmatpush.msra.mxu3 %v1629_v37  ;;  %v1787_v36 = vld [vmem:[#allocation6 + $0x450] sm:$0xff] }
  0xe8   : > { %1120 = vmatpush.msrb.mxu0 %v1089_v30  ;;  %1268 = vmatpush.msra.mxu1 %v1265_v38  ;;  %v1625_v30 = vld [vmem:[#allocation6 + $0x2d0] sm:$0xff]  ;;  %v1462_v38 = vld [vmem:[#allocation6 + $0x148] sm:$0xff] }
  0xe9   : > { %556 = vmatmul.f32.gmra.mxu1 %v2949_v31  ;;  %580 = vmatmul.f32.gmra.mxu2 %v2951_v32 }
  0xea   : > { %1793 = vmatpush.msra.mxu0 %v1792_v33  ;;  %1471 = vmatpush.msra.mxu2 %v1466_v50  ;;  %v2990_v33 = vld [vmem:[#allocation2 + $0x61] sm:$0xff]  ;;  %v1260_v50 = vld [vmem:[#allocation6 + $0x3c8] sm:$0xff] }
  0xeb   : > { %604 = vmatmul.f32.gmra.mxu3 %v2954_v34  ;;  %1269 = vmatpush.msra.mxu1 %v1264_v53 }
  0xec   : > { %1794 = vmatpush.msra.mxu0 %v1791_v46  ;;  %1633 = vmatpush.msra.mxu3 %v1628_v52 }
  0xed   : > { %1472 = vmatpush.msra.mxu2 %v1465_v4  ;;  %1270 = vmatpush.msra.mxu1 %v1263_v6  ;;  %v1259_v6 = vld [vmem:[#allocation6 + $0x3c0] sm:$0xff] }
  0xee   : > { %1795 = vmatpush.msra.mxu0 %v1790_v63  ;;  %1634 = vmatpush.msra.mxu3 %v1627_v5  ;;  %v3035_v5 = vld [vmem:[#allocation2 + $0x89] sm:$0xff] }
  0xef   : > { %532 = vmatmul.f32.gmra.mxu0 %v2959_v41  ;;  %1473 = vmatpush.msra.mxu2 %v1464_v20  ;;  %3670 = vst [vmem:[#allocation19_spill] sm:$0xff] %v3035_v5 }
  0xf0   : > { %1796 = vmatpush.msra.mxu0 %v1789_v16  ;;  %1635 = vmatpush.msra.mxu3 %v1626_v21 }
  0xf1   : > { %559 = vmatmul.f32.gmra.mxu1 %v2961_v42  ;;  %583 = vmatmul.f32.gmra.mxu2 %v2963_v44 }
  0xf2   : > { %1271 = vmatpush.msra.mxu1 %v1262_v25  ;;  %1797 = vmatpush.msra.mxu0 %v1788_v26  ;;  %v1622_v25 = vld [vmem:[#allocation6 + $0x2b8] sm:$0xff] }
  0xf3   : > { %607 = vmatmul.f32.gmra.mxu3 %v2966_v45  ;;  %1474 = vmatpush.msra.mxu2 %v1463_v28 }
  0xf4   : > { %1636 = vmatpush.msra.mxu3 %v1625_v30  ;;  %1798 = vmatpush.msra.mxu0 %v1787_v36  ;;  %v3063_v30 = vld [vmem:[#allocation2 + $0xa1] sm:$0xff] }
  0xf5   : > { %1475 = vmatpush.msra.mxu2 %v1462_v38 }
  0xf7   : > { %535 = vmatmul.f32.gmra.mxu0 %v2971_v47 }
  0xf9   : > { %627 = vmatmul.f32.vlgmr.msrb.gmra.mxu1 %v425_v48  ;;  %757 = vmatmul.f32.vlgmr.msrb.gmra.mxu2 %v2935_v9 }
  0xfb   : > { %959 = vmatmul.f32.vlgmr.msrb.gmra.mxu3 %v886_v49  ;;  %v3007_v49 = vld [vmem:[#allocation2 + $0x79] sm:$0xff] }
  0xff   : > { %1121 = vmatmul.f32.vlgmr.msrb.gmra.mxu0 %v890_v54 }
 0x101   : > { %630 = vmatmul.f32.gmra.mxu1 %v426_v59  ;;  %760 = vmatmul.f32.gmra.mxu2 %v2947_v29 }
 0x103   : > { %962 = vmatmul.f32.gmra.mxu3 %v887_v61  ;;  %v3021_v61 = vld [vmem:[#allocation2 + $0x81] sm:$0xff] }
 0x107   : > { %1124 = vmatmul.f32.gmra.mxu0 %v891_v0 }
 0x109   : > { %633 = vmatmul.f32.gmra.mxu1 %v427_v1  ;;  %763 = vmatmul.f32.gmra.mxu2 %v2959_v41  ;;  %v1623_v1 = vld [vmem:[#allocation6 + $0x2c0] sm:$0xff] }
 0x10b   : > { %965 = vmatmul.f32.gmra.mxu3 %v888_v2 }
 0x10f   : > { %1127 = vmatmul.f32.gmra.mxu0 %v892_v10 }
 0x111   : > { %636 = vmatmul.f32.gmra.mxu1 %v428_v12  ;;  %766 = vmatmul.f32.gmra.mxu2 %v2971_v47 }
 0x113   : > { %968 = vmatmul.f32.gmra.mxu3 %v889_v13 }
 0x117   : > { %1130 = vmatmul.f32.gmra.mxu0 %v893_v17 }
 0x119   : > { %639 = vmatmul.f32.gmra.mxu1 %v2887_v3  ;;  %769 = vmatmul.f32.gmra.mxu2 %v2878_v57  ;;  %v2985_v3 = vld [vmem:[#allocation2 + $0x59] sm:$0xff] }
 0x11b   : > { %971 = vmatmul.f32.gmra.mxu3 %v890_v54 }
 0x11f   : > { %1133 = vmatmul.f32.gmra.mxu0 %v2980_v22 }
 0x121   : > { %642 = vmatmul.f32.gmra.mxu1 %v2899_v19  ;;  %772 = vmatmul.f32.gmra.mxu2 %v2889_v7  ;;  %v1261_v19 = vld [vmem:[#allocation6 + $0x3d0] sm:$0xff] }
 0x122   : > { %1272 = vmatpush.msra.mxu1 %v1261_v19  ;;  %v1258_v19 = vld [vmem:[#allocation6 + $0x3b8] sm:$0xff] }
 0x123   : > { %974 = vmatmul.f32.gmra.mxu3 %v891_v0 }
 0x124   : > { %1273 = vmatpush.msra.mxu1 %v1260_v50 }
 0x126   : > { %1274 = vmatpush.msra.mxu1 %v1259_v6  ;;  %v1621_v6 = vld [vmem:[#allocation6 + $0x2b0] sm:$0xff] }
 0x127   : > { %1136 = vmatmul.f32.gmra.mxu0 %v2985_v3 }
 0x128   : > { %1275 = vmatpush.msra.mxu1 %v1258_v19  ;;  %v1257_v19 = vld [vmem:[#allocation6 + $0x3b0] sm:$0xff] }
 0x129   : > { %645 = vmatmul.f32.gmra.mxu1 %v2911_v35  ;;  %775 = vmatmul.f32.gmra.mxu2 %v2901_v23  ;;  %v2995_v35 = vld [vmem:[#allocation2 + $0x69] sm:$0xff] }
 0x12a   : > { %1276 = vmatpush.msra.mxu1 %v1257_v19 }
 0x12b   : > { %977 = vmatmul.f32.gmra.mxu3 %v892_v10 }
 0x12f   : > { %1139 = vmatmul.f32.gmra.mxu0 %v2990_v33 }
 0x131   : > { %648 = vmatmul.f32.gmra.mxu1 %v2923_v51  ;;  %778 = vmatmul.f32.gmra.mxu2 %v2913_v39  ;;  %v1624_v51 = vld [vmem:[#allocation6 + $0x2c8] sm:$0xff] }
 0x132   : > { %1637 = vmatpush.msra.mxu3 %v1624_v51 }
 0x133   : > { %980 = vmatmul.f32.gmra.mxu3 %v893_v17  ;;  %v3049_v17 = vld [vmem:[#allocation2 + $0x91] sm:$0xff] }
 0x134   : > { %1638 = vmatpush.msra.mxu3 %v1623_v1  ;;  %3672 = vst [vmem:[#allocation21_spill] sm:$0xff] %v3049_v17 }
 0x136   : > { %v2997_v37 = vpop.f32.mrf.mxu1  ;;  %1639 = vmatpush.msra.mxu3 %v1622_v25  ;;  %v3091_v25 = vld [vmem:[#allocation2 + $0xb1] sm:$0xff] }
 0x137   : > { %1142 = vmatmul.f32.gmra.mxu0 %v2995_v35 }
 0x138   : > { %1640 = vmatpush.msra.mxu3 %v1621_v6  ;;  %v3105_v6 = vld [vmem:[#allocation2 + $0xb9] sm:$0xff] }
 0x139   : > { %651 = vmatmul.f32.gmra.mxu1 %v2935_v9  ;;  %781 = vmatmul.f32.gmra.mxu2 %v2925_v55  ;;  %v1786_v9 = vld [vmem:[#allocation6 + $0x448] sm:$0xff] }
 0x13a   : > { %1799 = vmatpush.msra.mxu0 %v1786_v9  ;;  %v3077_v9 = vld [vmem:[#allocation2 + $0xa9] sm:$0xff] }
 0x13b   : > { %983 = vmatmul.f32.gmra.mxu3 %v2980_v22 }
 0x13c   : > { %v3003_v46 = vpop.f32.mrf.mxu2  ;;  %v3005_v48 = vpop.f32.mrf.mxu0 }
 0x13e   : > { %v3009_v52 = vpop.f32.mrf.mxu1  ;;  %v3011_v53 = vpop.f32.mrf.mxu3 }
 0x13f   : > { %3668 = vst [vmem:[#allocation17_spill] sm:$0xff] %v3011_v53  ;;  %1145 = vmatmul.f32.gmra.mxu0 %v3007_v49 }
 0x141   : > { %654 = vmatmul.f32.gmra.mxu1 %v2947_v29  ;;  %784 = vmatmul.f32.gmra.mxu2 %v2937_v14  ;;  %v1461_v29 = vld [vmem:[#allocation6 + $0x140] sm:$0xff] }
 0x142   : > { %1476 = vmatpush.msra.mxu2 %v1461_v29 }
 0x143   : > { %986 = vmatmul.f32.gmra.mxu3 %v2985_v3 }
 0x144   : > { %v3017_v54 = vpop.f32.mrf.mxu2  ;;  %v3019_v59 = vpop.f32.mrf.mxu0 }
 0x146   : > { %v3023_v63 = vpop.f32.mrf.mxu1  ;;  %v3025_v0 = vpop.f32.mrf.mxu3 }
 0x147   : > { %3669 = vst [vmem:[#allocation18_spill] sm:$0xff] %v3025_v0  ;;  %1148 = vmatmul.f32.gmra.mxu0 %v3021_v61 }
 0x149   : > { %657 = vmatmul.f32.gmra.mxu1 %v2959_v41  ;;  %787 = vmatmul.f32.gmra.mxu2 %v2949_v31  ;;  %v1785_v41 = vld [vmem:[#allocation6 + $0x440] sm:$0xff] }
 0x14a   : > { %1800 = vmatpush.msra.mxu0 %v1785_v41 }
 0x14b   : > { %989 = vmatmul.f32.gmra.mxu3 %v2990_v33 }
 0x14c   : > { %v3031_v2 = vpop.f32.mrf.mxu2  ;;  %v3033_v4 = vpop.f32.mrf.mxu0 }
 0x14e   : > { %v3037_v10 = vpop.f32.mrf.mxu1  ;;  %v3039_v12 = vpop.f32.mrf.mxu3 }
 0x14f   : > { %3671 = vst [vmem:[#allocation20_spill] sm:$0xff] %v3039_v12  ;;  %1151 = vmatmul.f32.gmra.mxu0 %v3035_v5  ;;  %v1620_v12 = vld [vmem:[#allocation6 + $0x2a8] sm:$0xff] }
 0x150   : > { %1641 = vmatpush.msra.mxu3 %v1620_v12 }
 0x151   : > { %660 = vmatmul.f32.gmra.mxu1 %v2971_v47  ;;  %790 = vmatmul.f32.gmra.mxu2 %v2961_v42  ;;  %v1460_v47 = vld [vmem:[#allocation6 + $0x138] sm:$0xff] }
 0x152   : > { %1477 = vmatpush.msra.mxu2 %v1460_v47 }
 0x153   : > { %992 = vmatmul.f32.gmra.mxu3 %v2995_v35 }
 0x154   : > { %v3045_v13 = vpop.f32.mrf.mxu2  ;;  %v3047_v16 = vpop.f32.mrf.mxu0 }
 0x156   : > { %v3051_v20 = vpop.f32.mrf.mxu1  ;;  %v3053_v21 = vpop.f32.mrf.mxu3 }
 0x157   : > { %3673 = vst [vmem:[#allocation22_spill] sm:$0xff] %v3053_v21  ;;  %1154 = vmatmul.f32.gmra.mxu0 %v3049_v17 }
 0x159   : > { %663 = vmatmul.f32.gmra.mxu1 %v2878_v57  ;;  %793 = vmatmul.f32.gmra.mxu2 %v2880_v58  ;;  %v1784_v57 = vld [vmem:[#allocation6 + $0x438] sm:$0xff] }
 0x15a   : > { %1801 = vmatpush.msra.mxu0 %v1784_v57 }
 0x15b   : > { %995 = vmatmul.f32.gmra.mxu3 %v3007_v49 }
 0x15c   : > { %v3059_v26 = vpop.f32.mrf.mxu2  ;;  %v3061_v28 = vpop.f32.mrf.mxu0 }
 0x15e   : > { %v3065_v36 = vpop.f32.mrf.mxu1  ;;  %v3067_v38 = vpop.f32.mrf.mxu3 }
 0x15f   : > { %3674 = vst [vmem:[#allocation23_spill] sm:$0xff] %v3067_v38  ;;  %1157 = vmatmul.f32.gmra.mxu0 %v3063_v30 }
 0x161   : > { %666 = vmatmul.f32.gmra.mxu1 %v2889_v7  ;;  %796 = vmatmul.f32.gmra.mxu2 %v2891_v8  ;;  %v1459_v7 = vld [vmem:[#allocation6 + $0x130] sm:$0xff] }
 0x162   : > { %1478 = vmatpush.msra.mxu2 %v1459_v7 }
 0x163   : > { %998 = vmatmul.f32.gmra.mxu3 %v3021_v61 }
 0x164   : > { %v3073_v51 = vpop.f32.mrf.mxu2  ;;  %v3075_v50 = vpop.f32.mrf.mxu0 }
 0x166   : > { %v3079_v29 = vpop.f32.mrf.mxu1  ;;  %v3081_v1 = vpop.f32.mrf.mxu3 }
 0x167   : > { %3675 = vst [vmem:[#allocation24_spill] sm:$0xff] %v3081_v1  ;;  %1160 = vmatmul.f32.gmra.mxu0 %v3077_v9 }
 0x169   : > { %669 = vmatmul.f32.gmra.mxu1 %v2901_v23  ;;  %799 = vmatmul.f32.gmra.mxu2 %v2903_v24  ;;  %v1783_v23 = vld [vmem:[#allocation6 + $0x430] sm:$0xff] }
 0x16a   : > { %1802 = vmatpush.msra.mxu0 %v1783_v23 }
 0x16b   : > { %1001 = vmatmul.f32.gmra.mxu3 %v3035_v5 }
 0x16c   : > { %v3087_v41 = vpop.f32.mrf.mxu2  ;;  %v3089_v47 = vpop.f32.mrf.mxu0 }
 0x16d   : > { %3676 = vst [vmem:[#allocation25_spill] sm:$0xff] %v3087_v41 }
 0x16e   : > { %v3093_v57 = vpop.f32.mrf.mxu1  ;;  %v3095_v1 = vpop.f32.mrf.mxu3 }
 0x16f   : > { %3677 = vst [vmem:[#allocation26_spill] sm:$0xff] %v3095_v1  ;;  %1163 = vmatmul.f32.gmra.mxu0 %v3091_v25 }
 0x171   : > { %672 = vmatmul.f32.gmra.mxu1 %v2913_v39  ;;  %802 = vmatmul.f32.gmra.mxu2 %v2915_v40  ;;  %v1458_v39 = vld [vmem:[#allocation6 + $0x128] sm:$0xff] }
 0x172   : > { %1479 = vmatpush.msra.mxu2 %v1458_v39  ;;  %v3123_v39 = vld [vmem:[#allocation2 + $0xd1] sm:$0xff] }
 0x173   : > { %1004 = vmatmul.f32.gmra.mxu3 %v3049_v17 }
 0x174   : > { %v3101_v7 = vpop.f32.mrf.mxu2  ;;  %v3103_v38 = vpop.f32.mrf.mxu0 }
 0x175   : > { %3678 = vst [vmem:[#allocation27_spill] sm:$0xff] %v3101_v7  ;;  %v3114_v7 = vld [vmem:[#allocation2 + $0xc9] sm:$0xff] }
 0x176   : > { %v3107_v21 = vpop.f32.mrf.mxu3  ;;  %v628_v1 = vpop.f32.mrf.mxu1 }
 0x177   : > { %3679 = vst [vmem:[#allocation28_spill] sm:$0xff] %v3107_v21  ;;  %1166 = vmatmul.f32.gmra.mxu0 %v3105_v6  ;;  %v629_v19 = vadd.f32 %v628_v1, %v3005_v48  ;;  %v1256_v21 = vld [vmem:[#allocation6 + $0x3a8] sm:$0xff] }
 0x178   : > { %1277 = vmatpush.msra.mxu1 %v1256_v21  ;;  %v1782_v1 = vld [vmem:[#allocation6 + $0x428] sm:$0xff] }
 0x179   : > { %675 = vmatmul.f32.gmra.mxu1 %v2925_v55  ;;  %805 = vmatmul.f32.gmra.mxu2 %v2927_v56 }
 0x17a   : > { %1803 = vmatpush.msra.mxu0 %v1782_v1  ;;  %v3132_v1 = vld [vmem:[#allocation2 + $0xd9] sm:$0xff] }
 0x17b   : > { %1007 = vmatmul.f32.gmra.mxu3 %v3063_v30 }
 0x17c   : > { %v758_v0 = vpop.f32.mrf.mxu2  ;;  %v1122_v53 = vpop.f32.mrf.mxu0 }
 0x17d   : > { %v854_v23 = vadd.f32 %v758_v0, %v629_v19 }
 0x17e   : > { %v631_v17 = vpop.f32.mrf.mxu1  ;;  %v960_v41 = vpop.f32.mrf.mxu3 }
 0x17f   : > { %v1056_v55 = vadd.f32 %v960_v41, %v854_v23  ;;  %1169 = vmatmul.f32.gmra.mxu0 %v3114_v7  ;;  %v632_v48 = vadd.f32 %v631_v17, %v3019_v59  ;;  %v1619_v17 = vld [vmem:[#allocation6 + $0x2a0] sm:$0xff] }
 0x180   : > { %1642 = vmatpush.msra.mxu3 %v1619_v17  ;;  %v3141_v17 = vld [vmem:[#allocation2 + $0xe1] sm:$0xff] }
 0x181   : > { %v3117_v5 = vadd.f32 %v1122_v53, %v1056_v55  ;;  %678 = vmatmul.f32.gmra.mxu1 %v2937_v14  ;;  %808 = vmatmul.f32.gmra.mxu2 %v2939_v15  ;;  %v1457_v14 = vld [vmem:[#allocation6 + $0x120] sm:$0xff] }
 0x182   : > { %1480 = vmatpush.msra.mxu2 %v1457_v14 }
 0x183   : > { %1010 = vmatmul.f32.gmra.mxu3 %v3077_v9 }
 0x184   : > { %v761_v12 = vpop.f32.mrf.mxu2  ;;  %v1125_v0 = vpop.f32.mrf.mxu0 }
 0x185   : > { %v855_v21 = vadd.f32 %v761_v12, %v632_v48 }
 0x186   : > { %v634_v41 = vpop.f32.mrf.mxu1  ;;  %v963_v19 = vpop.f32.mrf.mxu3 }
 0x187   : > { %v1057_v23 = vadd.f32 %v963_v19, %v855_v21  ;;  %1172 = vmatmul.f32.gmra.mxu0 %v3123_v39  ;;  %v635_v59 = vadd.f32 %v634_v41, %v3033_v4  ;;  %v1255_v21 = vld [vmem:[#allocation6 + $0x3a0] sm:$0xff] }
 0x188   : > { %1278 = vmatpush.msra.mxu1 %v1255_v21  ;;  %v1781_v41 = vld [vmem:[#allocation6 + $0x420] sm:$0xff] }
 0x189   : > { %v3126_v53 = vadd.f32 %v1125_v0, %v1057_v23  ;;  %681 = vmatmul.f32.gmra.mxu1 %v2949_v31  ;;  %811 = vmatmul.f32.gmra.mxu2 %v2951_v32 }
 0x18a   : > { %1804 = vmatpush.msra.mxu0 %v1781_v41  ;;  %v3150_v41 = vld [vmem:[#allocation2 + $0xf1] sm:$0xff] }
 0x18b   : > { %1013 = vmatmul.f32.gmra.mxu3 %v3091_v25 }
 0x18c   : > { %v764_v55 = vpop.f32.mrf.mxu2  ;;  %v1128_v48 = vpop.f32.mrf.mxu0 }
 0x18d   : > { %v856_v12 = vadd.f32 %v764_v55, %v635_v59 }
 0x18e   : > { %v637_v0 = vpop.f32.mrf.mxu1  ;;  %v966_v19 = vpop.f32.mrf.mxu3 }
 0x18f   : > { %v1058_v31 = vadd.f32 %v966_v19, %v856_v12  ;;  %1175 = vmatmul.f32.gmra.mxu0 %v3132_v1  ;;  %v638_v4 = vadd.f32 %v637_v0, %v3047_v16  ;;  %v1618_v0 = vld [vmem:[#allocation6 + $0x298] sm:$0xff] }
 0x190   : > { %1643 = vmatpush.msra.mxu3 %v1618_v0 }
 0x191   : > { %v3135_v23 = vadd.f32 %v1128_v48, %v1058_v31  ;;  %684 = vmatmul.f32.gmra.mxu1 %v2961_v42  ;;  %814 = vmatmul.f32.gmra.mxu2 %v2963_v44  ;;  %v1456_v42 = vld [vmem:[#allocation6 + $0x118] sm:$0xff] }
 0x192   : > { %1481 = vmatpush.msra.mxu2 %v1456_v42 }
 0x193   : > { %1016 = vmatmul.f32.gmra.mxu3 %v3105_v6 }
 0x194   : > { %v767_v14 = vpop.f32.mrf.mxu2  ;;  %v1131_v59 = vpop.f32.mrf.mxu0 }
 0x195   : > { %v857_v55 = vadd.f32 %v767_v14, %v638_v4 }
 0x196   : > { %v640_v12 = vpop.f32.mrf.mxu1  ;;  %v969_v21 = vpop.f32.mrf.mxu3 }
 0x197   : > { %v1059_v19 = vadd.f32 %v969_v21, %v857_v55  ;;  %1178 = vmatmul.f32.gmra.mxu0 %v3141_v17  ;;  %v641_v16 = vadd.f32 %v640_v12, %v3061_v28  ;;  %v1254_v55 = vld [vmem:[#allocation6 + $0x398] sm:$0xff] }
 0x198   : > { %1279 = vmatpush.msra.mxu1 %v1254_v55  ;;  %v1780_v12 = vld [vmem:[#allocation6 + $0x418] sm:$0xff] }
 0x199   : > { %v3144_v48 = vadd.f32 %v1131_v59, %v1059_v19  ;;  %687 = vmatmul.f32.gmra.mxu1 %v2880_v58  ;;  %817 = vmatmul.f32.gmra.mxu2 %v2882_v60 }
 0x19a   : > { %1805 = vmatpush.msra.mxu0 %v1780_v12  ;;  %v1253_v12 = vld [vmem:[#allocation6 + $0x390] sm:$0xff] }
 0x19b   : > { %1019 = vmatmul.f32.gmra.mxu3 %v3114_v7  ;;  %1280 = vmatpush.msra.mxu1 %v1253_v12 }
 0x19c   : > { %v770_v31 = vpop.f32.mrf.mxu2  ;;  %v1134_v4 = vpop.f32.mrf.mxu0 }
 0x19d   : > { %v858_v14 = vadd.f32 %v770_v31, %v641_v16  ;;  %v3159_v16 = vld [vmem:[#allocation2 + $0xf9] sm:$0xff] }
 0x19e   : > { %v643_v59 = vpop.f32.mrf.mxu1  ;;  %v972_v21 = vpop.f32.mrf.mxu3 }
 0x19f   : > { %v1060_v58 = vadd.f32 %v972_v21, %v858_v14  ;;  %1181 = vmatmul.f32.gmra.mxu0 %v3150_v41  ;;  %v644_v28 = vadd.f32 %v643_v59, %v3075_v50  ;;  %v1617_v50 = vld [vmem:[#allocation6 + $0x290] sm:$0xff] }
 0x1a0   : > { %1644 = vmatpush.msra.mxu3 %v1617_v50 }
 0x1a1   : > { %v3153_v60 = vadd.f32 %v1134_v4, %v1060_v58  ;;  %690 = vmatmul.f32.gmra.mxu1 %v2891_v8  ;;  %820 = vmatmul.f32.gmra.mxu2 %v2894_v11  ;;  %v1455_v8 = vld [vmem:[#allocation6 + $0x110] sm:$0xff] }
 0x1a2   : > { %1482 = vmatpush.msra.mxu2 %v1455_v8  ;;  %v3168_v58 = vld [vmem:[#allocation2 + $0x101] sm:$0xff] }
 0x1a3   : > { %1022 = vmatmul.f32.gmra.mxu3 %v3123_v39 }
 0x1a4   : > { %v773_v19 = vpop.f32.mrf.mxu2  ;;  %v1137_v42 = vpop.f32.mrf.mxu0 }
 0x1a5   : > { %v859_v0 = vadd.f32 %v773_v19, %v644_v28 }
 0x1a6   : > { %v646_v31 = vpop.f32.mrf.mxu1  ;;  %v975_v14 = vpop.f32.mrf.mxu3 }
 0x1a7   : > { %v1061_v55 = vadd.f32 %v975_v14, %v859_v0  ;;  %1184 = vmatmul.f32.gmra.mxu0 %v3159_v16  ;;  %v647_v11 = vadd.f32 %v646_v31, %v3089_v47  ;;  %v1779_v0 = vld [vmem:[#allocation6 + $0x410] sm:$0xff] }
 0x1a8   : > { %1806 = vmatpush.msra.mxu0 %v1779_v0 }
 0x1a9   : > { %v3162_v4 = vadd.f32 %v1137_v42, %v1061_v55  ;;  %693 = vmatmul.f32.gmra.mxu1 %v2903_v24  ;;  %823 = vmatmul.f32.gmra.mxu2 %v2906_v27  ;;  %v3177_v55 = vld [vmem:[#allocation2 + $0x109] sm:$0xff] }
 0x1ab   : > { %1025 = vmatmul.f32.gmra.mxu3 %v3132_v1 }
 0x1ac   : > { %v776_v59 = vpop.f32.mrf.mxu2  ;;  %v1140_v21 = vpop.f32.mrf.mxu0 }
 0x1ad   : > { %v860_v28 = vadd.f32 %v776_v59, %v647_v11 }
 0x1ae   : > { %v649_v19 = vpop.f32.mrf.mxu1  ;;  %v978_v42 = vpop.f32.mrf.mxu3 }
 0x1af   : > { %v1062_v24 = vadd.f32 %v978_v42, %v860_v28  ;;  %1187 = vmatmul.f32.gmra.mxu0 %v3168_v58  ;;  %v650_v47 = vadd.f32 %v649_v19, %v3103_v38  ;;  %v1616_v38 = vld [vmem:[#allocation6 + $0x288] sm:$0xff] }
 0x1b0   : > { %v3186_v19 = vld [vmem:[#allocation2 + $0x119] sm:$0xff]  ;;  %1645 = vmatpush.msra.mxu3 %v1616_v38 }
 0x1b1   : > { %v3171_v27 = vadd.f32 %v1140_v21, %v1062_v24  ;;  %696 = vmatmul.f32.gmra.mxu1 %v2915_v40  ;;  %826 = vmatmul.f32.gmra.mxu2 %v2918_v43  ;;  %v1454_v40 = vld [vmem:[#allocation6 + $0x108] sm:$0xff] }
 0x1b2   : > { %1483 = vmatpush.msra.mxu2 %v1454_v40  ;;  %v1252_v24 = vld [vmem:[#allocation6 + $0x388] sm:$0xff] }
 0x1b3   : > { %1028 = vmatmul.f32.gmra.mxu3 %v3141_v17  ;;  %1281 = vmatpush.msra.mxu1 %v1252_v24 }
 0x1b4   : > { %v779_v31 = vpop.f32.mrf.mxu2  ;;  %v1143_v14 = vpop.f32.mrf.mxu0 }
 0x1b5   : > { %v861_v8 = vadd.f32 %v779_v31, %v650_v47  ;;  %v1778_v31 = vld [vmem:[#allocation6 + $0x408] sm:$0xff] }
 0x1b6   : > { %v652_v11 = vpop.f32.mrf.mxu1  ;;  %v981_v50 = vpop.f32.mrf.mxu3  ;;  %1807 = vmatpush.msra.mxu0 %v1778_v31 }
 0x1b7   : > { %v1063_v59 = vadd.f32 %v981_v50, %v861_v8  ;;  %1190 = vmatmul.f32.gmra.mxu0 %v3177_v55  ;;  %v653_v43 = vadd.f32 %v652_v11, %v2997_v37  ;;  %v3195_v11 = vld [vmem:[#allocation2 + $0x121] sm:$0xff] }
 0x1b9   : > { %v3180_v21 = vadd.f32 %v1143_v14, %v1063_v59  ;;  %699 = vmatmul.f32.gmra.mxu1 %v2927_v56  ;;  %829 = vmatmul.f32.gmra.mxu2 %v2930_v62 }
 0x1bb   : > { %1031 = vmatmul.f32.gmra.mxu3 %v3150_v41 }
 0x1bc   : > { %v782_v28 = vpop.f32.mrf.mxu2  ;;  %v1146_v12 = vpop.f32.mrf.mxu0 }
 0x1bd   : > { %v862_v42 = vadd.f32 %v782_v28, %v653_v43 }
 0x1be   : > { %v655_v47 = vpop.f32.mrf.mxu1  ;;  %v984_v0 = vpop.f32.mrf.mxu3 }
 0x1bf   : > { %v1064_v56 = vadd.f32 %v984_v0, %v862_v42  ;;  %1193 = vmatmul.f32.gmra.mxu0 %v3186_v19  ;;  %v656_v37 = vadd.f32 %v655_v47, %v3009_v52  ;;  %v1615_v52 = vld [vmem:[#allocation6 + $0x280] sm:$0xff] }
 0x1c0   : > { %v3204_v42 = vld [vmem:[#allocation2 + $0x129] sm:$0xff]  ;;  %1646 = vmatpush.msra.mxu3 %v1615_v52 }
 0x1c1   : > { %v3189_v62 = vadd.f32 %v1146_v12, %v1064_v56  ;;  %702 = vmatmul.f32.gmra.mxu1 %v2939_v15  ;;  %832 = vmatmul.f32.gmra.mxu2 %v2942_v18  ;;  %v1453_v15 = vld [vmem:[#allocation6 + $0x100] sm:$0xff] }
 0x1c2   : > { %1484 = vmatpush.msra.mxu2 %v1453_v15  ;;  %v1251_v47 = vld [vmem:[#allocation6 + $0x380] sm:$0xff] }
 0x1c3   : > { %1034 = vmatmul.f32.gmra.mxu3 %v3159_v16  ;;  %1282 = vmatpush.msra.mxu1 %v1251_v47 }
 0x1c4   : > { %v785_v14 = vpop.f32.mrf.mxu2  ;;  %v1149_v8 = vpop.f32.mrf.mxu0 }
 0x1c5   : > { %v863_v50 = vadd.f32 %v785_v14, %v656_v37  ;;  %v1777_v37 = vld [vmem:[#allocation6 + $0x400] sm:$0xff] }
 0x1c6   : > { %v658_v59 = vpop.f32.mrf.mxu1  ;;  %v987_v40 = vpop.f32.mrf.mxu3  ;;  %1808 = vmatpush.msra.mxu0 %v1777_v37 }
 0x1c7   : > { %v1065_v43 = vadd.f32 %v987_v40, %v863_v50  ;;  %1196 = vmatmul.f32.gmra.mxu0 %v3195_v11  ;;  %v659_v18 = vadd.f32 %v658_v59, %v3023_v63 }
 0x1c9   : > { %v3198_v38 = vadd.f32 %v1149_v8, %v1065_v43  ;;  %705 = vmatmul.f32.gmra.mxu1 %v2951_v32  ;;  %835 = vmatmul.f32.gmra.mxu2 %v2954_v34  ;;  %v3213_v8 = vld [vmem:[#allocation2 + $0x131] sm:$0xff]  ;;  %v461_v43 = vld [vmem:[#allocation2 + $0x168] sm:$0xff] }
 0x1cb   : > { %1037 = vmatmul.f32.gmra.mxu3 %v3168_v58 }
 0x1cc   : > { %v788_v28 = vpop.f32.mrf.mxu2  ;;  %v1152_v12 = vpop.f32.mrf.mxu0 }
 0x1cd   : > { %v864_v24 = vadd.f32 %v788_v28, %v659_v18  ;;  %v3220_v28 = vld [vmem:[#allocation2 + $0x141] sm:$0xff] }
 0x1ce   : > { %v661_v0 = vpop.f32.mrf.mxu1  ;;  %v990_v56 = vpop.f32.mrf.mxu3 }
 0x1cf   : > { %v1066_v32 = vadd.f32 %v990_v56, %v864_v24  ;;  %1199 = vmatmul.f32.gmra.mxu0 %v3204_v42  ;;  %v662_v63 = vadd.f32 %v661_v0, %v3037_v10  ;;  %v462_v0 = vld [vmem:[#allocation2 + $0x170] sm:$0xff] }
 0x1d1   : > { %v3207_v34 = vadd.f32 %v1152_v12, %v1066_v32  ;;  %708 = vmatmul.f32.gmra.mxu1 %v2963_v44  ;;  %838 = vmatmul.f32.gmra.mxu2 %v2966_v45  ;;  %v2488_v45 = vld [vmem:[#allocation2 + $0x118] sm:$0xff] }
 0x1d3   : > { %1040 = vmatmul.f32.gmra.mxu3 %v3177_v55 }
 0x1d4   : > { %v791_v31 = vpop.f32.mrf.mxu2  ;;  %v1155_v14 = vpop.f32.mrf.mxu0 }
 0x1d5   : > { %v865_v50 = vadd.f32 %v791_v31, %v662_v63  ;;  %v2489_v63 = vld [vmem:[#allocation2 + $0x120] sm:$0xff] }
 0x1d6   : > { %v664_v59 = vpop.f32.mrf.mxu1  ;;  %v993_v40 = vpop.f32.mrf.mxu3 }
 0x1d7   : > { %v1067_v15 = vadd.f32 %v993_v40, %v865_v50  ;;  %1202 = vmatmul.f32.gmra.mxu0 %v3213_v8  ;;  %v665_v10 = vadd.f32 %v664_v59, %v3051_v20 }
 0x1d9   : > { %v3216_v44 = vadd.f32 %v1155_v14, %v1067_v15  ;;  %711 = vmatmul.f32.gmra.mxu1 %v2488_v45  ;;  %841 = vmatmul.f32.gmra.mxu2 %v461_v43  ;;  %v3227_v14 = vld [vmem:[#allocation2 + $0x149] sm:$0xff]  ;;  %v463_v43 = vld [vmem:[#allocation2 + $0x178] sm:$0xff] }
 0x1db   : > { %1043 = vmatmul.f32.gmra.mxu3 %v3186_v19 }
 0x1dc   : > { %v794_v18 = vpop.f32.mrf.mxu2  ;;  %v1158_v52 = vpop.f32.mrf.mxu0 }
 0x1dd   : > { %v866_v12 = vadd.f32 %v794_v18, %v665_v10  ;;  %v2490_v10 = vld [vmem:[#allocation2 + $0x128] sm:$0xff] }
 0x1de   : > { %v667_v24 = vpop.f32.mrf.mxu1  ;;  %v996_v47 = vpop.f32.mrf.mxu3 }
 0x1df   : > { %v1068_v56 = vadd.f32 %v996_v47, %v866_v12  ;;  %1205 = vmatmul.f32.gmra.mxu0 %v3220_v28  ;;  %v668_v20 = vadd.f32 %v667_v24, %v3065_v36  ;;  %v3234_v12 = vld [vmem:[#allocation2 + $0x151] sm:$0xff] }
 0x1e1   : > { %v3223_v32 = vadd.f32 %v1158_v52, %v1068_v56  ;;  %714 = vmatmul.f32.gmra.mxu1 %v2489_v63  ;;  %844 = vmatmul.f32.gmra.mxu2 %v462_v0  ;;  %v464_v56 = vld [vmem:[#allocation2 + $0x180] sm:$0xff] }
 0x1e3   : > { %1046 = vmatmul.f32.gmra.mxu3 %v3195_v11 }
 0x1e4   : > { %v797_v37 = vpop.f32.mrf.mxu2  ;;  %v1161_v31 = vpop.f32.mrf.mxu0 }
 0x1e5   : > { %v867_v50 = vadd.f32 %v797_v37, %v668_v20  ;;  %v2491_v37 = vld [vmem:[#allocation2 + $0x130] sm:$0xff] }
 0x1e6   : > { %v670_v59 = vpop.f32.mrf.mxu1  ;;  %v999_v40 = vpop.f32.mrf.mxu3 }
 0x1e7   : > { %v1069_v15 = vadd.f32 %v999_v40, %v867_v50  ;;  %1208 = vmatmul.f32.gmra.mxu0 %v3227_v14  ;;  %v671_v36 = vadd.f32 %v670_v59, %v3079_v29  ;;  %v3241_v59 = vld [vmem:[#allocation2 + $0x159] sm:$0xff] }
 0x1e9   : > { %v3230_v45 = vadd.f32 %v1161_v31, %v1069_v15  ;;  %717 = vmatmul.f32.gmra.mxu1 %v2490_v10  ;;  %847 = vmatmul.f32.gmra.mxu2 %v463_v43  ;;  %v1412_v10 = vld [vmem:[#allocation2 + $0x2] sm:$0xff] }
 0x1eb   : > { %1049 = vmatmul.f32.gmra.mxu3 %v3204_v42 }
 0x1ec   : > { %v800_v18 = vpop.f32.mrf.mxu2  ;;  %v1164_v52 = vpop.f32.mrf.mxu0 }
 0x1ed   : > { %v868_v24 = vadd.f32 %v800_v18, %v671_v36  ;;  %v1416_v18 = vld [vmem:[#allocation2 + $0x2a] sm:$0xff] }
 0x1ee   : > { %v673_v47 = vpop.f32.mrf.mxu1  ;;  %v1002_v0 = vpop.f32.mrf.mxu3 }
 0x1ef   : > { %v1070_v63 = vadd.f32 %v1002_v0, %v868_v24  ;;  %1211 = vmatmul.f32.gmra.mxu0 %v3234_v12  ;;  %v674_v29 = vadd.f32 %v673_v47, %v3093_v57  ;;  %v3248_v0 = vld [vmem:[#allocation2 + $0x52] sm:$0xff] }
 0x1f1   : > { %v3237_v20 = vadd.f32 %v1164_v52, %v1070_v63  ;;  %720 = vmatmul.f32.gmra.mxu1 %v2491_v37  ;;  %850 = vmatmul.f32.gmra.mxu2 %v464_v56 }
 0x1f3   : > { %1052 = vmatmul.f32.gmra.mxu3 %v3213_v8 }
 0x1f4   : > { %v803_v31 = vpop.f32.mrf.mxu2  ;;  %v1167_v50 = vpop.f32.mrf.mxu0 }
 0x1f5   : > { %v869_v40 = vadd.f32 %v803_v31, %v674_v29  ;;  %v1413_v29 = vld [vmem:[#allocation2 + $0xa] sm:$0xff] }
 0x1f6   : > { %v676_v43 = vpop.f32.mrf.mxu1  ;;  %v1005_v15 = vpop.f32.mrf.mxu3 }
 0x1f7   : > { %v1071_v36 = vadd.f32 %v1005_v15, %v869_v40  ;;  %1214 = vmatmul.f32.gmra.mxu0 %v3241_v59  ;;  %v677_v57 = vadd.f32 %v676_v43, %v3003_v46  ;;  %v1417_v40 = vld [vmem:[#allocation2 + $0x32] sm:$0xff]  ;;  %v3255_v15 = vld [vmem:[#allocation2 + $0x5a] sm:$0xff] }
 0x1f9   : > { %v3244_v52 = vadd.f32 %v1167_v50, %v1071_v36  ;;  %1283 = vmatmul.f32.vlgmr.msra.gmra.mxu1 %v2980_v22  ;;  %1485 = vmatmul.f32.vlgmr.msra.gmra.mxu2 %v1412_v10 }
 0x1fb   : > { %1647 = vmatmul.f32.vlgmr.msra.gmra.mxu3 %v1416_v18 }
 0x1fc   : > { %v806_v24 = vpop.f32.mrf.mxu2  ;;  %v1170_v47 = vpop.f32.mrf.mxu0 }
 0x1fd   : > { %v870_v56 = vadd.f32 %v806_v24, %v677_v57  ;;  %v1414_v24 = vld [vmem:[#allocation2 + $0x12] sm:$0xff] }
 0x1fe   : > { %v679_v63 = vpop.f32.mrf.mxu1  ;;  %v1008_v37 = vpop.f32.mrf.mxu3 }
 0x1ff   : > { %v1072_v31 = vadd.f32 %v1008_v37, %v870_v56  ;;  %1809 = vmatmul.f32.vlgmr.msra.gmra.mxu0 %v3248_v0  ;;  %v680_v22 = vadd.f32 %v679_v63, %v3017_v54  ;;  %v1418_v37 = vld [vmem:[#allocation2 + $0x3a] sm:$0xff] }
 0x201   : > { %v3251_v50 = vadd.f32 %v1170_v47, %v1072_v31  ;;  %1286 = vmatmul.f32.gmra.mxu1 %v2985_v3  ;;  %1488 = vmatmul.f32.gmra.mxu2 %v1413_v29  ;;  %v3262_v29 = vld [vmem:[#allocation2 + $0x62] sm:$0xff] }
 0x203   : > { %3680 = vst [vmem:[#allocation29_spill] sm:$0xff] %v3251_v50  ;;  %1650 = vmatmul.f32.gmra.mxu3 %v1417_v40  ;;  %v1415_v50 = vld [vmem:[#allocation2 + $0x1a] sm:$0xff] }
 0x204   : > { %v809_v46 = vpop.f32.mrf.mxu2  ;;  %v1173_v43 = vpop.f32.mrf.mxu0 }
 0x205   : > { %v871_v10 = vadd.f32 %v809_v46, %v680_v22 }
 0x206   : > { %v682_v36 = vpop.f32.mrf.mxu1  ;;  %v1011_v57 = vpop.f32.mrf.mxu3 }
 0x207   : > { %v1073_v56 = vadd.f32 %v1011_v57, %v871_v10  ;;  %1812 = vmatmul.f32.gmra.mxu0 %v3255_v15  ;;  %v683_v3 = vadd.f32 %v682_v36, %v3031_v2  ;;  %v1419_v57 = vld [vmem:[#allocation2 + $0x42] sm:$0xff] }
 0x209   : > { %v3258_v47 = vadd.f32 %v1173_v43, %v1073_v56  ;;  %1289 = vmatmul.f32.gmra.mxu1 %v2990_v33  ;;  %1491 = vmatmul.f32.gmra.mxu2 %v1414_v24  ;;  %v3269_v24 = vld [vmem:[#allocation2 + $0x6a] sm:$0xff] }
 0x20b   : > { %3681 = vst [vmem:[#allocation30_spill] sm:$0xff] %v3258_v47  ;;  %1653 = vmatmul.f32.gmra.mxu3 %v1418_v37 }
 0x20c   : > { %v812_v54 = vpop.f32.mrf.mxu2  ;;  %v1176_v63 = vpop.f32.mrf.mxu0 }
 0x20d   : > { %v872_v31 = vadd.f32 %v812_v54, %v683_v3 }
 0x20e   : > { %v685_v22 = vpop.f32.mrf.mxu1  ;;  %v1014_v46 = vpop.f32.mrf.mxu3 }
 0x20f   : > { %v1074_v10 = vadd.f32 %v1014_v46, %v872_v31  ;;  %1815 = vmatmul.f32.gmra.mxu0 %v3262_v29  ;;  %v686_v33 = vadd.f32 %v685_v22, %v3045_v13 }
 0x211   : > { %v3265_v43 = vadd.f32 %v1176_v63, %v1074_v10  ;;  %1292 = vmatmul.f32.gmra.mxu1 %v2995_v35  ;;  %1494 = vmatmul.f32.gmra.mxu2 %v1415_v50  ;;  %v3277_v63 = vld [vmem:[#allocation2 + $0x7a] sm:$0xff] }
 0x213   : > { %1656 = vmatmul.f32.gmra.mxu3 %v1419_v57 }
 0x214   : > { %v815_v2 = vpop.f32.mrf.mxu2  ;;  %v1179_v36 = vpop.f32.mrf.mxu0 }
 0x215   : > { %v873_v56 = vadd.f32 %v815_v2, %v686_v33 }
 0x216   : > { %v688_v3 = vpop.f32.mrf.mxu1  ;;  %v1017_v54 = vpop.f32.mrf.mxu3 }
 0x217   : > { %v1075_v47 = vadd.f32 %v1017_v54, %v873_v56  ;;  %1818 = vmatmul.f32.gmra.mxu0 %v3269_v24  ;;  %v689_v35 = vadd.f32 %v688_v3, %v3059_v26 }
 0x219   : > { %v3272_v31 = vadd.f32 %v1179_v36, %v1075_v47  ;;  %1295 = vmatmul.f32.gmra.mxu1 %v3007_v49  ;;  %1497 = vmatmul.f32.gmra.mxu2 %v1416_v18  ;;  %v3285_v47 = vld [vmem:[#allocation2 + $0x82] sm:$0xff] }
 0x21b   : > { %1659 = vmatmul.f32.gmra.mxu3 %v3248_v0 }
 0x21c   : > { %v818_v13 = vpop.f32.mrf.mxu2  ;;  %v1182_v50 = vpop.f32.mrf.mxu0 }
 0x21d   : > { %v874_v22 = vadd.f32 %v818_v13, %v689_v35  ;;  %v3682_v13 = vld [vmem:[#allocation19_spill] sm:$0xff] }
 0x21e   : > { %v691_v46 = vpop.f32.mrf.mxu1  ;;  %v1020_v10 = vpop.f32.mrf.mxu3 }
 0x21f   : > { %v1076_v33 = vadd.f32 %v1020_v10, %v874_v22  ;;  %1821 = vmatmul.f32.gmra.mxu0 %v3277_v63  ;;  %v692_v49 = vadd.f32 %v691_v46, %v3073_v51  ;;  %v3293_v22 = vld [vmem:[#allocation2 + $0x8a] sm:$0xff] }
 0x221   : > { %v3280_v2 = vadd.f32 %v1182_v50, %v1076_v33  ;;  %1298 = vmatmul.f32.gmra.mxu1 %v3021_v61  ;;  %1500 = vmatmul.f32.gmra.mxu2 %v1417_v40  ;;  %v3683_v61 = vld [vmem:[#allocation25_spill] sm:$0xff] }
 0x223   : > { %1662 = vmatmul.f32.gmra.mxu3 %v3255_v15 }
 0x224   : > { %v821_v26 = vpop.f32.mrf.mxu2  ;;  %v1185_v18 = vpop.f32.mrf.mxu0 }
 0x225   : > { %v875_v36 = vadd.f32 %v821_v26, %v692_v49 }
 0x226   : > { %v694_v56 = vpop.f32.mrf.mxu1  ;;  %v1023_v3 = vpop.f32.mrf.mxu3 }
 0x227   : > { %v1077_v54 = vadd.f32 %v1023_v3, %v875_v36  ;;  %1824 = vmatmul.f32.gmra.mxu0 %v3285_v47  ;;  %v695_v40 = vadd.f32 %v694_v56, %v3683_v61 }
 0x229   : > { %v3288_v35 = vadd.f32 %v1185_v18, %v1077_v54  ;;  %1301 = vmatmul.f32.gmra.mxu1 %v3682_v13  ;;  %1503 = vmatmul.f32.gmra.mxu2 %v1418_v37  ;;  %v3684_v18 = vld [vmem:[#allocation21_spill] sm:$0xff]  ;;  %v3685_v37 = vld [vmem:[#allocation27_spill] sm:$0xff] }
 0x22a   : > { %v3301_v54 = vld [vmem:[#allocation2 + $0x92] sm:$0xff] }
 0x22b   : > { %1665 = vmatmul.f32.gmra.mxu3 %v3262_v29 }
 0x22c   : > { %v824_v51 = vpop.f32.mrf.mxu2  ;;  %v1188_v50 = vpop.f32.mrf.mxu0 }
 0x22d   : > { %v876_v46 = vadd.f32 %v824_v51, %v695_v40 }
 0x22e   : > { %v697_v10 = vpop.f32.mrf.mxu1  ;;  %v1026_v33 = vpop.f32.mrf.mxu3 }
 0x22f   : > { %v1078_v49 = vadd.f32 %v1026_v33, %v876_v46  ;;  %1827 = vmatmul.f32.gmra.mxu0 %v3293_v22  ;;  %v698_v36 = vadd.f32 %v697_v10, %v3685_v37 }
 0x231   : > { %v3296_v26 = vadd.f32 %v1188_v50, %v1078_v49  ;;  %1304 = vmatmul.f32.gmra.mxu1 %v3684_v18  ;;  %1506 = vmatmul.f32.gmra.mxu2 %v1419_v57  ;;  %v3686_v57 = vld [vmem:[#allocation17_spill] sm:$0xff]  ;;  %v3310_v49 = vld [vmem:[#allocation2 + $0xa2] sm:$0xff] }
 0x233   : > { %1668 = vmatmul.f32.gmra.mxu3 %v3269_v24 }
 0x234   : > { %v827_v56 = vpop.f32.mrf.mxu2  ;;  %v1191_v3 = vpop.f32.mrf.mxu0 }
 0x235   : > { %v877_v13 = vadd.f32 %v827_v56, %v698_v36 }
 0x236   : > { %v700_v61 = vpop.f32.mrf.mxu1  ;;  %v1029_v40 = vpop.f32.mrf.mxu3 }
 0x237   : > { %v1079_v51 = vadd.f32 %v1029_v40, %v877_v13  ;;  %1830 = vmatmul.f32.gmra.mxu0 %v3301_v54  ;;  %v701_v50 = vadd.f32 %v700_v61, %v3686_v57  ;;  %v3319_v40 = vld [vmem:[#allocation2 + $0xaa] sm:$0xff] }
 0x239   : > { %v3304_v46 = vadd.f32 %v1191_v3, %v1079_v51  ;;  %1307 = vmatmul.f32.gmra.mxu1 %v3063_v30  ;;  %1509 = vmatmul.f32.gmra.mxu2 %v3248_v0  ;;  %v3687_v30 = vld [vmem:[#allocation18_spill] sm:$0xff] }
 0x23b   : > { %1671 = vmatmul.f32.gmra.mxu3 %v3277_v63 }
 0x23c   : > { %v830_v10 = vpop.f32.mrf.mxu2  ;;  %v1194_v33 = vpop.f32.mrf.mxu0 }
 0x23d   : > { %v878_v18 = vadd.f32 %v830_v10, %v701_v50 }
 0x23e   : > { %v703_v37 = vpop.f32.mrf.mxu1  ;;  %v1032_v36 = vpop.f32.mrf.mxu3 }
 0x23f   : > { %v1080_v56 = vadd.f32 %v1032_v36, %v878_v18  ;;  %1833 = vmatmul.f32.gmra.mxu0 %v3310_v49  ;;  %v704_v0 = vadd.f32 %v703_v37, %v3687_v30  ;;  %v3328_v36 = vld [vmem:[#allocation2 + $0xb2] sm:$0xff] }
 0x241   : > { %v3313_v3 = vadd.f32 %v1194_v33, %v1080_v56  ;;  %1310 = vmatmul.f32.gmra.mxu1 %v3077_v9  ;;  %1512 = vmatmul.f32.gmra.mxu2 %v3255_v15  ;;  %v3688_v9 = vld [vmem:[#allocation20_spill] sm:$0xff] }
 0x243   : > { %1674 = vmatmul.f32.gmra.mxu3 %v3285_v47 }
 0x244   : > { %v833_v13 = vpop.f32.mrf.mxu2  ;;  %v1197_v61 = vpop.f32.mrf.mxu0 }
 0x245   : > { %v879_v51 = vadd.f32 %v833_v13, %v704_v0 }
 0x246   : > { %v706_v57 = vpop.f32.mrf.mxu1  ;;  %v1035_v50 = vpop.f32.mrf.mxu3 }
 0x247   : > { %v1081_v10 = vadd.f32 %v1035_v50, %v879_v51  ;;  %1836 = vmatmul.f32.gmra.mxu0 %v3319_v40  ;;  %v707_v15 = vadd.f32 %v706_v57, %v3688_v9  ;;  %v3337_v50 = vld [vmem:[#allocation2 + $0xba] sm:$0xff] }
 0x249   : > { %v3322_v33 = vadd.f32 %v1197_v61, %v1081_v10  ;;  %1313 = vmatmul.f32.gmra.mxu1 %v3091_v25  ;;  %1515 = vmatmul.f32.gmra.mxu2 %v3262_v29  ;;  %v3689_v25 = vld [vmem:[#allocation22_spill] sm:$0xff] }
 0x24b   : > { %1677 = vmatmul.f32.gmra.mxu3 %v3293_v22 }
 0x24c   : > { %v836_v18 = vpop.f32.mrf.mxu2  ;;  %v1200_v37 = vpop.f32.mrf.mxu0 }
 0x24d   : > { %v880_v56 = vadd.f32 %v836_v18, %v707_v15 }
 0x24e   : > { %v709_v30 = vpop.f32.mrf.mxu1  ;;  %v1038_v0 = vpop.f32.mrf.mxu3 }
 0x24f   : > { %v1082_v13 = vadd.f32 %v1038_v0, %v880_v56  ;;  %1839 = vmatmul.f32.gmra.mxu0 %v3328_v36  ;;  %v710_v29 = vadd.f32 %v709_v30, %v3689_v25  ;;  %v3346_v0 = vld [vmem:[#allocation2 + $0xca] sm:$0xff] }
 0x251   : > { %v3331_v61 = vadd.f32 %v1200_v37, %v1082_v13  ;;  %1316 = vmatmul.f32.gmra.mxu1 %v3105_v6  ;;  %1518 = vmatmul.f32.gmra.mxu2 %v3269_v24  ;;  %v3690_v6 = vld [vmem:[#allocation23_spill] sm:$0xff] }
 0x253   : > { %1680 = vmatmul.f32.gmra.mxu3 %v3301_v54 }
 0x254   : > { %v839_v51 = vpop.f32.mrf.mxu2  ;;  %v1203_v57 = vpop.f32.mrf.mxu0 }
 0x255   : > { %v881_v10 = vadd.f32 %v839_v51, %v710_v29 }
 0x256   : > { %v712_v9 = vpop.f32.mrf.mxu1  ;;  %v1041_v15 = vpop.f32.mrf.mxu3 }
 0x257   : > { %v1083_v18 = vadd.f32 %v1041_v15, %v881_v10  ;;  %1842 = vmatmul.f32.gmra.mxu0 %v3337_v50  ;;  %v713_v24 = vadd.f32 %v712_v9, %v3690_v6  ;;  %v3355_v15 = vld [vmem:[#allocation2 + $0xd2] sm:$0xff] }
 0x259   : > { %v3340_v37 = vadd.f32 %v1203_v57, %v1083_v18  ;;  %1319 = vmatmul.f32.gmra.mxu1 %v3114_v7  ;;  %1521 = vmatmul.f32.gmra.mxu2 %v3277_v63  ;;  %v3691_v7 = vld [vmem:[#allocation24_spill] sm:$0xff] }
 0x25b   : > { %1683 = vmatmul.f32.gmra.mxu3 %v3310_v49 }
 0x25c   : > { %v842_v56 = vpop.f32.mrf.mxu2  ;;  %v1206_v30 = vpop.f32.mrf.mxu0 }
 0x25d   : > { %v882_v13 = vadd.f32 %v842_v56, %v713_v24 }
 0x25e   : > { %v715_v25 = vpop.f32.mrf.mxu1  ;;  %v1044_v29 = vpop.f32.mrf.mxu3 }
 0x25f   : > { %v1084_v51 = vadd.f32 %v1044_v29, %v882_v13  ;;  %1845 = vmatmul.f32.gmra.mxu0 %v3346_v0  ;;  %v716_v63 = vadd.f32 %v715_v25, %v3691_v7  ;;  %v3364_v29 = vld [vmem:[#allocation2 + $0xda] sm:$0xff] }
 0x261   : > { %v3349_v57 = vadd.f32 %v1206_v30, %v1084_v51  ;;  %1322 = vmatmul.f32.gmra.mxu1 %v3123_v39  ;;  %1524 = vmatmul.f32.gmra.mxu2 %v3285_v47  ;;  %v3692_v39 = vld [vmem:[#allocation26_spill] sm:$0xff] }
 0x263   : > { %1686 = vmatmul.f32.gmra.mxu3 %v3319_v40 }
 0x264   : > { %v845_v10 = vpop.f32.mrf.mxu2  ;;  %v1209_v9 = vpop.f32.mrf.mxu0 }
 0x265   : > { %v883_v18 = vadd.f32 %v845_v10, %v716_v63 }
 0x266   : > { %v718_v6 = vpop.f32.mrf.mxu1  ;;  %v1047_v24 = vpop.f32.mrf.mxu3 }
 0x267   : > { %v1085_v56 = vadd.f32 %v1047_v24, %v883_v18  ;;  %1848 = vmatmul.f32.gmra.mxu0 %v3355_v15  ;;  %v719_v47 = vadd.f32 %v718_v6, %v3692_v39  ;;  %v3373_v24 = vld [vmem:[#allocation2 + $0xe2] sm:$0xff] }
 0x269   : > { %v3358_v30 = vadd.f32 %v1209_v9, %v1085_v56  ;;  %1325 = vmatmul.f32.gmra.mxu1 %v3132_v1  ;;  %1527 = vmatmul.f32.gmra.mxu2 %v3293_v22  ;;  %v3693_v1 = vld [vmem:[#allocation28_spill] sm:$0xff] }
 0x26b   : > { %1689 = vmatmul.f32.gmra.mxu3 %v3328_v36 }
 0x26c   : > { %v848_v13 = vpop.f32.mrf.mxu2  ;;  %v1212_v25 = vpop.f32.mrf.mxu0 }
 0x26d   : > { %v884_v51 = vadd.f32 %v848_v13, %v719_v47 }
 0x26e   : > { %v721_v7 = vpop.f32.mrf.mxu1  ;;  %v1050_v63 = vpop.f32.mrf.mxu3 }
 0x26f   : > { %v1086_v10 = vadd.f32 %v1050_v63, %v884_v51  ;;  %1851 = vmatmul.f32.gmra.mxu0 %v3364_v29  ;;  %v722_v22 = vadd.f32 %v721_v7, %v3693_v1  ;;  %v3382_v7 = vld [vmem:[#allocation2 + $0xf2] sm:$0xff] }
 0x271   : > { %v3367_v9 = vadd.f32 %v1212_v25, %v1086_v10  ;;  %1328 = vmatmul.f32.gmra.mxu1 %v3141_v17  ;;  %1530 = vmatmul.f32.gmra.mxu2 %v3301_v54 }
 0x273   : > { %1692 = vmatmul.f32.gmra.mxu3 %v3337_v50 }
 0x274   : > { %v851_v18 = vpop.f32.mrf.mxu2  ;;  %v1215_v6 = vpop.f32.mrf.mxu0 }
 0x275   : > { %v885_v56 = vadd.f32 %v851_v18, %v722_v22  ;;  %v3387_v18 = vld [vmem:[%s3639_s3] ss:$0 sm:$0xff] }
 0x276   : > { %v1053_v39 = vpop.f32.mrf.mxu3  ;;  %v1284_v47 = vpop.f32.mrf.mxu1 }
 0x277   : > { %v1087_v13 = vadd.f32 %v1053_v39, %v885_v56  ;;  %1854 = vmatmul.f32.gmra.mxu0 %v3373_v24  ;;  %v1380_v17 = vadd.f32 %v1284_v47, %v3117_v5  ;;  %v1974_v5 = vld [vmem:[%s2811_s4] sm:$0xff]  ;;  %v3396_v47 = vld [vmem:[#allocation2 + $0xfa] sm:$0xff] }
 0x279   : > { %v3376_v25 = vadd.f32 %v1215_v6, %v1087_v13  ;;  %1331 = vmatmul.f32.gmra.mxu1 %v3150_v41  ;;  %1533 = vmatmul.f32.gmra.mxu2 %v3310_v49 }
 0x27b   : > { %1695 = vmatmul.f32.gmra.mxu3 %v3346_v0 }
 0x27c   : > { %v1486_v54 = vpop.f32.mrf.mxu2  ;;  %v1810_v51 = vpop.f32.mrf.mxu0 }
 0x27d   : > { %v1582_v63 = vadd.f32 %v1486_v54, %v1380_v17 }
 0x27e   : > { %v1287_v10 = vpop.f32.mrf.mxu1  ;;  %v1648_v1 = vpop.f32.mrf.mxu3 }
 0x27f   : > { %v1744_v22 = vadd.f32 %v1648_v1, %v1582_v63  ;;  %1857 = vmatmul.f32.gmra.mxu0 %v3382_v7  ;;  %v1381_v49 = vadd.f32 %v1287_v10, %v3126_v53  ;;  %v1975_v10 = vld [vmem:[%s2811_s4 + $0x8] sm:$0xff] }
 0x281   : > { %v1906_v41 = vadd.f32 %v1810_v51, %v1744_v22  ;;  %1334 = vmatmul.f32.gmra.mxu1 %v3159_v16  ;;  %1536 = vmatmul.f32.gmra.mxu2 %v3319_v40 }
 0x283   : > { %v1942_v6 = vadd.f32 %v3387_v18, %v1906_v41  ;;  %1698 = vmatmul.f32.gmra.mxu3 %v3355_v15 }
 0x284   : > { %v1489_v56 = vpop.f32.mrf.mxu2  ;;  %v1813_v39 = vpop.f32.mrf.mxu0 }
 0x285   : > { %v2006_v13 = vadd.f32 %v1974_v5, %v1942_v6  ;;  %v1583_v17 = vadd.f32 %v1489_v56, %v1381_v49  ;;  %v3406_v49 = vld [vmem:[#allocation2 + $0x102] sm:$0xff] }
 0x286   : > { %v1290_v54 = vpop.f32.mrf.mxu1  ;;  %v1651_v51 = vpop.f32.mrf.mxu3 }
 0x287   : > { %vm2038_vm0 = vcmp.ge.f32.partialorder %v2006_v13, 0.0  ;;  %v2070_v16 = vmul.f32 0.01, %v2006_v13  ;;  %v1745_v40 = vadd.f32 %v1651_v51, %v1583_v17  ;;  %1860 = vmatmul.f32.gmra.mxu0 %v3396_v47  ;;  %v1382_v1 = vadd.f32 %v1290_v54, %v3135_v23  ;;  %v1976_v54 = vld [vmem:[%s2811_s4 + $0x10] sm:$0xff] }
 0x289   : > { %v2102_v53 = vsel %vm2038_vm0, %v2006_v13, %v2070_v16  ;;  %v1907_v63 = vadd.f32 %v1813_v39, %v1745_v40  ;;  %1337 = vmatmul.f32.gmra.mxu1 %v3168_v58  ;;  %1539 = vmatmul.f32.gmra.mxu2 %v3328_v36 }
 0x28a   : > { %2134 = vst [vmem:[%s2867_s24] sm:$0xff] %v2102_v53 }
 0x28b   : > { %v1943_v22 = vadd.f32 %v3387_v18, %v1907_v63  ;;  %1701 = vmatmul.f32.gmra.mxu3 %v3364_v29  ;;  %v3416_v63 = vld [vmem:[#allocation2 + $0x10a] sm:$0xff] }
 0x28c   : > { %v1492_v41 = vpop.f32.mrf.mxu2  ;;  %v1816_v5 = vpop.f32.mrf.mxu0 }
 0x28d   : > { %v2007_v6 = vadd.f32 %v1975_v10, %v1943_v22  ;;  %v1584_v56 = vadd.f32 %v1492_v41, %v1382_v1 }
 0x28e   : > { %v1293_v39 = vpop.f32.mrf.mxu1  ;;  %v1654_v58 = vpop.f32.mrf.mxu3 }
 0x28f   : > { %vm2039_vm1 = vcmp.ge.f32.partialorder %v2007_v6, 0.0  ;;  %v2071_v36 = vmul.f32 0.01, %v2007_v6  ;;  %v1746_v13 = vadd.f32 %v1654_v58, %v1584_v56  ;;  %1863 = vmatmul.f32.gmra.mxu0 %v3406_v49  ;;  %v1383_v51 = vadd.f32 %v1293_v39, %v3144_v48 }
 0x291   : > { %v2103_v23 = vsel %vm2039_vm1, %v2007_v6, %v2071_v36  ;;  %v1908_v17 = vadd.f32 %v1816_v5, %v1746_v13  ;;  %1340 = vmatmul.f32.gmra.mxu1 %v3177_v55  ;;  %1542 = vmatmul.f32.gmra.mxu2 %v3337_v50  ;;  %v1977_v6 = vld [vmem:[%s2811_s4 + $0x18] sm:$0xff]  ;;  %v3426_v13 = vld [vmem:[#allocation2 + $0x11a] sm:$0xff] }
 0x292   : > { %2135 = vst [vmem:[%s2867_s24 + $0x8] sm:$0xff] %v2103_v23 }
 0x293   : > { %v1944_v16 = vadd.f32 %v3387_v18, %v1908_v17  ;;  %1704 = vmatmul.f32.gmra.mxu3 %v3373_v24 }
 0x294   : > { %v1495_v40 = vpop.f32.mrf.mxu2  ;;  %v1819_v53 = vpop.f32.mrf.mxu0 }
 0x295   : > { %v2008_v10 = vadd.f32 %v1976_v54, %v1944_v16  ;;  %v1585_v1 = vadd.f32 %v1495_v40, %v1383_v51  ;;  %v1978_v40 = vld [vmem:[%s2811_s4 + $0x20] sm:$0xff] }
 0x296   : > { %v1296_v22 = vpop.f32.mrf.mxu1  ;;  %v1657_v55 = vpop.f32.mrf.mxu3 }
 0x297   : > { %vm2040_vm2 = vcmp.ge.f32.partialorder %v2008_v10, 0.0  ;;  %v2072_v50 = vmul.f32 0.01, %v2008_v10  ;;  %v1747_v41 = vadd.f32 %v1657_v55, %v1585_v1  ;;  %1866 = vmatmul.f32.gmra.mxu0 %v3416_v63  ;;  %v1384_v56 = vadd.f32 %v1296_v22, %v3153_v60  ;;  %v3436_v55 = vld [vmem:[#allocation2 + $0x122] sm:$0xff] }
 0x299   : > { %v2104_v48 = vsel %vm2040_vm2, %v2008_v10, %v2072_v50  ;;  %v1909_v5 = vadd.f32 %v1819_v53, %v1747_v41  ;;  %1343 = vmatmul.f32.gmra.mxu1 %v3186_v19  ;;  %1545 = vmatmul.f32.gmra.mxu2 %v3346_v0 }
 0x29a   : > { %2136 = vst [vmem:[%s2867_s24 + $0x10] sm:$0xff] %v2104_v48 }
 0x29b   : > { %v1945_v39 = vadd.f32 %v3387_v18, %v1909_v5  ;;  %1707 = vmatmul.f32.gmra.mxu3 %v3382_v7 }
 0x29c   : > { %v1498_v58 = vpop.f32.mrf.mxu2  ;;  %v1822_v36 = vpop.f32.mrf.mxu0 }
 0x29d   : > { %v2009_v23 = vadd.f32 %v1977_v6, %v1945_v39  ;;  %v1586_v17 = vadd.f32 %v1498_v58, %v1384_v56  ;;  %v1979_v56 = vld [vmem:[%s2811_s4 + $0x28] sm:$0xff] }
 0x29e   : > { %v1299_v54 = vpop.f32.mrf.mxu1  ;;  %v1660_v19 = vpop.f32.mrf.mxu3 }
 0x29f   : > { %vm2041_vm3 = vcmp.ge.f32.partialorder %v2009_v23, 0.0  ;;  %v2073_v0 = vmul.f32 0.01, %v2009_v23  ;;  %v1748_v51 = vadd.f32 %v1660_v19, %v1586_v17  ;;  %1869 = vmatmul.f32.gmra.mxu0 %v3426_v13  ;;  %v1385_v53 = vadd.f32 %v1299_v54, %v3162_v4  ;;  %v3446_v17 = vld [vmem:[#allocation2 + $0x12a] sm:$0xff] }
 0x2a1   : > { %v2105_v60 = vsel %vm2041_vm3, %v2009_v23, %v2073_v0  ;;  %v1910_v16 = vadd.f32 %v1822_v36, %v1748_v51  ;;  %1346 = vmatmul.f32.gmra.mxu1 %v3195_v11  ;;  %1548 = vmatmul.f32.gmra.mxu2 %v3355_v15 }
 0x2a2   : > { %2137 = vst [vmem:[%s2867_s24 + $0x18] sm:$0xff] %v2105_v60 }
 0x2a3   : > { %v1946_v10 = vadd.f32 %v3387_v18, %v1910_v16  ;;  %1710 = vmatmul.f32.gmra.mxu3 %v3396_v47  ;;  %v1980_v16 = vld [vmem:[%s2811_s4 + $0x30] sm:$0xff] }
 0x2a4   : > { %v1501_v1 = vpop.f32.mrf.mxu2  ;;  %v1825_v22 = vpop.f32.mrf.mxu0 }
 0x2a5   : > { %v2010_v50 = vadd.f32 %v1978_v40, %v1946_v10  ;;  %v1587_v41 = vadd.f32 %v1501_v1, %v1385_v53 }
 0x2a6   : > { %v1302_v48 = vpop.f32.mrf.mxu1  ;;  %v1663_v11 = vpop.f32.mrf.mxu3 }
 0x2a7   : > { %vm2042_vm4 = vcmp.ge.f32.partialorder %v2010_v50, 0.0  ;;  %v2074_v15 = vmul.f32 0.01, %v2010_v50  ;;  %v1749_v5 = vadd.f32 %v1663_v11, %v1587_v41  ;;  %1872 = vmatmul.f32.gmra.mxu0 %v3436_v55  ;;  %v1386_v39 = vadd.f32 %v1302_v48, %v3171_v27 }
 0x2a9   : > { %v2106_v4 = vsel %vm2042_vm4, %v2010_v50, %v2074_v15  ;;  %v1911_v6 = vadd.f32 %v1825_v22, %v1749_v5  ;;  %1349 = vmatmul.f32.gmra.mxu1 %v3204_v42  ;;  %1551 = vmatmul.f32.gmra.mxu2 %v3364_v29  ;;  %v3456_v22 = vld [vmem:[#allocation2 + $0x132] sm:$0xff]  ;;  %v1981_v5 = vld [vmem:[%s2811_s4 + $0x38] sm:$0xff] }
 0x2aa   : > { %2138 = vst [vmem:[%s2867_s24 + $0x20] sm:$0xff] %v2106_v4 }
 0x2ab   : > { %v1947_v58 = vadd.f32 %v3387_v18, %v1911_v6  ;;  %1713 = vmatmul.f32.gmra.mxu3 %v3406_v49 }
 0x2ac   : > { %v1504_v36 = vpop.f32.mrf.mxu2  ;;  %v1828_v23 = vpop.f32.mrf.mxu0 }
 0x2ad   : > { %v2011_v54 = vadd.f32 %v1979_v56, %v1947_v58  ;;  %v1588_v19 = vadd.f32 %v1504_v36, %v1386_v39  ;;  %v3466_v58 = vld [vmem:[#allocation2 + $0x142] sm:$0xff] }
 0x2ae   : > { %v1305_v0 = vpop.f32.mrf.mxu1  ;;  %v1666_v42 = vpop.f32.mrf.mxu3 }
 0x2af   : > { %vm2043_vm5 = vcmp.ge.f32.partialorder %v2011_v54, 0.0  ;;  %v2075_v29 = vmul.f32 0.01, %v2011_v54  ;;  %v1750_v51 = vadd.f32 %v1666_v42, %v1588_v19  ;;  %1875 = vmatmul.f32.gmra.mxu0 %v3446_v17  ;;  %v1387_v40 = vadd.f32 %v1305_v0, %v3180_v21  ;;  %v1982_v42 = vld [vmem:[%s2811_s4 + $0x40] sm:$0xff] }
 0x2b1   : > { %v2107_v27 = vsel %vm2043_vm5, %v2011_v54, %v2075_v29  ;;  %v1912_v60 = vadd.f32 %v1828_v23, %v1750_v51  ;;  %1352 = vmatmul.f32.gmra.mxu1 %v3213_v8  ;;  %1554 = vmatmul.f32.gmra.mxu2 %v3373_v24 }
 0x2b2   : > { %2139 = vst [vmem:[%s2867_s24 + $0x28] sm:$0xff] %v2107_v27 }
 0x2b3   : > { %v1948_v53 = vadd.f32 %v3387_v18, %v1912_v60  ;;  %1716 = vmatmul.f32.gmra.mxu3 %v3416_v63 }
 0x2b4   : > { %v1507_v10 = vpop.f32.mrf.mxu2  ;;  %v1831_v1 = vpop.f32.mrf.mxu0 }
 0x2b5   : > { %v2012_v50 = vadd.f32 %v1980_v16, %v1948_v53  ;;  %v1589_v41 = vadd.f32 %v1507_v10, %v1387_v40  ;;  %v3476_v16 = vld [vmem:[#allocation2 + $0x14a] sm:$0xff] }
 0x2b6   : > { %v1308_v48 = vpop.f32.mrf.mxu1  ;;  %v1669_v8 = vpop.f32.mrf.mxu3 }
 0x2b7   : > { %vm2044_vm6 = vcmp.ge.f32.partialorder %v2012_v50, 0.0  ;;  %v2076_v24 = vmul.f32 0.01, %v2012_v50  ;;  %v1751_v11 = vadd.f32 %v1669_v8, %v1589_v41  ;;  %1878 = vmatmul.f32.gmra.mxu0 %v3456_v22  ;;  %v1388_v4 = vadd.f32 %v1308_v48, %v3189_v62  ;;  %v1983_v41 = vld [vmem:[%s2811_s4 + $0x48] sm:$0xff] }
 0x2b9   : > { %v2108_v21 = vsel %vm2044_vm6, %v2012_v50, %v2076_v24  ;;  %v1913_v15 = vadd.f32 %v1831_v1, %v1751_v11  ;;  %1355 = vmatmul.f32.gmra.mxu1 %v3220_v28  ;;  %1557 = vmatmul.f32.gmra.mxu2 %v3382_v7 }
 0x2ba   : > { %2140 = vst [vmem:[%s2867_s24 + $0x30] sm:$0xff] %v2108_v21  ;;  %v3486_v21 = vld [vmem:[#allocation2 + $0x152] sm:$0xff] }
 0x2bb   : > { %v1949_v6 = vadd.f32 %v3387_v18, %v1913_v15  ;;  %1719 = vmatmul.f32.gmra.mxu3 %v3426_v13 }
 0x2bc   : > { %v1510_v56 = vpop.f32.mrf.mxu2  ;;  %v1834_v39 = vpop.f32.mrf.mxu0 }
 0x2bd   : > { %v2013_v36 = vadd.f32 %v1981_v5, %v1949_v6  ;;  %v1590_v23 = vadd.f32 %v1510_v56, %v1388_v4 }
 0x2be   : > { %v1311_v54 = vpop.f32.mrf.mxu1  ;;  %v1672_v28 = vpop.f32.mrf.mxu3 }
 0x2bf   : > { %vm2045_vm7 = vcmp.ge.f32.partialorder %v2013_v36, 0.0  ;;  %v2077_v7 = vmul.f32 0.01, %v2013_v36  ;;  %v1752_v19 = vadd.f32 %v1672_v28, %v1590_v23  ;;  %1881 = vmatmul.f32.gmra.mxu0 %v3466_v58  ;;  %v1389_v29 = vadd.f32 %v1311_v54, %v3198_v38 }
 0x2c1   : > { %v2109_v62 = vsel %vm2045_vm7, %v2013_v36, %v2077_v7  ;;  %v1914_v0 = vadd.f32 %v1834_v39, %v1752_v19  ;;  %1358 = vmatmul.f32.gmra.mxu1 %v3227_v14  ;;  %1560 = vmatmul.f32.gmra.mxu2 %v3396_v47  ;;  %v1984_v39 = vld [vmem:[%s2811_s4 + $0x50] sm:$0xff] }
 0x2c2   : > { %2141 = vst [vmem:[%s2867_s24 + $0x38] sm:$0xff] %v2109_v62  ;;  %v3496_v7 = vld [vmem:[#allocation2 + $0x15a] sm:$0xff] }
 0x2c3   : > { %v1950_v51 = vadd.f32 %v3387_v18, %v1914_v0  ;;  %1722 = vmatmul.f32.gmra.mxu3 %v3436_v55 }
 0x2c4   : > { %v1513_v27 = vpop.f32.mrf.mxu2  ;;  %v1837_v60 = vpop.f32.mrf.mxu0 }
 0x2c5   : > { %v2014_v40 = vadd.f32 %v1982_v42, %v1950_v51  ;;  %v1591_v53 = vadd.f32 %v1513_v27, %v1389_v29  ;;  %v922_v42 = vld [vmem:[#allocation2 + $0x169] sm:$0xff] }
 0x2c6   : > { %v1314_v10 = vpop.f32.mrf.mxu1  ;;  %v1675_v14 = vpop.f32.mrf.mxu3  ;;  %v1985_v27 = vld [vmem:[%s2811_s4 + $0x58] sm:$0xff] }
 0x2c7   : > { %vm2046_vm8 = vcmp.ge.f32.partialorder %v2014_v40, 0.0  ;;  %v2078_v47 = vmul.f32 0.01, %v2014_v40  ;;  %v1753_v1 = vadd.f32 %v1675_v14, %v1591_v53  ;;  %1884 = vmatmul.f32.gmra.mxu0 %v3476_v16  ;;  %v1390_v48 = vadd.f32 %v1314_v10, %v3207_v34  ;;  %v1448_v14 = vld [vmem:[#allocation2 + $0x16a] sm:$0xff] }
 0x2c9   : > { %v2110_v38 = vsel %vm2046_vm8, %v2014_v40, %v2078_v47  ;;  %v1915_v50 = vadd.f32 %v1837_v60, %v1753_v1  ;;  %1361 = vmatmul.f32.gmra.mxu1 %v3234_v12  ;;  %1563 = vmatmul.f32.gmra.mxu2 %v3406_v49 }
 0x2ca   : > { %2142 = vst [vmem:[%s2867_s24 + $0x40] sm:$0xff] %v2110_v38 }
 0x2cb   : > { %v1951_v8 = vadd.f32 %v3387_v18, %v1915_v50  ;;  %1725 = vmatmul.f32.gmra.mxu3 %v3446_v17 }
 0x2cc   : > { %v1516_v24 = vpop.f32.mrf.mxu2  ;;  %v1840_v11 = vpop.f32.mrf.mxu0 }
 0x2cd   : > { %v2015_v15 = vadd.f32 %v1983_v41, %v1951_v8  ;;  %v1592_v5 = vadd.f32 %v1516_v24, %v1390_v48  ;;  %v923_v41 = vld [vmem:[#allocation2 + $0x171] sm:$0xff] }
 0x2ce   : > { %v1317_v4 = vpop.f32.mrf.mxu1  ;;  %v1678_v12 = vpop.f32.mrf.mxu3 }
 0x2cf   : > { %vm2047_vm9 = vcmp.ge.f32.partialorder %v2015_v15, 0.0  ;;  %v2079_v49 = vmul.f32 0.01, %v2015_v15  ;;  %v1754_v6 = vadd.f32 %v1678_v12, %v1592_v5  ;;  %1887 = vmatmul.f32.gmra.mxu0 %v3486_v21  ;;  %v1391_v36 = vadd.f32 %v1317_v4, %v3216_v44  ;;  %v1449_v4 = vld [vmem:[#allocation2 + $0x172] sm:$0xff] }
 0x2d1   : > { %v2111_v34 = vsel %vm2047_vm9, %v2015_v15, %v2079_v49  ;;  %v1916_v56 = vadd.f32 %v1840_v11, %v1754_v6  ;;  %1364 = vmatmul.f32.gmra.mxu1 %v3241_v59  ;;  %1566 = vmatmul.f32.gmra.mxu2 %v3416_v63 }
 0x2d2   : > { %2143 = vst [vmem:[%s2867_s24 + $0x48] sm:$0xff] %v2111_v34 }
 0x2d3   : > { %v1952_v23 = vadd.f32 %v3387_v18, %v1916_v56  ;;  %1728 = vmatmul.f32.gmra.mxu3 %v3456_v22  ;;  %v924_v56 = vld [vmem:[#allocation2 + $0x179] sm:$0xff] }
 0x2d4   : > { %v1519_v54 = vpop.f32.mrf.mxu2  ;;  %v1843_v28 = vpop.f32.mrf.mxu0 }
 0x2d5   : > { %v2016_v19 = vadd.f32 %v1984_v39, %v1952_v23  ;;  %v1593_v62 = vadd.f32 %v1519_v54, %v1391_v36 }
 0x2d6   : > { %v1320_v0 = vpop.f32.mrf.mxu1  ;;  %v1681_v59 = vpop.f32.mrf.mxu3 }
 0x2d7   : > { %vm2048_vm10 = vcmp.ge.f32.partialorder %v2016_v19, 0.0  ;;  %v2080_v63 = vmul.f32 0.01, %v2016_v19  ;;  %v1755_v29 = vadd.f32 %v1681_v59, %v1593_v62  ;;  %1890 = vmatmul.f32.gmra.mxu0 %v3496_v7  ;;  %v1392_v60 = vadd.f32 %v1320_v0, %v3223_v32  ;;  %v1450_v62 = vld [vmem:[#allocation2 + $0x17a] sm:$0xff] }
 0x2d9   : > { %v2112_v44 = vsel %vm2048_vm10, %v2016_v19, %v2080_v63  ;;  %v1917_v51 = vadd.f32 %v1843_v28, %v1755_v29  ;;  %1367 = vmatmul.f32.gmra.mxu1 %v922_v42  ;;  %1569 = vmatmul.f32.gmra.mxu2 %v3426_v13  ;;  %v925_v29 = vld [vmem:[#allocation2 + $0x181] sm:$0xff] }
 0x2da   : > { %2144 = vst [vmem:[%s2867_s24 + $0x50] sm:$0xff] %v2112_v44 }
 0x2db   : > { %v1953_v40 = vadd.f32 %v3387_v18, %v1917_v51  ;;  %1731 = vmatmul.f32.gmra.mxu3 %v3466_v58  ;;  %v1986_v58 = vld [vmem:[%s2811_s4 + $0x60] sm:$0xff] }
 0x2dc   : > { %v1522_v53 = vpop.f32.mrf.mxu2  ;;  %v1846_v10 = vpop.f32.mrf.mxu0 }
 0x2dd   : > { %v2017_v47 = vadd.f32 %v1985_v27, %v1953_v40  ;;  %v1594_v1 = vadd.f32 %v1522_v53, %v1392_v60 }
 0x2de   : > { %v1323_v38 = vpop.f32.mrf.mxu1  ;;  %v1684_v50 = vpop.f32.mrf.mxu3 }
 0x2df   : > { %vm2049_vm11 = vcmp.ge.f32.partialorder %v2017_v47, 0.0  ;;  %v2081_v13 = vmul.f32 0.01, %v2017_v47  ;;  %v1756_v48 = vadd.f32 %v1684_v50, %v1594_v1  ;;  %1893 = vmatmul.f32.gmra.mxu0 %v1448_v14  ;;  %v1393_v24 = vadd.f32 %v1323_v38, %v3230_v45 }
 0x2e1   : > { %v2113_v8 = vsel %vm2049_vm11, %v2017_v47, %v2081_v13  ;;  %v1918_v32 = vadd.f32 %v1846_v10, %v1756_v48  ;;  %1370 = vmatmul.f32.gmra.mxu1 %v923_v41  ;;  %1572 = vmatmul.f32.gmra.mxu2 %v3436_v55  ;;  %v1451_v10 = vld [vmem:[#allocation2 + $0x182] sm:$0xff]  ;;  %v3694_v48 = vld [vmem:[#allocation29_spill] sm:$0xff] }
 0x2e2   : > { %2145 = vst [vmem:[%s2867_s24 + $0x58] sm:$0xff] %v2113_v8 }
 0x2e3   : > { %v1954_v11 = vadd.f32 %v3387_v18, %v1918_v32  ;;  %1734 = vmatmul.f32.gmra.mxu3 %v3476_v16  ;;  %v1987_v16 = vld [vmem:[%s2811_s4 + $0x68] sm:$0xff] }
 0x2e4   : > { %v1525_v15 = vpop.f32.mrf.mxu2  ;;  %v1849_v5 = vpop.f32.mrf.mxu0 }
 0x2e5   : > { %v2018_v12 = vadd.f32 %v1986_v58, %v1954_v11  ;;  %v1595_v49 = vadd.f32 %v1525_v15, %v1393_v24 }
 0x2e6   : > { %v1326_v6 = vpop.f32.mrf.mxu1  ;;  %v1687_v34 = vpop.f32.mrf.mxu3 }
 0x2e7   : > { %vm2050_vm12 = vcmp.ge.f32.partialorder %v2018_v12, 0.0  ;;  %v2082_v55 = vmul.f32 0.01, %v2018_v12  ;;  %v1757_v39 = vadd.f32 %v1687_v34, %v1595_v49  ;;  %1896 = vmatmul.f32.gmra.mxu0 %v1449_v4  ;;  %v1394_v23 = vadd.f32 %v1326_v6, %v3237_v20  ;;  %v1990_v34 = vld [vmem:[%s2811_s4 + $0x80] sm:$0xff] }
 0x2e9   : > { %v2114_v36 = vsel %vm2050_vm12, %v2018_v12, %v2082_v55  ;;  %v1919_v45 = vadd.f32 %v1849_v5, %v1757_v39  ;;  %1373 = vmatmul.f32.gmra.mxu1 %v924_v56  ;;  %1575 = vmatmul.f32.gmra.mxu2 %v3446_v17  ;;  %v3695_v56 = vld [vmem:[#allocation30_spill] sm:$0xff] }
 0x2ea   : > { %2146 = vst [vmem:[%s2867_s24 + $0x60] sm:$0xff] %v2114_v36 }
 0x2eb   : > { %v1955_v54 = vadd.f32 %v3387_v18, %v1919_v45  ;;  %1737 = vmatmul.f32.gmra.mxu3 %v3486_v21  ;;  %v1988_v21 = vld [vmem:[%s2811_s4 + $0x70] sm:$0xff] }
 0x2ec   : > { %v1528_v28 = vpop.f32.mrf.mxu2  ;;  %v1852_v19 = vpop.f32.mrf.mxu0 }
 0x2ed   : > { %v2019_v0 = vadd.f32 %v1987_v16, %v1955_v54  ;;  %v1596_v59 = vadd.f32 %v1528_v28, %v1394_v23 }
 0x2ee   : > { %v1329_v42 = vpop.f32.mrf.mxu1  ;;  %v1690_v63 = vpop.f32.mrf.mxu3 }
 0x2ef   : > { %vm2051_vm13 = vcmp.ge.f32.partialorder %v2019_v0, 0.0  ;;  %v2083_v17 = vmul.f32 0.01, %v2019_v0  ;;  %v1758_v44 = vadd.f32 %v1690_v63, %v1596_v59  ;;  %1899 = vmatmul.f32.gmra.mxu0 %v1450_v62  ;;  %v1395_v27 = vadd.f32 %v1329_v42, %v3244_v52  ;;  %v1989_v52 = vld [vmem:[%s2811_s4 + $0x78] sm:$0xff]  ;;  %v1991_v42 = vld [vmem:[%s2811_s4 + $0x88] sm:$0xff] }
 0x2f1   : > { %v2115_v51 = vsel %vm2051_vm13, %v2019_v0, %v2083_v17  ;;  %v1920_v20 = vadd.f32 %v1852_v19, %v1758_v44  ;;  %1376 = vmatmul.f32.gmra.mxu1 %v925_v29  ;;  %1578 = vmatmul.f32.gmra.mxu2 %v3456_v22 }
 0x2f2   : > { %2147 = vst [vmem:[%s2867_s24 + $0x68] sm:$0xff] %v2115_v51 }
 0x2f3   : > { %v1956_v60 = vadd.f32 %v3387_v18, %v1920_v20  ;;  %1740 = vmatmul.f32.gmra.mxu3 %v3496_v7 }
 0x2f4   : > { %v1531_v40 = vpop.f32.mrf.mxu2  ;;  %v1855_v53 = vpop.f32.mrf.mxu0 }
 0x2f5   : > { %v2020_v14 = vadd.f32 %v1988_v21, %v1956_v60  ;;  %v1597_v47 = vadd.f32 %v1531_v40, %v1395_v27 }
 0x2f6   : > { %v1332_v1 = vpop.f32.mrf.mxu1  ;;  %v1693_v38 = vpop.f32.mrf.mxu3 }
 0x2f7   : > { %vm2052_vm14 = vcmp.ge.f32.partialorder %v2020_v14, 0.0  ;;  %v2084_v50 = vmul.f32 0.01, %v2020_v14  ;;  %v1759_v22 = vadd.f32 %v1693_v38, %v1597_v47  ;;  %1902 = vmatmul.f32.gmra.mxu0 %v1451_v10  ;;  %v1396_v8 = vadd.f32 %v1332_v1, %v3694_v48 }
 0x2f9   : > { %v2116_v41 = vsel %vm2052_vm14, %v2020_v14, %v2084_v50  ;;  %v1921_v13 = vadd.f32 %v1855_v53, %v1759_v22  ;;  %v1992_v14 = vld [vmem:[%s2811_s4 + $0x90] sm:$0xff] }
 0x2fa   : > { %2148 = vst [vmem:[%s2867_s24 + $0x70] sm:$0xff] %v2116_v41 }
 0x2fb   : > { %v1957_v7 = vadd.f32 %v3387_v18, %v1921_v13 }
 0x2fc   : > { %v1534_v32 = vpop.f32.mrf.mxu2  ;;  %v1858_v58 = vpop.f32.mrf.mxu0 }
 0x2fd   : > { %v2021_v24 = vadd.f32 %v1989_v52, %v1957_v7  ;;  %v1598_v11 = vadd.f32 %v1534_v32, %v1396_v8  ;;  %v1993_v32 = vld [vmem:[%s2811_s4 + $0x98] sm:$0xff] }
 0x2fe   : > { %v1335_v15 = vpop.f32.mrf.mxu1  ;;  %v1696_v5 = vpop.f32.mrf.mxu3 }
 0x2ff   : > { %vm2053_vm15 = vcmp.ge.f32.partialorder %v2021_v24, 0.0  ;;  %v2085_v4 = vmul.f32 0.01, %v2021_v24  ;;  %v1760_v12 = vadd.f32 %v1696_v5, %v1598_v11  ;;  %v1397_v55 = vadd.f32 %v1335_v15, %v3695_v56 }
 0x301   : > { %v2117_v49 = vsel %vm2053_vm15, %v2021_v24, %v2085_v4  ;;  %v1922_v6 = vadd.f32 %v1858_v58, %v1760_v12 }
 0x302   : > { %2149 = vst [vmem:[%s2867_s24 + $0x78] sm:$0xff] %v2117_v49 }
 0x303   : > { %v1958_v39 = vadd.f32 %v3387_v18, %v1922_v6 }
 0x304   : > { %v1537_v36 = vpop.f32.mrf.mxu2  ;;  %v1861_v45 = vpop.f32.mrf.mxu0 }
 0x305   : > { %v2022_v16 = vadd.f32 %v1990_v34, %v1958_v39  ;;  %v1599_v23 = vadd.f32 %v1537_v36, %v1397_v55  ;;  %v1994_v55 = vld [vmem:[%s2811_s4 + $0xa0] sm:$0xff] }
 0x306   : > { %v1338_v54 = vpop.f32.mrf.mxu1  ;;  %v1699_v28 = vpop.f32.mrf.mxu3 }
 0x307   : > { %vm2054_vm0 = vcmp.ge.f32.partialorder %v2022_v16, 0.0  ;;  %v2086_v19 = vmul.f32 0.01, %v2022_v16  ;;  %v1761_v62 = vadd.f32 %v1699_v28, %v1599_v23  ;;  %v1398_v63 = vadd.f32 %v1338_v54, %v3265_v43 }
 0x309   : > { %v2118_v0 = vsel %vm2054_vm0, %v2022_v16, %v2086_v19  ;;  %v1923_v59 = vadd.f32 %v1861_v45, %v1761_v62 }
 0x30a   : > { %2150 = vst [vmem:[%s2867_s24 + $0x80] sm:$0xff] %v2118_v0 }
 0x30b   : > { %v1959_v29 = vadd.f32 %v3387_v18, %v1923_v59 }
 0x30c   : > { %v1540_v17 = vpop.f32.mrf.mxu2  ;;  %v1864_v44 = vpop.f32.mrf.mxu0 }
 0x30d   : > { %v2023_v51 = vadd.f32 %v1991_v42, %v1959_v29  ;;  %v1600_v20 = vadd.f32 %v1540_v17, %v1398_v63  ;;  %v1995_v42 = vld [vmem:[%s2811_s4 + $0xa8] sm:$0xff] }
 0x30e   : > { %v1341_v21 = vpop.f32.mrf.mxu1  ;;  %v1702_v27 = vpop.f32.mrf.mxu3 }
 0x30f   : > { %vm2055_vm1 = vcmp.ge.f32.partialorder %v2023_v51, 0.0  ;;  %v2087_v60 = vmul.f32 0.01, %v2023_v51  ;;  %v1762_v40 = vadd.f32 %v1702_v27, %v1600_v20  ;;  %v1399_v47 = vadd.f32 %v1341_v21, %v3272_v31 }
 0x311   : > { %v2119_v53 = vsel %vm2055_vm1, %v2023_v51, %v2087_v60  ;;  %v1924_v10 = vadd.f32 %v1864_v44, %v1762_v40 }
 0x312   : > { %2151 = vst [vmem:[%s2867_s24 + $0x88] sm:$0xff] %v2119_v53 }
 0x313   : > { %v1960_v43 = vadd.f32 %v3387_v18, %v1924_v10  ;;  %v1996_v10 = vld [vmem:[%s2811_s4 + $0xb0] sm:$0xff] }
 0x314   : > { %v1543_v1 = vpop.f32.mrf.mxu2  ;;  %v1867_v38 = vpop.f32.mrf.mxu0 }
 0x315   : > { %v2024_v50 = vadd.f32 %v1992_v14, %v1960_v43  ;;  %v1601_v22 = vadd.f32 %v1543_v1, %v1399_v47 }
 0x316   : > { %v1344_v41 = vpop.f32.mrf.mxu1  ;;  %v1705_v13 = vpop.f32.mrf.mxu3 }
 0x317   : > { %vm2056_vm2 = vcmp.ge.f32.partialorder %v2024_v50, 0.0  ;;  %v2088_v52 = vmul.f32 0.01, %v2024_v50  ;;  %v1763_v48 = vadd.f32 %v1705_v13, %v1601_v22  ;;  %v1400_v58 = vadd.f32 %v1344_v41, %v3280_v2 }
 0x319   : > { %v2120_v8 = vsel %vm2056_vm2, %v2024_v50, %v2088_v52  ;;  %v1925_v7 = vadd.f32 %v1867_v38, %v1763_v48 }
 0x31a   : > { %2152 = vst [vmem:[%s2867_s24 + $0x90] sm:$0xff] %v2120_v8  ;;  %v1997_v8 = vld [vmem:[%s2811_s4 + $0xb8] sm:$0xff] }
 0x31b   : > { %v1961_v31 = vadd.f32 %v3387_v18, %v1925_v7 }
 0x31c   : > { %v1546_v24 = vpop.f32.mrf.mxu2  ;;  %v1870_v11 = vpop.f32.mrf.mxu0 }
 0x31d   : > { %v2025_v15 = vadd.f32 %v1993_v32, %v1961_v31  ;;  %v1602_v5 = vadd.f32 %v1546_v24, %v1400_v58 }
 0x31e   : > { %v1347_v4 = vpop.f32.mrf.mxu1  ;;  %v1708_v12 = vpop.f32.mrf.mxu3 }
 0x31f   : > { %vm2057_vm3 = vcmp.ge.f32.partialorder %v2025_v15, 0.0  ;;  %v2089_v49 = vmul.f32 0.01, %v2025_v15  ;;  %v1764_v6 = vadd.f32 %v1708_v12, %v1602_v5  ;;  %v1401_v39 = vadd.f32 %v1347_v4, %v3288_v35 }
 0x321   : > { %v2121_v34 = vsel %vm2057_vm3, %v2025_v15, %v2089_v49  ;;  %v1926_v56 = vadd.f32 %v1870_v11, %v1764_v6  ;;  %v1998_v6 = vld [vmem:[%s2811_s4 + $0xc0] sm:$0xff] }
 0x322   : > { %2153 = vst [vmem:[%s2867_s24 + $0x98] sm:$0xff] %v2121_v34 }
 0x323   : > { %v1962_v2 = vadd.f32 %v3387_v18, %v1926_v56 }
 0x324   : > { %v1549_v36 = vpop.f32.mrf.mxu2  ;;  %v1873_v45 = vpop.f32.mrf.mxu0 }
 0x325   : > { %v2026_v16 = vadd.f32 %v1994_v55, %v1962_v2  ;;  %v1603_v23 = vadd.f32 %v1549_v36, %v1401_v39 }
 0x326   : > { %v1350_v54 = vpop.f32.mrf.mxu1  ;;  %v1711_v28 = vpop.f32.mrf.mxu3 }
 0x327   : > { %vm2058_vm4 = vcmp.ge.f32.partialorder %v2026_v16, 0.0  ;;  %v2090_v19 = vmul.f32 0.01, %v2026_v16  ;;  %v1765_v62 = vadd.f32 %v1711_v28, %v1603_v23  ;;  %v1402_v63 = vadd.f32 %v1350_v54, %v3296_v26 }
 0x329   : > { %v2122_v0 = vsel %vm2058_vm4, %v2026_v16, %v2090_v19  ;;  %v1927_v59 = vadd.f32 %v1873_v45, %v1765_v62  ;;  %v1999_v19 = vld [vmem:[%s2811_s4 + $0xc8] sm:$0xff] }
 0x32a   : > { %2154 = vst [vmem:[%s2867_s24 + $0xa0] sm:$0xff] %v2122_v0 }
 0x32b   : > { %v1963_v35 = vadd.f32 %v3387_v18, %v1927_v59 }
 0x32c   : > { %v1552_v29 = vpop.f32.mrf.mxu2  ;;  %v1876_v17 = vpop.f32.mrf.mxu0 }
 0x32d   : > { %v2027_v44 = vadd.f32 %v1995_v42, %v1963_v35  ;;  %v1604_v51 = vadd.f32 %v1552_v29, %v1402_v63 }
 0x32e   : > { %v1353_v20 = vpop.f32.mrf.mxu1  ;;  %v1714_v21 = vpop.f32.mrf.mxu3 }
 0x32f   : > { %vm2059_vm5 = vcmp.ge.f32.partialorder %v2027_v44, 0.0  ;;  %v2091_v27 = vmul.f32 0.01, %v2027_v44  ;;  %v1766_v60 = vadd.f32 %v1714_v21, %v1604_v51  ;;  %v1403_v14 = vadd.f32 %v1353_v20, %v3304_v46  ;;  %v2000_v21 = vld [vmem:[%s2811_s4 + $0xd0] sm:$0xff] }
 0x331   : > { %v2123_v40 = vsel %vm2059_vm5, %v2027_v44, %v2091_v27  ;;  %v1928_v53 = vadd.f32 %v1876_v17, %v1766_v60 }
 0x332   : > { %2155 = vst [vmem:[%s2867_s24 + $0xa8] sm:$0xff] %v2123_v40 }
 0x333   : > { %v1964_v26 = vadd.f32 %v3387_v18, %v1928_v53 }
 0x334   : > { %v1555_v47 = vpop.f32.mrf.mxu2  ;;  %v1879_v43 = vpop.f32.mrf.mxu0 }
 0x335   : > { %v2028_v1 = vadd.f32 %v1996_v10, %v1964_v26  ;;  %v1605_v38 = vadd.f32 %v1555_v47, %v1403_v14 }
 0x336   : > { %v1356_v50 = vpop.f32.mrf.mxu1  ;;  %v1717_v22 = vpop.f32.mrf.mxu3 }
 0x337   : > { %vm2060_vm6 = vcmp.ge.f32.partialorder %v2028_v1, 0.0  ;;  %v2092_v41 = vmul.f32 0.01, %v2028_v1  ;;  %v1767_v13 = vadd.f32 %v1717_v22, %v1605_v38  ;;  %v1404_v7 = vadd.f32 %v1356_v50, %v3313_v3  ;;  %v2001_v50 = vld [vmem:[%s2811_s4 + $0xd8] sm:$0xff] }
 0x339   : > { %v2124_v52 = vsel %vm2060_vm6, %v2028_v1, %v2092_v41  ;;  %v1929_v48 = vadd.f32 %v1879_v43, %v1767_v13 }
 0x33a   : > { %2156 = vst [vmem:[%s2867_s24 + $0xb0] sm:$0xff] %v2124_v52 }
 0x33b   : > { %v1965_v46 = vadd.f32 %v3387_v18, %v1929_v48 }
 0x33c   : > { %v1558_v32 = vpop.f32.mrf.mxu2  ;;  %v1882_v58 = vpop.f32.mrf.mxu0 }
 0x33d   : > { %v2029_v31 = vadd.f32 %v1997_v8, %v1965_v46  ;;  %v1606_v24 = vadd.f32 %v1558_v32, %v1404_v7 }
 0x33e   : > { %v1359_v11 = vpop.f32.mrf.mxu1  ;;  %v1720_v15 = vpop.f32.mrf.mxu3 }
 0x33f   : > { %vm2061_vm7 = vcmp.ge.f32.partialorder %v2029_v31, 0.0  ;;  %v2093_v5 = vmul.f32 0.01, %v2029_v31  ;;  %v1768_v4 = vadd.f32 %v1720_v15, %v1606_v24  ;;  %v1405_v34 = vadd.f32 %v1359_v11, %v3322_v33  ;;  %v2002_v24 = vld [vmem:[%s2811_s4 + $0xe0] sm:$0xff] }
 0x341   : > { %v2125_v12 = vsel %vm2061_vm7, %v2029_v31, %v2093_v5  ;;  %v1930_v49 = vadd.f32 %v1882_v58, %v1768_v4 }
 0x342   : > { %2157 = vst [vmem:[%s2867_s24 + $0xb8] sm:$0xff] %v2125_v12 }
 0x343   : > { %v1966_v3 = vadd.f32 %v3387_v18, %v1930_v49 }
 0x344   : > { %v1561_v56 = vpop.f32.mrf.mxu2  ;;  %v1885_v55 = vpop.f32.mrf.mxu0 }
 0x345   : > { %v2030_v39 = vadd.f32 %v1998_v6, %v1966_v3  ;;  %v1607_v2 = vadd.f32 %v1561_v56, %v1405_v34 }
 0x346   : > { %v1362_v36 = vpop.f32.mrf.mxu1  ;;  %v1723_v45 = vpop.f32.mrf.mxu3 }
 0x347   : > { %vm2062_vm8 = vcmp.ge.f32.partialorder %v2030_v39, 0.0  ;;  %v2094_v16 = vmul.f32 0.01, %v2030_v39  ;;  %v1769_v23 = vadd.f32 %v1723_v45, %v1607_v2  ;;  %v1406_v62 = vadd.f32 %v1362_v36, %v3331_v61 }
 0x349   : > { %v2126_v54 = vsel %vm2062_vm8, %v2030_v39, %v2094_v16  ;;  %v1931_v28 = vadd.f32 %v1885_v55, %v1769_v23  ;;  %v2003_v39 = vld [vmem:[%s2811_s4 + $0xe8] sm:$0xff] }
 0x34a   : > { %2158 = vst [vmem:[%s2867_s24 + $0xc0] sm:$0xff] %v2126_v54 }
 0x34b   : > { %v1967_v33 = vadd.f32 %v3387_v18, %v1931_v28 }
 0x34c   : > { %v1564_v0 = vpop.f32.mrf.mxu2  ;;  %v1888_v59 = vpop.f32.mrf.mxu0 }
 0x34d   : > { %v2031_v42 = vadd.f32 %v1999_v19, %v1967_v33  ;;  %v1608_v63 = vadd.f32 %v1564_v0, %v1406_v62  ;;  %v2004_v0 = vld [vmem:[%s2811_s4 + $0xf0] sm:$0xff] }
 0x34e   : > { %v1365_v35 = vpop.f32.mrf.mxu1  ;;  %v1726_v29 = vpop.f32.mrf.mxu3 }
 0x34f   : > { %vm2063_vm9 = vcmp.ge.f32.partialorder %v2031_v42, 0.0  ;;  %v2095_v17 = vmul.f32 0.01, %v2031_v42  ;;  %v1770_v44 = vadd.f32 %v1726_v29, %v1608_v63  ;;  %v1407_v27 = vadd.f32 %v1365_v35, %v3340_v37 }
 0x351   : > { %v2127_v51 = vsel %vm2063_vm9, %v2031_v42, %v2095_v17  ;;  %v1932_v20 = vadd.f32 %v1888_v59, %v1770_v44 }
 0x352   : > { %2159 = vst [vmem:[%s2867_s24 + $0xc8] sm:$0xff] %v2127_v51 }
 0x353   : > { %v1968_v61 = vadd.f32 %v3387_v18, %v1932_v20 }
 0x354   : > { %v1567_v60 = vpop.f32.mrf.mxu2  ;;  %v1891_v40 = vpop.f32.mrf.mxu0 }
 0x355   : > { %v2032_v53 = vadd.f32 %v2000_v21, %v1968_v61  ;;  %v1609_v10 = vadd.f32 %v1567_v60, %v1407_v27 }
 0x356   : > { %v1368_v14 = vpop.f32.mrf.mxu1  ;;  %v1729_v26 = vpop.f32.mrf.mxu3 }
 0x357   : > { %vm2064_vm10 = vcmp.ge.f32.partialorder %v2032_v53, 0.0  ;;  %v2096_v47 = vmul.f32 0.01, %v2032_v53  ;;  %v1771_v43 = vadd.f32 %v1729_v26, %v1609_v10  ;;  %v1408_v22 = vadd.f32 %v1368_v14, %v3349_v57 }
 0x359   : > { %v2128_v1 = vsel %vm2064_vm10, %v2032_v53, %v2096_v47  ;;  %v1933_v38 = vadd.f32 %v1891_v40, %v1771_v43 }
 0x35a   : > { %2160 = vst [vmem:[%s2867_s24 + $0xd0] sm:$0xff] %v2128_v1 }
 0x35b   : > { %v1969_v37 = vadd.f32 %v3387_v18, %v1933_v38 }
 0x35c   : > { %v1570_v41 = vpop.f32.mrf.mxu2  ;;  %v1894_v13 = vpop.f32.mrf.mxu0 }
 0x35d   : > { %v2033_v52 = vadd.f32 %v2001_v50, %v1969_v37  ;;  %v1610_v48 = vadd.f32 %v1570_v41, %v1408_v22 }
 0x35e   : > { %v1371_v8 = vpop.f32.mrf.mxu1  ;;  %v1732_v7 = vpop.f32.mrf.mxu3 }
 0x35f   : > { %vm2065_vm11 = vcmp.ge.f32.partialorder %v2033_v52, 0.0  ;;  %v2097_v46 = vmul.f32 0.01, %v2033_v52  ;;  %v1772_v32 = vadd.f32 %v1732_v7, %v1610_v48  ;;  %v1409_v11 = vadd.f32 %v1371_v8, %v3358_v30  ;;  %v2492_v30 = vld [vmem:[%s3639_s3] ss:$0 sm:$0xff] }
 0x361   : > { %v2129_v58 = vsel %vm2065_vm11, %v2033_v52, %v2097_v46  ;;  %v1934_v31 = vadd.f32 %v1894_v13, %v1772_v32 }
 0x362   : > { %2161 = vst [vmem:[%s2867_s24 + $0xd8] sm:$0xff] %v2129_v58 }
 0x363   : > { %v1970_v57 = vadd.f32 %v3387_v18, %v1934_v31 }
 0x364   : > { %v1573_v15 = vpop.f32.mrf.mxu2  ;;  %v1897_v5 = vpop.f32.mrf.mxu0 }
 0x365   : > { %v2034_v4 = vadd.f32 %v2002_v24, %v1970_v57  ;;  %v1611_v12 = vadd.f32 %v1573_v15, %v1409_v11 }
 0x366   : > { %v1374_v49 = vpop.f32.mrf.mxu1  ;;  %v1735_v6 = vpop.f32.mrf.mxu3 }
 0x367   : > { %vm2066_vm12 = vcmp.ge.f32.partialorder %v2034_v4, 0.0  ;;  %v2098_v34 = vmul.f32 0.01, %v2034_v4  ;;  %v1773_v3 = vadd.f32 %v1735_v6, %v1611_v12  ;;  %v1410_v2 = vadd.f32 %v1374_v49, %v3367_v9 }
 0x369   : > { %v2130_v56 = vsel %vm2066_vm12, %v2034_v4, %v2098_v34  ;;  %v1935_v55 = vadd.f32 %v1897_v5, %v1773_v3 }
 0x36a   : > { %2162 = vst [vmem:[%s2867_s24 + $0xe0] sm:$0xff] %v2130_v56 }
 0x36b   : > { %v1971_v18 = vadd.f32 %v2492_v30, %v1935_v55 }
 0x36c   : > { %v1576_v36 = vpop.f32.mrf.mxu2  ;;  %v1900_v45 = vpop.f32.mrf.mxu0 }
 0x36d   : > { %v2035_v16 = vadd.f32 %v2003_v39, %v1971_v18  ;;  %v1612_v23 = vadd.f32 %v1576_v36, %v1410_v2 }
 0x36e   : > { %v1738_v54 = vpop.f32.mrf.mxu3  ;;  %v1377_v62 = vpop.f32.mrf.mxu1 }
 0x36f   : > { %vm2067_vm13 = vcmp.ge.f32.partialorder %v2035_v16, 0.0  ;;  %v2099_v28 = vmul.f32 0.01, %v2035_v16  ;;  %v1774_v19 = vadd.f32 %v1738_v54, %v1612_v23  ;;  %v1411_v59 = vadd.f32 %v1377_v62, %v3376_v25  ;;  %v2005_v25 = vld [vmem:[%s2811_s4 + $0xf8] sm:$0xff] }
 0x371   : > { %v2131_v33 = vsel %vm2067_vm13, %v2035_v16, %v2099_v28  ;;  %v1936_v9 = vadd.f32 %v1900_v45, %v1774_v19 }
 0x372   : > { %2163 = vst [vmem:[%s2867_s24 + $0xe8] sm:$0xff] %v2131_v33 }
 0x373   : > { %v1972_v42 = vadd.f32 %v2492_v30, %v1936_v9 }
 0x374   : > { %v1579_v63 = vpop.f32.mrf.mxu2  ;;  %v1903_v44 = vpop.f32.mrf.mxu0 }
 0x375   : > { %v2036_v35 = vadd.f32 %v2004_v0, %v1972_v42  ;;  %v1613_v29 = vadd.f32 %v1579_v63, %v1411_v59 }
 0x376   : > { %v1741_v17 = vpop.f32.mrf.mxu3 }
 0x377   : > { %vm2068_vm14 = vcmp.ge.f32.partialorder %v2036_v35, 0.0  ;;  %v2100_v51 = vmul.f32 0.01, %v2036_v35  ;;  %v1775_v20 = vadd.f32 %v1741_v17, %v1613_v29 }
 0x379   : > { %v2132_v21 = vsel %vm2068_vm14, %v2036_v35, %v2100_v51  ;;  %v1937_v27 = vadd.f32 %v1903_v44, %v1775_v20 }
 0x37a   : > { %2164 = vst [vmem:[%s2867_s24 + $0xf0] sm:$0xff] %v2132_v21 }
 0x37b   : > { %v1973_v61 = vadd.f32 %v2492_v30, %v1937_v27 }
 0x37d   : > { %v2037_v60 = vadd.f32 %v2005_v25, %v1973_v61 }
 0x37f   : > { %vm2069_vm15 = vcmp.ge.f32.partialorder %v2037_v60, 0.0  ;;  %v2101_v40 = vmul.f32 0.01, %v2037_v60 }
 0x381   : > { %v2133_v53 = vsel %vm2069_vm15, %v2037_v60, %v2101_v40 }
 0x382   : > { %2165 = vst [vmem:[%s2867_s24 + $0xf8] sm:$0xff] %v2133_v53 }
 0x383   : > { %2580 = shalt.err (!%p2577_p6)
}
 0x384   : > { %s2661_s8 = smov 128   ;;  %s2662_s24 = smov 8  }
 0x385   : > { %2399 = dma.vmem_to_hbm [thread:$0]  (%p2771_p2), %s2183_s11, 4096, %s2185_s12, %s2167_s13, %s2661_s8, %s2661_s8, %s2662_s24  }
 0x386 PF: > { %s3698_s30 = sld [smem:[#allocation12_spill]]  ;;  %p2416_p8 = scmp.ge.s32.totalorder %s2655_s22, 2 }
 0x388   : > { %p2410_p9 = pnand %p2416_p8, %p2743_p5 }
 0x38a   : > { %p2411_p1 = pneg %p2410_p9 }
 0x38c   : > { %s2199_s27 = sand.u32 1, %s3698_s30  }
 0x38d   : > { %s2200_s5 = scalar_lea.sflag [#allocation5], %s2199_s27 }
 0x38e   : > { %2622 = dma.done.wait (%p2411_p1), %s2200_s5, 4096  }
 0x38f   : > { %2624 = vsyncadd (%p2411_p1), %s2200_s5, 4294963200  ;;  %s21_s22 = sadd.s32 1, %s2655_s22   ;;  %s3700_s25 = sld [smem:[#allocation14_spill]] }
 0x390   : > { %p18_p3 = scmp.ge.s32.totalorder %s21_s22, 10   ;;  %s3701_s9 = sld [smem:[#allocation16_spill]] }
 0x391   : > { %s3702_s15 = smov %s2631_s16  ;;  %s3703_s16 = smov %s2635_s17 }
 0x392   : > { %s3704_s17 = smov %s2790_s2  ;;  %s3705_s18 = smov %s2647_s20 }
 0x393   : > { %s3706_s19 = smov %s2651_s21  ;;  %20 = sbr.rel (!%p18_p3) target bundleno = 11 (0xb), region = 109 }
 0x395   : > { %s3707_s20 = smov %s3700_s25 }
 0x396   : > { %s3708_s21 = smov %s3701_s9 }
 0x398   :  { %2206 = vsyncpa [#allocation4], 1 }
 0x399   :  { %2208 = vsyncpa [#allocation4 + $0x1], 1 }
 0x39a   :  { %2209 = vsyncpa [#allocation7], 1 }
 0x39b   :  { %2210 = vsyncpa [#allocation5], 1 }
 0x39c   :  { %2212 = vsyncpa [#allocation5 + $0x1], 1 }

// kernel: resnet_block_forward.2
= control target key start
LH: loop header
LB: loop body
LE: loop exit
PB: predicated region body
PF: predicated region fallthrough
CT: control target
= control target key end

     0   :  { %s3382_s0 = inlined_call_operand.hbm [shape: f32[2,32,32,128], index: 0, kind: input, shape index: {}]   ;;  %s3383_s1 = inlined_call_operand.hbm [shape: f32[3,3,128,128], index: 1, kind: input, shape index: {}]   ;;  %s3384_s2 = inlined_call_operand.vmem [shape: f32[1,128], index: 2, kind: input, shape index: {}]   ;;  %s3385_s3 = inlined_call_operand.vmem [shape: f32[2,32,32,128], index: 3, kind: output, shape index: {}]  }
   0x1   :  { %3389 = sst [smem:[#allocation23_spill]] %s3383_s1 }
   0x2   :  { %8 = vsyncpa [#allocation4], 0 }
   0x3   :  { %10 = vsyncpa [#allocation4 + $0x1], 0 }
   0x4   :  { %11 = vsyncpa [#allocation6], 0  ;;  %s2506_s12 = smov 0   ;;  %s2508_s13 = smov 0  }
   0x5   :  { %s2510_s14 = smov 0   ;;  %s2512_s15 = smov 0  }
   0x6   :  { %s2514_s16 = smov 0   ;;  %s2516_s17 = smov 0  }
   0x7   :  { %s2518_s18 = smov 0   ;;  %s2520_s19 = smov 0  }
   0x8 LB: > { %s2180_s20 = sadd.s32 4294967295, %s2480_s19   ;;  %p49_p0 = scmp.ne.s32.totalorder %s2456_s13, %s2452_s12  ;;  %s2480_s19 = sphi %s2520_s19, %s17_s19   ;;  %s2476_s18 = sphi %s2518_s18, %s3430_s18   ;;  %s2472_s17 = sphi %s2516_s17, %s3429_s17   ;;  %s2468_s16 = sphi %s2514_s16, %s3428_s16   ;;  %s2464_s15 = sphi %s2512_s15, %s3427_s15   ;;  %s2460_s14 = sphi %s2510_s14, %s3426_s14   ;;  %s2456_s13 = sphi %s2508_s13, %s3425_s13   ;;  %s2452_s12 = sphi %s2506_s12, %s3424_s12  }
   0x9   : > { %p2546_p1 = scmp.eq.s32.totalorder %s2180_s20, 0  ;;  %p2182_p2 = scmp.ge.s32.totalorder %s2480_s19, 1 }
   0xa   : > { %p130_p3 = scmp.lt.s32.totalorder %s2480_s19, 9  ;;  %s3392_s1 = sld [smem:[#allocation23_spill]] }
   0xb   : > { %p2554_p4 = por %p2546_p1, %p49_p0  ;;  %s2482_s27 = smov [#allocation5]  }
   0xc   : > { %p2561_p5 = pnand %p2182_p2, %p130_p3  ;;  %s143_s28 = sshll.u32 %s2482_s27, 4  ;;  %s144_s28 = int_to_ptr.vmem [resolvable:$true] %s143_s28 }
   0xd   : > { %s3386_s29 = smov 128   ;;  %s2484_s30 = smov 8  }
   0xe   : > { %p2266_p6 = pneg %p2561_p5  ;;  %s26_s4 = sadd.s32 1, %s2472_s17 }
   0xf   : > { %p27_p8 = scmp.ge.s32.totalorder %s26_s4, 4  ;;  %s29_s5 = sadd.s32 1, %s2476_s18 }
  0x10   : > { %s141_s25 = sshll.u32 %s3392_s1, 4  ;;  %p2267_p7 = pnand %p2266_p6, %p2546_p1  ;;  %s142_s25 = int_to_ptr.hbm [resolvable:$true] %s141_s25 }
  0x11   : > { %p43_p9 = scmp.ne.s32.totalorder %s2460_s14, %s2456_s13  ;;  %s3432_s4 = smov (%p27_p8, %s26_s4), 0 }
  0x12   : > { %2269 = dma.hbm_to_vmem [thread:$0]  (!%p2267_p7), %s142_s25, 18432, %s144_s28, [#allocation6], %s3386_s29, %s3386_s29, %s2484_s30  }
  0x13   : > { %s3434_s5 = smov (!%p27_p8, %s29_s5), %s2476_s18  ;;  %s36_s6 = sadd.s32 1, %s2460_s14 }
  0x14   : > { %p44_p10 = scmp.eq.s32.totalorder %s2480_s19, 0  ;;  %p31_p11 = scmp.ge.s32.totalorder %s3434_s5, 2 }
  0x15   : > { %s160_s7 = sand.u32 1, %s2460_s14   ;;  %p2275_p13 = scmp.lt.s32.totalorder %s2480_s19, 8 }
  0x16   : > { %p2582_p12 = por %p44_p10, %p43_p9  ;;  %s3436_s5 = smov (%p31_p11, %s3434_s5), 0 }
  0x17   : > { %s2185_s9 = sshll.u32 %s160_s7, 10  ;;  %s2209_s10 = sshll.u32 %s2476_s18, 10 }
  0x18   : > { %s33_s11 = ssub.s32 %s2476_s18, %s3436_s5  ;;  %s169_s23 = scalar_lea.hbm %s3382_s0, %s2209_s10 }
  0x19   : > { %p34_p0 = scmp.eq.s32.totalorder %s33_s11, 0  ;;  %s170_s24 = sshll.u32 %s169_s23, 4  ;;  %s171_s24 = int_to_ptr.hbm [resolvable:$true] %s170_s24 }
  0x1a   : > { %s164_s25 = scalar_lea.vmem [#allocation3], %s2185_s9  ;;  %p2271_p2 = pnand %p2275_p13, %p2582_p12 }
  0x1b   : > { %s172_s27 = sshll.u32 %s164_s25, 4  ;;  %s161_s29 = scalar_lea.sflag [#allocation4], %s160_s7  ;;  %s173_s27 = int_to_ptr.vmem [resolvable:$true] %s172_s27 }
  0x1c   : > { %s2596_s28 = scalar_select %p34_p0, %s2460_s14, %s36_s6  }
  0x1d   : > { %s3395_s1 = smov 128   ;;  %184 = sbr.rel (%p2561_p5) target bundleno = 884 (0x374), region = 32 }
  0x1e   : > { %2273 = dma.hbm_to_vmem [thread:$0]  (!%p2271_p2), %s171_s24, 16384, %s173_s27, %s161_s29, %s3395_s1, %s3395_s1, %s2484_s30  }
  0x22   : > { %s186_s10 = sand.u32 1, %s2456_s13  }
  0x23   : > { %s2608_s9 = sshll.u32 %s186_s10, 10  ;;  %s187_s6 = scalar_lea.sflag [#allocation4], %s186_s10 }
  0x24   : > { %s190_s11 = scalar_lea.vmem [#allocation3], %s2608_s9 }
  0x25   : > { %2443 = dma.done.wait (%p2554_p4), %s187_s6, 16384  }
  0x26   : > { %2445 = vsyncadd (%p2554_p4), %s187_s6, 4294950912 }
  0x27   : > { %2447 = dma.done.wait (%p2546_p1), [#allocation6], 18432  }
  0x28   : > { %2449 = vsyncadd (%p2546_p1), [#allocation6], 4294948864  ;;  %s2620_s1 = sshll.u32 %s2464_s15, 3  ;;  %p225_p3 = scmp.lt.s32.totalorder %s2468_s16, 1  ;;  %v2485_v0 = vmov 0.0  }
  0x29   : > { %241 = vst [vmem:[#allocation2 + $0x28] sm:$0xff] %v2485_v0  ;;  %p227_p5 = scmp.lt.s32.totalorder %s2620_s1, 31  ;;  %p2197_p1 = scmp.le.s32.totalorder %s2464_s15, 0 }
  0x2a   : > { %236 = vst [vmem:[#allocation2] sm:$0xff] %v2485_v0  ;;  %s3438_s16 = smov (!%p225_p3, %s2468_s16), 1  ;;  %s2198_s23 = sadd.s32 (!%p2197_p1), 4294967295, %s2620_s1 }
  0x2b   : > { %237 = vst [vmem:[#allocation2 + $0x8] sm:$0xff] %v2485_v0  ;;  %s228_s22 = scalar_select %p227_p5, %s2620_s1, 31 }
  0x2c   : > { %238 = vst [vmem:[#allocation2 + $0x10] sm:$0xff] %v2485_v0  ;;  %s2193_s26 = sshll.u32 %s3438_s16, 7  ;;  %s2210_s16 = sshll.u32 %s2464_s15, 8 }
  0x2d   : > { %239 = vst [vmem:[#allocation2 + $0x18] sm:$0xff] %v2485_v0  ;;  %s2192_s21 = sshll.u32 %s228_s22, 2  ;;  %s2634_s20 = scalar_lea.vmem %s190_s11, %s2210_s16 [#allocation3] }
  0x2e   : > { %240 = vst [vmem:[#allocation2 + $0x20] sm:$0x3] %v2485_v0  ;;  %s231_s29 = sadd.s32 %s2193_s26, %s2192_s21  ;;  %v288_v1 = vld [vmem:[%s2634_s20] sm:$0xff]  ;;  %v289_v2 = vld [vmem:[%s2634_s20 + $0x8] sm:$0xff]  ;;  %v290_v3 = vld [vmem:[%s2634_s20 + $0x10] sm:$0xff]  ;;  %s2199_s24 = sshll.u32 (!%p2197_p1), %s2198_s23, 5 }
  0x2f   : > { %242 = vst [vmem:[#allocation2 + $0x30] sm:$0xff] %v2485_v0  ;;  %s2194_s30 = sshll.u32 %s231_s29, 3  ;;  %v291_v4 = vld [vmem:[%s2634_s20 + $0x18] sm:$0xff]  ;;  %v292_v5 = vld [vmem:[%s2634_s20 + $0x20] sm:$0xff]  ;;  %v293_v6 = vld [vmem:[%s2634_s20 + $0x28] sm:$0xff]  ;;  %s359_s25 = scalar_lea.vmem (!%p2197_p1), %s190_s11, %s2199_s24 [#allocation3] }
  0x30   : > { %243 = vst [vmem:[#allocation2 + $0x38] sm:$0xff] %v2485_v0  ;;  %s2629_s12 = scalar_lea.vmem %s3385_s3, %s2194_s30  ;;  %v294_v7 = vld [vmem:[%s2634_s20 + $0x30] sm:$0xff]  ;;  %v295_v8 = vld [vmem:[%s2634_s20 + $0x38] sm:$0xff]  ;;  %v296_v9 = vld [vmem:[%s2634_s20 + $0x40] sm:$0xff] }
  0x31   : > { %244 = vst [vmem:[#allocation2 + $0x40] sm:$0xff] %v2485_v0  ;;  %v297_v10 = vld [vmem:[%s2634_s20 + $0x48] sm:$0xff]  ;;  %v298_v11 = vld [vmem:[%s2634_s20 + $0x50] sm:$0xff]  ;;  %v299_v12 = vld [vmem:[%s2634_s20 + $0x58] sm:$0xff] }
  0x32   : > { %245 = vst [vmem:[#allocation2 + $0x48] sm:$0x3] %v2485_v0  ;;  %v300_v13 = vld [vmem:[%s2634_s20 + $0x60] sm:$0xff]  ;;  %v301_v14 = vld [vmem:[%s2634_s20 + $0x68] sm:$0xff]  ;;  %v302_v15 = vld [vmem:[%s2634_s20 + $0x70] sm:$0xff] }
  0x33   : > { %246 = vst [vmem:[#allocation2 + $0x50] sm:$0xff] %v2485_v0  ;;  %v303_v16 = vld [vmem:[%s2634_s20 + $0x78] sm:$0xff]  ;;  %v304_v17 = vld [vmem:[%s2634_s20 + $0x80] sm:$0xff]  ;;  %v305_v18 = vld [vmem:[%s2634_s20 + $0x88] sm:$0xff] }
  0x34   : > { %247 = vst [vmem:[#allocation2 + $0x58] sm:$0xff] %v2485_v0  ;;  %v306_v19 = vld [vmem:[%s2634_s20 + $0x90] sm:$0xff]  ;;  %v307_v20 = vld [vmem:[%s2634_s20 + $0x98] sm:$0xff]  ;;  %v308_v21 = vld [vmem:[%s2634_s20 + $0xa0] sm:$0xff] }
  0x35   : > { %248 = vst [vmem:[#allocation2 + $0x60] sm:$0xff] %v2485_v0  ;;  %v309_v22 = vld [vmem:[%s2634_s20 + $0xa8] sm:$0xff]  ;;  %v310_v23 = vld [vmem:[%s2634_s20 + $0xb0] sm:$0xff]  ;;  %v311_v24 = vld [vmem:[%s2634_s20 + $0xb8] sm:$0xff] }
  0x36   : > { %249 = vst [vmem:[#allocation2 + $0x68] sm:$0xff] %v2485_v0  ;;  %v312_v25 = vld [vmem:[%s2634_s20 + $0xc0] sm:$0xff]  ;;  %v313_v26 = vld [vmem:[%s2634_s20 + $0xc8] sm:$0xff]  ;;  %v314_v27 = vld [vmem:[%s2634_s20 + $0xd0] sm:$0xff] }
  0x37   : > { %250 = vst [vmem:[#allocation2 + $0x70] sm:$0x3] %v2485_v0  ;;  %v315_v28 = vld [vmem:[%s2634_s20 + $0xd8] sm:$0xff]  ;;  %v316_v29 = vld [vmem:[%s2634_s20 + $0xe0] sm:$0xff]  ;;  %v317_v30 = vld [vmem:[%s2634_s20 + $0xe8] sm:$0xff] }
  0x38   : > { %251 = vst [vmem:[#allocation2 + $0x78] sm:$0xff] %v2485_v0  ;;  %v318_v31 = vld [vmem:[%s2634_s20 + $0xf0] sm:$0xff]  ;;  %v319_v32 = vld [vmem:[%s2634_s20 + $0xf8] sm:$0xff] }
  0x39   : > { %252 = vst [vmem:[#allocation2 + $0x80] sm:$0xff] %v2485_v0 }
  0x3a   : > { %253 = vst [vmem:[#allocation2 + $0x88] sm:$0xff] %v2485_v0 }
  0x3b   : > { %254 = vst [vmem:[#allocation2 + $0x90] sm:$0xff] %v2485_v0 }
  0x3c   : > { %255 = vst [vmem:[#allocation2 + $0x98] sm:$0x3] %v2485_v0 }
  0x3d   : > { %256 = vst [vmem:[#allocation2 + $0xa0] sm:$0xff] %v2485_v0 }
  0x3e   : > { %257 = vst [vmem:[#allocation2 + $0xa8] sm:$0xff] %v2485_v0 }
  0x3f   : > { %258 = vst [vmem:[#allocation2 + $0xb0] sm:$0xff] %v2485_v0 }
  0x40   : > { %259 = vst [vmem:[#allocation2 + $0xb8] sm:$0xff] %v2485_v0 }
  0x41   : > { %260 = vst [vmem:[#allocation2 + $0xc0] sm:$0x3] %v2485_v0 }
  0x42   : > { %261 = vst [vmem:[#allocation2 + $0xc8] sm:$0xff] %v2485_v0 }
  0x43   : > { %262 = vst [vmem:[#allocation2 + $0xd0] sm:$0xff] %v2485_v0 }
  0x44   : > { %263 = vst [vmem:[#allocation2 + $0xd8] sm:$0xff] %v2485_v0 }
  0x45   : > { %264 = vst [vmem:[#allocation2 + $0xe0] sm:$0xff] %v2485_v0 }
  0x46   : > { %265 = vst [vmem:[#allocation2 + $0xe8] sm:$0x3] %v2485_v0 }
  0x47   : > { %266 = vst [vmem:[#allocation2 + $0xf0] sm:$0xff] %v2485_v0 }
  0x48   : > { %267 = vst [vmem:[#allocation2 + $0xf8] sm:$0xff] %v2485_v0 }
  0x49   : > { %268 = vst [vmem:[#allocation2 + $0x100] sm:$0xff] %v2485_v0 }
  0x4a   : > { %269 = vst [vmem:[#allocation2 + $0x108] sm:$0xff] %v2485_v0 }
  0x4b   : > { %270 = vst [vmem:[#allocation2 + $0x110] sm:$0x3] %v2485_v0 }
  0x4c   : > { %271 = vst [vmem:[#allocation2 + $0x118] sm:$0xff] %v2485_v0 }
  0x4d   : > { %272 = vst [vmem:[#allocation2 + $0x120] sm:$0xff] %v2485_v0 }
  0x4e   : > { %273 = vst [vmem:[#allocation2 + $0x128] sm:$0xff] %v2485_v0 }
  0x4f   : > { %274 = vst [vmem:[#allocation2 + $0x130] sm:$0xff] %v2485_v0 }
  0x50   : > { %275 = vst [vmem:[#allocation2 + $0x138] sm:$0x3] %v2485_v0 }
  0x51   : > { %276 = vst [vmem:[#allocation2 + $0x140] sm:$0xff] %v2485_v0 }
  0x52   : > { %277 = vst [vmem:[#allocation2 + $0x148] sm:$0xff] %v2485_v0 }
  0x53   : > { %278 = vst [vmem:[#allocation2 + $0x150] sm:$0xff] %v2485_v0 }
  0x54   : > { %279 = vst [vmem:[#allocation2 + $0x158] sm:$0xff] %v2485_v0 }
  0x55   : > { %280 = vst [vmem:[#allocation2 + $0x160] sm:$0x3] %v2485_v0 }
  0x56   : > { %281 = vst [vmem:[#allocation2 + $0x168] sm:$0xff] %v2485_v0 }
  0x57   : > { %282 = vst [vmem:[#allocation2 + $0x170] sm:$0xff] %v2485_v0 }
  0x58   : > { %283 = vst [vmem:[#allocation2 + $0x178] sm:$0xff] %v2485_v0 }
  0x59   : > { %284 = vst [vmem:[#allocation2 + $0x180] sm:$0xff] %v2485_v0 }
  0x5a   : > { %285 = vst [vmem:[#allocation2 + $0x188] sm:$0x3] %v2485_v0 }
  0x5b   : > { %321 = vst [vmem:[#allocation2 + $0x29] sm:$0xff] %v288_v1 }
  0x5c   : > { %322 = vst [vmem:[#allocation2 + $0x31] sm:$0xff] %v289_v2 }
  0x5d   : > { %323 = vst [vmem:[#allocation2 + $0x39] sm:$0xff] %v290_v3 }
  0x5e   : > { %324 = vst [vmem:[#allocation2 + $0x41] sm:$0xff] %v291_v4 }
  0x5f   : > { %325 = vst [vmem:[#allocation2 + $0x51] sm:$0xff] %v292_v5 }
  0x60   : > { %326 = vst [vmem:[#allocation2 + $0x59] sm:$0xff] %v293_v6 }
  0x61   : > { %327 = vst [vmem:[#allocation2 + $0x61] sm:$0xff] %v294_v7 }
  0x62   : > { %328 = vst [vmem:[#allocation2 + $0x69] sm:$0xff] %v295_v8 }
  0x63   : > { %329 = vst [vmem:[#allocation2 + $0x79] sm:$0xff] %v296_v9 }
  0x64   : > { %330 = vst [vmem:[#allocation2 + $0x81] sm:$0xff] %v297_v10 }
  0x65   : > { %331 = vst [vmem:[#allocation2 + $0x89] sm:$0xff] %v298_v11 }
  0x66   : > { %332 = vst [vmem:[#allocation2 + $0x91] sm:$0xff] %v299_v12 }
  0x67   : > { %333 = vst [vmem:[#allocation2 + $0xa1] sm:$0xff] %v300_v13 }
  0x68   : > { %334 = vst [vmem:[#allocation2 + $0xa9] sm:$0xff] %v301_v14 }
  0x69   : > { %335 = vst [vmem:[#allocation2 + $0xb1] sm:$0xff] %v302_v15 }
  0x6a   : > { %336 = vst [vmem:[#allocation2 + $0xb9] sm:$0xff] %v303_v16 }
  0x6b   : > { %337 = vst [vmem:[#allocation2 + $0xc9] sm:$0xff] %v304_v17 }
  0x6c   : > { %338 = vst [vmem:[#allocation2 + $0xd1] sm:$0xff] %v305_v18 }
  0x6d   : > { %339 = vst [vmem:[#allocation2 + $0xd9] sm:$0xff] %v306_v19 }
  0x6e   : > { %340 = vst [vmem:[#allocation2 + $0xe1] sm:$0xff] %v307_v20 }
  0x6f   : > { %341 = vst [vmem:[#allocation2 + $0xf1] sm:$0xff] %v308_v21 }
  0x70   : > { %342 = vst [vmem:[#allocation2 + $0xf9] sm:$0xff] %v309_v22 }
  0x71   : > { %343 = vst [vmem:[#allocation2 + $0x101] sm:$0xff] %v310_v23 }
  0x72   : > { %344 = vst [vmem:[#allocation2 + $0x109] sm:$0xff] %v311_v24 }
  0x73   : > { %345 = vst [vmem:[#allocation2 + $0x119] sm:$0xff] %v312_v25 }
  0x74   : > { %346 = vst [vmem:[#allocation2 + $0x121] sm:$0xff] %v313_v26 }
  0x75   : > { %347 = vst [vmem:[#allocation2 + $0x129] sm:$0xff] %v314_v27 }
  0x76   : > { %348 = vst [vmem:[#allocation2 + $0x131] sm:$0xff] %v315_v28  ;;  %356 = sbr.rel (%p2197_p1) target bundleno = 128 (0x80), region = 44 }
  0x77   : > { %349 = vst [vmem:[#allocation2 + $0x141] sm:$0xff] %v316_v29 }
  0x78   : > { %350 = vst [vmem:[#allocation2 + $0x149] sm:$0xff] %v317_v30 }
  0x79   : > { %351 = vst [vmem:[#allocation2 + $0x151] sm:$0xff] %v318_v31 }
  0x7a   : > { %352 = vst [vmem:[#allocation2 + $0x159] sm:$0xff] %v319_v32 }
  0x7b   : > { %v360_v33 = vld [vmem:[%s359_s25] sm:$0xff]  ;;  %v361_v34 = vld [vmem:[%s359_s25 + $0x8] sm:$0xff]  ;;  %v362_v35 = vld [vmem:[%s359_s25 + $0x10] sm:$0xff] }
  0x7c   : > { %364 = vst [vmem:[#allocation2 + $0x1] sm:$0xff] %v360_v33  ;;  %v363_v36 = vld [vmem:[%s359_s25 + $0x18] sm:$0xff] }
  0x7d   : > { %365 = vst [vmem:[#allocation2 + $0x9] sm:$0xff] %v361_v34 }
  0x7e   : > { %366 = vst [vmem:[#allocation2 + $0x11] sm:$0xff] %v362_v35 }
  0x7f   : > { %367 = vst [vmem:[#allocation2 + $0x19] sm:$0xff] %v363_v36 }
  0x80 PF: > { %p2200_p4 = scmp.ge.s32.totalorder %s2464_s15, 3 }
  0x82   : > { %371 = sbr.rel (%p2200_p4) target bundleno = 140 (0x8c), region = 48 }
  0x87   : > { %v2203_v37 = vld [vmem:[%s2634_s20 + $0x100] sm:$0xff]  ;;  %v2204_v38 = vld [vmem:[%s2634_s20 + $0x108] sm:$0xff]  ;;  %v2205_v39 = vld [vmem:[%s2634_s20 + $0x110] sm:$0xff] }
  0x88   : > { %380 = vst [vmem:[#allocation2 + $0x169] sm:$0xff] %v2203_v37  ;;  %v2206_v40 = vld [vmem:[%s2634_s20 + $0x118] sm:$0xff] }
  0x89   : > { %381 = vst [vmem:[#allocation2 + $0x171] sm:$0xff] %v2204_v38 }
  0x8a   : > { %382 = vst [vmem:[#allocation2 + $0x179] sm:$0xff] %v2205_v39 }
  0x8b   : > { %383 = vst [vmem:[#allocation2 + $0x181] sm:$0xff] %v2206_v40 }
  0x8c PF: > { %v456_v41 = vld [vmem:[#allocation5 + $0x1f8] sm:$0xff]  ;;  %v455_v42 = vld [vmem:[#allocation5 + $0x1f0] sm:$0xff]  ;;  %v454_v43 = vld [vmem:[#allocation5 + $0x1e8] sm:$0xff] }
  0x8d   : > { %2212 = vmatpush.msra.mxu1 %v456_v41  ;;  %2213 = vmatpush.msra.mxu2 %v456_v41  ;;  %v453_v44 = vld [vmem:[#allocation5 + $0x1e0] sm:$0xff]  ;;  %v452_v45 = vld [vmem:[#allocation5 + $0x1d8] sm:$0xff]  ;;  %v451_v46 = vld [vmem:[#allocation5 + $0x1d0] sm:$0xff] }
  0x8e   : > { %2214 = vmatpush.msra.mxu3 %v456_v41  ;;  %457 = vmatpush.msra.mxu0 %v456_v41  ;;  %v450_v47 = vld [vmem:[#allocation5 + $0x1c8] sm:$0xff]  ;;  %v449_v48 = vld [vmem:[#allocation5 + $0x1c0] sm:$0xff]  ;;  %v448_v49 = vld [vmem:[#allocation5 + $0x1b8] sm:$0xff] }
  0x8f   : > { %2215 = vmatpush.msra.mxu1 %v455_v42  ;;  %2216 = vmatpush.msra.mxu2 %v455_v42  ;;  %v447_v50 = vld [vmem:[#allocation5 + $0x1b0] sm:$0xff]  ;;  %v446_v51 = vld [vmem:[#allocation5 + $0x1a8] sm:$0xff]  ;;  %v445_v52 = vld [vmem:[#allocation5 + $0x1a0] sm:$0xff] }
  0x90   : > { %2217 = vmatpush.msra.mxu3 %v455_v42  ;;  %458 = vmatpush.msra.mxu0 %v455_v42  ;;  %v444_v53 = vld [vmem:[#allocation5 + $0x198] sm:$0xff]  ;;  %v443_v54 = vld [vmem:[#allocation5 + $0x190] sm:$0xff]  ;;  %v442_v55 = vld [vmem:[#allocation5 + $0x188] sm:$0xff] }
  0x91   : > { %2218 = vmatpush.msra.mxu1 %v454_v43  ;;  %2219 = vmatpush.msra.mxu2 %v454_v43  ;;  %v441_v56 = vld [vmem:[#allocation5 + $0x180] sm:$0xff]  ;;  %v2677_v57 = vld [vmem:[#allocation2 + $0x78] sm:$0xff]  ;;  %v2679_v58 = vld [vmem:[#allocation2 + $0xc8] sm:$0xff] }
  0x92   : > { %2220 = vmatpush.msra.mxu3 %v454_v43  ;;  %459 = vmatpush.msra.mxu0 %v454_v43  ;;  %v699_v59 = vld [vmem:[#allocation5 + $0x378] sm:$0xff]  ;;  %v2681_v60 = vld [vmem:[#allocation2 + $0x118] sm:$0xff]  ;;  %v698_v63 = vld [vmem:[#allocation5 + $0x370] sm:$0xff] }
  0x93   : > { %2221 = vmatpush.msra.mxu1 %v453_v44  ;;  %2222 = vmatpush.msra.mxu2 %v453_v44  ;;  %v439_v61 = vld [vmem:[#allocation5 + $0x78] sm:$0xff]  ;;  %v438_v0 = vld [vmem:[#allocation5 + $0x70] sm:$0xff]  ;;  %v697_v2 = vld [vmem:[#allocation5 + $0x368] sm:$0xff] }
  0x94   : > { %2223 = vmatpush.msra.mxu3 %v453_v44  ;;  %460 = vmatpush.msra.mxu0 %v453_v44  ;;  %v901_v62 = vld [vmem:[#allocation5 + $0xf8] sm:$0xff]  ;;  %v900_v1 = vld [vmem:[#allocation5 + $0xf0] sm:$0xff]  ;;  %v437_v4 = vld [vmem:[#allocation5 + $0x68] sm:$0xff] }
  0x95   : > { %2224 = vmatpush.msra.mxu1 %v452_v45  ;;  %2225 = vmatpush.msra.mxu2 %v452_v45  ;;  %v2686_v3 = vld [vmem:[#allocation2 + $0x28] sm:$0xff]  ;;  %v899_v5 = vld [vmem:[#allocation5 + $0xe8] sm:$0xff]  ;;  %v2688_v7 = vld [vmem:[#allocation2 + $0x80] sm:$0xff] }
  0x96   : > { %2226 = vmatpush.msra.mxu3 %v452_v45  ;;  %461 = vmatpush.msra.mxu0 %v452_v45  ;;  %v1063_v6 = vld [vmem:[#allocation5 + $0x278] sm:$0xff]  ;;  %v2690_v8 = vld [vmem:[#allocation2 + $0xd0] sm:$0xff]  ;;  %v2693_v11 = vld [vmem:[#allocation2 + $0x120] sm:$0xff] }
  0x97   : > { %2227 = vmatpush.msra.mxu1 %v451_v46  ;;  %2228 = vmatpush.msra.mxu2 %v451_v46  ;;  %v696_v9 = vld [vmem:[#allocation5 + $0x360] sm:$0xff]  ;;  %v1062_v12 = vld [vmem:[#allocation5 + $0x270] sm:$0xff]  ;;  %v695_v14 = vld [vmem:[#allocation5 + $0x358] sm:$0xff] }
  0x98   : > { %2229 = vmatpush.msra.mxu3 %v451_v46  ;;  %462 = vmatpush.msra.mxu0 %v451_v46  ;;  %v898_v10 = vld [vmem:[#allocation5 + $0xe0] sm:$0xff]  ;;  %v897_v15 = vld [vmem:[#allocation5 + $0xd8] sm:$0xff]  ;;  %v1061_v16 = vld [vmem:[#allocation5 + $0x268] sm:$0xff] }
  0x99   : > { %2230 = vmatpush.msra.mxu1 %v450_v47  ;;  %2231 = vmatpush.msra.mxu2 %v450_v47  ;;  %v436_v13 = vld [vmem:[#allocation5 + $0x60] sm:$0xff]  ;;  %v435_v17 = vld [vmem:[#allocation5 + $0x58] sm:$0xff]  ;;  %v694_v18 = vld [vmem:[#allocation5 + $0x350] sm:$0xff] }
  0x9a   : > { %2232 = vmatpush.msra.mxu3 %v450_v47  ;;  %463 = vmatpush.msra.mxu0 %v450_v47  ;;  %v2698_v19 = vld [vmem:[#allocation2 + $0x30] sm:$0xff]  ;;  %v896_v20 = vld [vmem:[#allocation5 + $0xd0] sm:$0xff]  ;;  %v2700_v23 = vld [vmem:[#allocation2 + $0x88] sm:$0xff] }
  0x9b   : > { %2233 = vmatpush.msra.mxu1 %v449_v48  ;;  %2234 = vmatpush.msra.mxu2 %v449_v48  ;;  %v1060_v21 = vld [vmem:[#allocation5 + $0x260] sm:$0xff]  ;;  %v434_v22 = vld [vmem:[#allocation5 + $0x50] sm:$0xff]  ;;  %v2702_v24 = vld [vmem:[#allocation2 + $0xd8] sm:$0xff] }
  0x9c   : > { %2235 = vmatpush.msra.mxu3 %v449_v48  ;;  %464 = vmatpush.msra.mxu0 %v449_v48  ;;  %v693_v25 = vld [vmem:[#allocation5 + $0x348] sm:$0xff]  ;;  %v2705_v27 = vld [vmem:[#allocation2 + $0x128] sm:$0xff]  ;;  %v692_v30 = vld [vmem:[#allocation5 + $0x340] sm:$0xff] }
  0x9d   : > { %2236 = vmatpush.msra.mxu1 %v448_v49  ;;  %2237 = vmatpush.msra.mxu2 %v448_v49  ;;  %v895_v26 = vld [vmem:[#allocation5 + $0xc8] sm:$0xff]  ;;  %v1059_v28 = vld [vmem:[#allocation5 + $0x258] sm:$0xff]  ;;  %v894_v31 = vld [vmem:[#allocation5 + $0xc0] sm:$0xff] }
  0x9e   : > { %2238 = vmatpush.msra.mxu3 %v448_v49  ;;  %465 = vmatpush.msra.mxu0 %v448_v49  ;;  %v433_v29 = vld [vmem:[#allocation5 + $0x48] sm:$0xff]  ;;  %v1058_v32 = vld [vmem:[#allocation5 + $0x250] sm:$0xff]  ;;  %v432_v33 = vld [vmem:[#allocation5 + $0x40] sm:$0xff] }
  0x9f   : > { %2239 = vmatpush.msra.mxu1 %v447_v50  ;;  %2240 = vmatpush.msra.mxu2 %v447_v50  ;;  %v691_v34 = vld [vmem:[#allocation5 + $0x338] sm:$0xff]  ;;  %v2710_v35 = vld [vmem:[#allocation2 + $0x38] sm:$0xff]  ;;  %v2712_v39 = vld [vmem:[#allocation2 + $0x90] sm:$0xff] }
  0xa0   : > { %2241 = vmatpush.msra.mxu3 %v447_v50  ;;  %466 = vmatpush.msra.mxu0 %v447_v50  ;;  %v893_v36 = vld [vmem:[#allocation5 + $0xb8] sm:$0xff]  ;;  %v1057_v37 = vld [vmem:[#allocation5 + $0x248] sm:$0xff]  ;;  %v2714_v40 = vld [vmem:[#allocation2 + $0xe0] sm:$0xff] }
  0xa1   : > { %2242 = vmatpush.msra.mxu1 %v446_v51  ;;  %2243 = vmatpush.msra.mxu2 %v446_v51  ;;  %v431_v38 = vld [vmem:[#allocation5 + $0x38] sm:$0xff]  ;;  %v690_v41 = vld [vmem:[#allocation5 + $0x330] sm:$0xff]  ;;  %v2717_v43 = vld [vmem:[#allocation2 + $0x130] sm:$0xff] }
  0xa2   : > { %2244 = vmatpush.msra.mxu3 %v446_v51  ;;  %467 = vmatpush.msra.mxu0 %v446_v51  ;;  %v892_v42 = vld [vmem:[#allocation5 + $0xb0] sm:$0xff]  ;;  %v1056_v44 = vld [vmem:[#allocation5 + $0x240] sm:$0xff]  ;;  %v689_v46 = vld [vmem:[#allocation5 + $0x328] sm:$0xff] }
  0xa3   : > { %2245 = vmatpush.msra.mxu1 %v445_v52  ;;  %2246 = vmatpush.msra.mxu2 %v445_v52  ;;  %v430_v45 = vld [vmem:[#allocation5 + $0x30] sm:$0xff]  ;;  %v891_v47 = vld [vmem:[#allocation5 + $0xa8] sm:$0xff]  ;;  %v1055_v48 = vld [vmem:[#allocation5 + $0x238] sm:$0xff] }
  0xa4   : > { %2247 = vmatpush.msra.mxu3 %v445_v52  ;;  %468 = vmatpush.msra.mxu0 %v445_v52  ;;  %v429_v49 = vld [vmem:[#allocation5 + $0x28] sm:$0xff]  ;;  %v688_v50 = vld [vmem:[#allocation5 + $0x320] sm:$0xff]  ;;  %v2722_v51 = vld [vmem:[#allocation2 + $0x40] sm:$0xff] }
  0xa5   : > { %2248 = vmatpush.msra.mxu1 %v444_v53  ;;  %2249 = vmatpush.msra.mxu2 %v444_v53  ;;  %v890_v52 = vld [vmem:[#allocation5 + $0xa0] sm:$0xff] }
  0xa6   : > { %2250 = vmatpush.msra.mxu3 %v444_v53  ;;  %469 = vmatpush.msra.mxu0 %v444_v53  ;;  %v1054_v53 = vld [vmem:[#allocation5 + $0x230] sm:$0xff] }
  0xa7   : > { %2251 = vmatpush.msra.mxu1 %v443_v54  ;;  %2252 = vmatpush.msra.mxu2 %v443_v54 }
  0xa8   : > { %2253 = vmatpush.msra.mxu3 %v443_v54  ;;  %470 = vmatpush.msra.mxu0 %v443_v54  ;;  %v428_v54 = vld [vmem:[#allocation5 + $0x20] sm:$0xff] }
  0xa9   : > { %2254 = vmatpush.msra.mxu1 %v442_v55  ;;  %2255 = vmatpush.msra.mxu2 %v442_v55 }
  0xaa   : > { %2256 = vmatpush.msra.mxu3 %v442_v55  ;;  %471 = vmatpush.msra.mxu0 %v442_v55  ;;  %v2724_v55 = vld [vmem:[#allocation2 + $0xa0] sm:$0xff] }
  0xab   : > { %2257 = vmatpush.msra.mxu1 %v441_v56  ;;  %2258 = vmatpush.msra.mxu2 %v441_v56 }
  0xac   : > { %497 = vmatmul.f32.vlgmr.msra.gmra.mxu1 %v2677_v57  ;;  %521 = vmatmul.f32.vlgmr.msra.gmra.mxu2 %v2679_v58 }
  0xad   : > { %700 = vmatpush.msrb.mxu2 %v699_v59  ;;  %2259 = vmatpush.msra.mxu3 %v441_v56  ;;  %v687_v59 = vld [vmem:[#allocation5 + $0x318] sm:$0xff] }
  0xae   : > { %545 = vmatmul.f32.vlgmr.msra.gmra.mxu3 %v2681_v60  ;;  %570 = vmatpush.msrb.mxu1 %v439_v61  ;;  %v889_v61 = vld [vmem:[#allocation5 + $0x98] sm:$0xff] }
  0xaf   : > { %902 = vmatpush.msrb.mxu3 %v901_v62  ;;  %701 = vmatpush.msrb.mxu2 %v698_v63  ;;  %v2729_v62 = vld [vmem:[#allocation2 + $0x140] sm:$0xff]  ;;  %v1053_v63 = vld [vmem:[#allocation5 + $0x228] sm:$0xff] }
  0xb0   : > { %571 = vmatpush.msrb.mxu1 %v438_v0  ;;  %472 = vmatpush.msra.mxu0 %v441_v56  ;;  %v2726_v56 = vld [vmem:[#allocation2 + $0xf0] sm:$0xff]  ;;  %v427_v0 = vld [vmem:[#allocation5 + $0x18] sm:$0xff] }
  0xb1   : > { %903 = vmatpush.msrb.mxu3 %v900_v1  ;;  %702 = vmatpush.msrb.mxu2 %v697_v2  ;;  %v686_v1 = vld [vmem:[#allocation5 + $0x310] sm:$0xff] }
  0xb2   : > { %473 = vmatmul.f32.vlgmr.msra.gmra.mxu0 %v2686_v3  ;;  %572 = vmatpush.msrb.mxu1 %v437_v4  ;;  %v888_v2 = vld [vmem:[#allocation5 + $0x90] sm:$0xff]  ;;  %v1052_v4 = vld [vmem:[#allocation5 + $0x220] sm:$0xff] }
  0xb3   : > { %904 = vmatpush.msrb.mxu3 %v899_v5  ;;  %1064 = vmatpush.msrb.mxu0 %v1063_v6  ;;  %v426_v5 = vld [vmem:[#allocation5 + $0x10] sm:$0xff]  ;;  %v685_v6 = vld [vmem:[#allocation5 + $0x308] sm:$0xff] }
  0xb4   : > { %500 = vmatmul.f32.gmra.mxu1 %v2688_v7  ;;  %524 = vmatmul.f32.gmra.mxu2 %v2690_v8 }
  0xb5   : > { %703 = vmatpush.msrb.mxu2 %v696_v9  ;;  %905 = vmatpush.msrb.mxu3 %v898_v10  ;;  %v2734_v9 = vld [vmem:[#allocation2 + $0x50] sm:$0xff]  ;;  %v887_v10 = vld [vmem:[#allocation5 + $0x88] sm:$0xff] }
  0xb6   : > { %548 = vmatmul.f32.gmra.mxu3 %v2693_v11  ;;  %1065 = vmatpush.msrb.mxu0 %v1062_v12  ;;  %v1051_v12 = vld [vmem:[#allocation5 + $0x218] sm:$0xff] }
  0xb7   : > { %573 = vmatpush.msrb.mxu1 %v436_v13  ;;  %704 = vmatpush.msrb.mxu2 %v695_v14  ;;  %v425_v13 = vld [vmem:[#allocation5 + $0x8] sm:$0xff]  ;;  %v2736_v14 = vld [vmem:[#allocation2 + $0xa8] sm:$0xff] }
  0xb8   : > { %906 = vmatpush.msrb.mxu3 %v897_v15  ;;  %1066 = vmatpush.msrb.mxu0 %v1061_v16  ;;  %v2738_v15 = vld [vmem:[#allocation2 + $0xf8] sm:$0xff]  ;;  %v684_v16 = vld [vmem:[#allocation5 + $0x300] sm:$0xff] }
  0xb9   : > { %574 = vmatpush.msrb.mxu1 %v435_v17  ;;  %705 = vmatpush.msrb.mxu2 %v694_v18  ;;  %v886_v17 = vld [vmem:[#allocation5 + $0x80] sm:$0xff]  ;;  %v2741_v18 = vld [vmem:[#allocation2 + $0x148] sm:$0xff] }
  0xba   : > { %476 = vmatmul.f32.gmra.mxu0 %v2698_v19  ;;  %907 = vmatpush.msrb.mxu3 %v896_v20  ;;  %v1050_v20 = vld [vmem:[#allocation5 + $0x210] sm:$0xff] }
  0xbb   : > { %1067 = vmatpush.msrb.mxu0 %v1060_v21  ;;  %575 = vmatpush.msrb.mxu1 %v434_v22  ;;  %v424_v21 = vld [vmem:[#allocation5] sm:$0xff]  ;;  %v1427_v22 = vld [vmem:[#allocation5 + $0x178] sm:$0xff] }
  0xbc   : > { %503 = vmatmul.f32.gmra.mxu1 %v2700_v23  ;;  %527 = vmatmul.f32.gmra.mxu2 %v2702_v24 }
  0xbd   : > { %706 = vmatpush.msrb.mxu2 %v693_v25  ;;  %908 = vmatpush.msrb.mxu3 %v895_v26  ;;  %v1049_v25 = vld [vmem:[#allocation5 + $0x208] sm:$0xff]  ;;  %v1589_v26 = vld [vmem:[#allocation5 + $0x2f8] sm:$0xff] }
  0xbe   : > { %551 = vmatmul.f32.gmra.mxu3 %v2705_v27  ;;  %1068 = vmatpush.msrb.mxu0 %v1059_v28  ;;  %v1225_v28 = vld [vmem:[#allocation5 + $0x3f8] sm:$0xff] }
  0xbf   : > { %576 = vmatpush.msrb.mxu1 %v433_v29  ;;  %707 = vmatpush.msrb.mxu2 %v692_v30  ;;  %v2746_v29 = vld [vmem:[#allocation2 + $0x58] sm:$0xff]  ;;  %v1048_v30 = vld [vmem:[#allocation5 + $0x200] sm:$0xff] }
  0xc0   : > { %909 = vmatpush.msrb.mxu3 %v894_v31  ;;  %1069 = vmatpush.msrb.mxu0 %v1058_v32  ;;  %v2748_v31 = vld [vmem:[#allocation2 + $0xb0] sm:$0xff]  ;;  %v2750_v32 = vld [vmem:[#allocation2 + $0x100] sm:$0xff] }
  0xc1   : > { %577 = vmatpush.msrb.mxu1 %v432_v33  ;;  %708 = vmatpush.msrb.mxu2 %v691_v34  ;;  %v1751_v33 = vld [vmem:[#allocation5 + $0x478] sm:$0xff]  ;;  %v2753_v34 = vld [vmem:[#allocation2 + $0x150] sm:$0xff] }
  0xc2   : > { %479 = vmatmul.f32.gmra.mxu0 %v2710_v35  ;;  %910 = vmatpush.msrb.mxu3 %v893_v36  ;;  %v1426_v36 = vld [vmem:[#allocation5 + $0x170] sm:$0xff] }
  0xc3   : > { %1070 = vmatpush.msrb.mxu0 %v1057_v37  ;;  %578 = vmatpush.msrb.mxu1 %v431_v38  ;;  %v1588_v37 = vld [vmem:[#allocation5 + $0x2f0] sm:$0xff] }
  0xc4   : > { %506 = vmatmul.f32.gmra.mxu1 %v2712_v39  ;;  %530 = vmatmul.f32.gmra.mxu2 %v2714_v40  ;;  %v1224_v38 = vld [vmem:[#allocation5 + $0x3f0] sm:$0xff] }
  0xc5   : > { %709 = vmatpush.msrb.mxu2 %v690_v41  ;;  %911 = vmatpush.msrb.mxu3 %v892_v42  ;;  %v2758_v41 = vld [vmem:[#allocation2 + $0x60] sm:$0xff]  ;;  %v2760_v42 = vld [vmem:[#allocation2 + $0xb8] sm:$0xff] }
  0xc6   : > { %554 = vmatmul.f32.gmra.mxu3 %v2717_v43  ;;  %1071 = vmatpush.msrb.mxu0 %v1056_v44  ;;  %v2762_v44 = vld [vmem:[#allocation2 + $0x108] sm:$0xff] }
  0xc7   : > { %579 = vmatpush.msrb.mxu1 %v430_v45  ;;  %710 = vmatpush.msrb.mxu2 %v689_v46  ;;  %v2765_v45 = vld [vmem:[#allocation2 + $0x158] sm:$0xff]  ;;  %v1750_v46 = vld [vmem:[#allocation5 + $0x470] sm:$0xff] }
  0xc8   : > { %912 = vmatpush.msrb.mxu3 %v891_v47  ;;  %1072 = vmatpush.msrb.mxu0 %v1055_v48  ;;  %v2770_v47 = vld [vmem:[#allocation2 + $0x68] sm:$0xff]  ;;  %v384_v48 = vld [vmem:[#allocation2] sm:$0xff] }
  0xc9   : > { %580 = vmatpush.msrb.mxu1 %v429_v49  ;;  %711 = vmatpush.msrb.mxu2 %v688_v50  ;;  %v845_v49 = vld [vmem:[#allocation2 + $0x1] sm:$0xff]  ;;  %v1425_v50 = vld [vmem:[#allocation5 + $0x168] sm:$0xff] }
  0xca   : > { %482 = vmatmul.f32.gmra.mxu0 %v2722_v51  ;;  %913 = vmatpush.msrb.mxu3 %v890_v52  ;;  %v1587_v52 = vld [vmem:[#allocation5 + $0x2e8] sm:$0xff] }
  0xcb   : > { %1073 = vmatpush.msrb.mxu0 %v1054_v53  ;;  %581 = vmatpush.msrb.mxu1 %v428_v54  ;;  %v1223_v53 = vld [vmem:[#allocation5 + $0x3e8] sm:$0xff]  ;;  %v849_v54 = vld [vmem:[#allocation2 + $0x29] sm:$0xff] }
  0xcc   : > { %509 = vmatmul.f32.gmra.mxu1 %v2724_v55  ;;  %533 = vmatmul.f32.gmra.mxu2 %v2726_v56 }
  0xcd   : > { %712 = vmatpush.msrb.mxu2 %v687_v59  ;;  %914 = vmatpush.msrb.mxu3 %v889_v61  ;;  %v385_v59 = vld [vmem:[#allocation2 + $0x8] sm:$0xff] }
  0xce   : > { %557 = vmatmul.f32.gmra.mxu3 %v2729_v62  ;;  %1074 = vmatpush.msrb.mxu0 %v1053_v63  ;;  %v846_v61 = vld [vmem:[#allocation2 + $0x9] sm:$0xff]  ;;  %v1749_v63 = vld [vmem:[#allocation5 + $0x468] sm:$0xff] }
  0xcf   : > { %582 = vmatpush.msrb.mxu1 %v427_v0  ;;  %713 = vmatpush.msrb.mxu2 %v686_v1  ;;  %v850_v0 = vld [vmem:[#allocation2 + $0x31] sm:$0xff] }
  0xd0   : > { %915 = vmatpush.msrb.mxu3 %v888_v2  ;;  %1075 = vmatpush.msrb.mxu0 %v1052_v4  ;;  %v386_v1 = vld [vmem:[#allocation2 + $0x10] sm:$0xff] }
  0xd1   : > { %583 = vmatpush.msrb.mxu1 %v426_v5  ;;  %714 = vmatpush.msrb.mxu2 %v685_v6  ;;  %v847_v2 = vld [vmem:[#allocation2 + $0x11] sm:$0xff] }
  0xd2   : > { %485 = vmatmul.f32.gmra.mxu0 %v2734_v9  ;;  %916 = vmatpush.msrb.mxu3 %v887_v10  ;;  %v1424_v4 = vld [vmem:[#allocation5 + $0x160] sm:$0xff]  ;;  %v851_v10 = vld [vmem:[#allocation2 + $0x39] sm:$0xff] }
  0xd3   : > { %1076 = vmatpush.msrb.mxu0 %v1051_v12  ;;  %584 = vmatpush.msrb.mxu1 %v425_v13  ;;  %v1586_v5 = vld [vmem:[#allocation5 + $0x2e0] sm:$0xff]  ;;  %v387_v12 = vld [vmem:[#allocation2 + $0x18] sm:$0xff] }
  0xd4   : > { %512 = vmatmul.f32.gmra.mxu1 %v2736_v14  ;;  %536 = vmatmul.f32.gmra.mxu2 %v2738_v15  ;;  %v1222_v6 = vld [vmem:[#allocation5 + $0x3e0] sm:$0xff]  ;;  %v848_v13 = vld [vmem:[#allocation2 + $0x19] sm:$0xff] }
  0xd5   : > { %715 = vmatpush.msrb.mxu2 %v684_v16  ;;  %917 = vmatpush.msrb.mxu3 %v886_v17  ;;  %v1748_v16 = vld [vmem:[#allocation5 + $0x460] sm:$0xff]  ;;  %v852_v17 = vld [vmem:[#allocation2 + $0x41] sm:$0xff] }
  0xd6   : > { %560 = vmatmul.f32.gmra.mxu3 %v2741_v18  ;;  %1077 = vmatpush.msrb.mxu0 %v1050_v20  ;;  %v1423_v20 = vld [vmem:[#allocation5 + $0x158] sm:$0xff] }
  0xd7   : > { %585 = vmatpush.msrb.mxu1 %v424_v21  ;;  %1428 = vmatpush.msra.mxu2 %v1427_v22  ;;  %v1585_v21 = vld [vmem:[#allocation5 + $0x2d8] sm:$0xff]  ;;  %v2779_v22 = vld [vmem:[#allocation2 + $0x51] sm:$0xff] }
  0xd8   : > { %1078 = vmatpush.msrb.mxu0 %v1049_v25  ;;  %1590 = vmatpush.msra.mxu3 %v1589_v26  ;;  %v1221_v25 = vld [vmem:[#allocation5 + $0x3d8] sm:$0xff] }
  0xd9   : > { %1226 = vmatpush.msra.mxu1 %v1225_v28  ;;  %1429 = vmatpush.msra.mxu2 %v1426_v36  ;;  %v1747_v26 = vld [vmem:[#allocation5 + $0x458] sm:$0xff]  ;;  %v1422_v28 = vld [vmem:[#allocation5 + $0x150] sm:$0xff] }
  0xda   : > { %488 = vmatmul.f32.gmra.mxu0 %v2746_v29  ;;  %1591 = vmatpush.msra.mxu3 %v1588_v37  ;;  %v1746_v36 = vld [vmem:[#allocation5 + $0x450] sm:$0xff] }
  0xdb   : > { %1079 = vmatpush.msrb.mxu0 %v1048_v30  ;;  %1227 = vmatpush.msra.mxu1 %v1224_v38  ;;  %v1584_v30 = vld [vmem:[#allocation5 + $0x2d0] sm:$0xff]  ;;  %v1421_v38 = vld [vmem:[#allocation5 + $0x148] sm:$0xff] }
  0xdc   : > { %515 = vmatmul.f32.gmra.mxu1 %v2748_v31  ;;  %539 = vmatmul.f32.gmra.mxu2 %v2750_v32 }
  0xdd   : > { %1752 = vmatpush.msra.mxu0 %v1751_v33  ;;  %1430 = vmatpush.msra.mxu2 %v1425_v50  ;;  %v2789_v33 = vld [vmem:[#allocation2 + $0x61] sm:$0xff]  ;;  %v1219_v50 = vld [vmem:[#allocation5 + $0x3c8] sm:$0xff] }
  0xde   : > { %563 = vmatmul.f32.gmra.mxu3 %v2753_v34  ;;  %1228 = vmatpush.msra.mxu1 %v1223_v53 }
  0xdf   : > { %1753 = vmatpush.msra.mxu0 %v1750_v46  ;;  %1592 = vmatpush.msra.mxu3 %v1587_v52 }
  0xe0   : > { %1431 = vmatpush.msra.mxu2 %v1424_v4  ;;  %1229 = vmatpush.msra.mxu1 %v1222_v6  ;;  %v1218_v6 = vld [vmem:[#allocation5 + $0x3c0] sm:$0xff] }
  0xe1   : > { %1754 = vmatpush.msra.mxu0 %v1749_v63  ;;  %1593 = vmatpush.msra.mxu3 %v1586_v5  ;;  %v2834_v5 = vld [vmem:[#allocation2 + $0x89] sm:$0xff] }
  0xe2   : > { %491 = vmatmul.f32.gmra.mxu0 %v2758_v41  ;;  %1432 = vmatpush.msra.mxu2 %v1423_v20  ;;  %3398 = vst [vmem:[#allocation11_spill] sm:$0xff] %v2834_v5 }
  0xe3   : > { %1755 = vmatpush.msra.mxu0 %v1748_v16  ;;  %1594 = vmatpush.msra.mxu3 %v1585_v21 }
  0xe4   : > { %518 = vmatmul.f32.gmra.mxu1 %v2760_v42  ;;  %542 = vmatmul.f32.gmra.mxu2 %v2762_v44 }
  0xe5   : > { %1230 = vmatpush.msra.mxu1 %v1221_v25  ;;  %1756 = vmatpush.msra.mxu0 %v1747_v26  ;;  %v1581_v25 = vld [vmem:[#allocation5 + $0x2b8] sm:$0xff] }
  0xe6   : > { %566 = vmatmul.f32.gmra.mxu3 %v2765_v45  ;;  %1433 = vmatpush.msra.mxu2 %v1422_v28 }
  0xe7   : > { %1595 = vmatpush.msra.mxu3 %v1584_v30  ;;  %1757 = vmatpush.msra.mxu0 %v1746_v36  ;;  %v2862_v30 = vld [vmem:[#allocation2 + $0xa1] sm:$0xff] }
  0xe8   : > { %1434 = vmatpush.msra.mxu2 %v1421_v38 }
  0xea   : > { %494 = vmatmul.f32.gmra.mxu0 %v2770_v47 }
  0xec   : > { %586 = vmatmul.f32.vlgmr.msrb.gmra.mxu1 %v384_v48  ;;  %716 = vmatmul.f32.vlgmr.msrb.gmra.mxu2 %v2734_v9 }
  0xee   : > { %918 = vmatmul.f32.vlgmr.msrb.gmra.mxu3 %v845_v49  ;;  %v2806_v49 = vld [vmem:[#allocation2 + $0x79] sm:$0xff] }
  0xf2   : > { %1080 = vmatmul.f32.vlgmr.msrb.gmra.mxu0 %v849_v54 }
  0xf4   : > { %589 = vmatmul.f32.gmra.mxu1 %v385_v59  ;;  %719 = vmatmul.f32.gmra.mxu2 %v2746_v29 }
  0xf6   : > { %921 = vmatmul.f32.gmra.mxu3 %v846_v61  ;;  %v2820_v61 = vld [vmem:[#allocation2 + $0x81] sm:$0xff] }
  0xfa   : > { %1083 = vmatmul.f32.gmra.mxu0 %v850_v0 }
  0xfc   : > { %592 = vmatmul.f32.gmra.mxu1 %v386_v1  ;;  %722 = vmatmul.f32.gmra.mxu2 %v2758_v41  ;;  %v1582_v1 = vld [vmem:[#allocation5 + $0x2c0] sm:$0xff] }
  0xfe   : > { %924 = vmatmul.f32.gmra.mxu3 %v847_v2 }
 0x102   : > { %1086 = vmatmul.f32.gmra.mxu0 %v851_v10 }
 0x104   : > { %595 = vmatmul.f32.gmra.mxu1 %v387_v12  ;;  %725 = vmatmul.f32.gmra.mxu2 %v2770_v47 }
 0x106   : > { %927 = vmatmul.f32.gmra.mxu3 %v848_v13 }
 0x10a   : > { %1089 = vmatmul.f32.gmra.mxu0 %v852_v17 }
 0x10c   : > { %598 = vmatmul.f32.gmra.mxu1 %v2686_v3  ;;  %728 = vmatmul.f32.gmra.mxu2 %v2677_v57  ;;  %v2784_v3 = vld [vmem:[#allocation2 + $0x59] sm:$0xff] }
 0x10e   : > { %930 = vmatmul.f32.gmra.mxu3 %v849_v54 }
 0x112   : > { %1092 = vmatmul.f32.gmra.mxu0 %v2779_v22 }
 0x114   : > { %601 = vmatmul.f32.gmra.mxu1 %v2698_v19  ;;  %731 = vmatmul.f32.gmra.mxu2 %v2688_v7  ;;  %v1220_v19 = vld [vmem:[#allocation5 + $0x3d0] sm:$0xff] }
 0x115   : > { %1231 = vmatpush.msra.mxu1 %v1220_v19  ;;  %v1217_v19 = vld [vmem:[#allocation5 + $0x3b8] sm:$0xff] }
 0x116   : > { %933 = vmatmul.f32.gmra.mxu3 %v850_v0 }
 0x117   : > { %1232 = vmatpush.msra.mxu1 %v1219_v50 }
 0x119   : > { %1233 = vmatpush.msra.mxu1 %v1218_v6  ;;  %v1580_v6 = vld [vmem:[#allocation5 + $0x2b0] sm:$0xff] }
 0x11a   : > { %1095 = vmatmul.f32.gmra.mxu0 %v2784_v3 }
 0x11b   : > { %1234 = vmatpush.msra.mxu1 %v1217_v19  ;;  %v1216_v19 = vld [vmem:[#allocation5 + $0x3b0] sm:$0xff] }
 0x11c   : > { %604 = vmatmul.f32.gmra.mxu1 %v2710_v35  ;;  %734 = vmatmul.f32.gmra.mxu2 %v2700_v23  ;;  %v2794_v35 = vld [vmem:[#allocation2 + $0x69] sm:$0xff] }
 0x11d   : > { %1235 = vmatpush.msra.mxu1 %v1216_v19 }
 0x11e   : > { %936 = vmatmul.f32.gmra.mxu3 %v851_v10 }
 0x122   : > { %1098 = vmatmul.f32.gmra.mxu0 %v2789_v33 }
 0x124   : > { %607 = vmatmul.f32.gmra.mxu1 %v2722_v51  ;;  %737 = vmatmul.f32.gmra.mxu2 %v2712_v39  ;;  %v1583_v51 = vld [vmem:[#allocation5 + $0x2c8] sm:$0xff] }
 0x125   : > { %1596 = vmatpush.msra.mxu3 %v1583_v51 }
 0x126   : > { %939 = vmatmul.f32.gmra.mxu3 %v852_v17  ;;  %v2848_v17 = vld [vmem:[#allocation2 + $0x91] sm:$0xff] }
 0x127   : > { %1597 = vmatpush.msra.mxu3 %v1582_v1  ;;  %3400 = vst [vmem:[#allocation13_spill] sm:$0xff] %v2848_v17 }
 0x129   : > { %v2796_v37 = vpop.f32.mrf.mxu1  ;;  %1598 = vmatpush.msra.mxu3 %v1581_v25  ;;  %v2890_v25 = vld [vmem:[#allocation2 + $0xb1] sm:$0xff] }
 0x12a   : > { %1101 = vmatmul.f32.gmra.mxu0 %v2794_v35 }
 0x12b   : > { %1599 = vmatpush.msra.mxu3 %v1580_v6  ;;  %v2904_v6 = vld [vmem:[#allocation2 + $0xb9] sm:$0xff] }
 0x12c   : > { %610 = vmatmul.f32.gmra.mxu1 %v2734_v9  ;;  %740 = vmatmul.f32.gmra.mxu2 %v2724_v55  ;;  %v1745_v9 = vld [vmem:[#allocation5 + $0x448] sm:$0xff] }
 0x12d   : > { %1758 = vmatpush.msra.mxu0 %v1745_v9  ;;  %v2876_v9 = vld [vmem:[#allocation2 + $0xa9] sm:$0xff] }
 0x12e   : > { %942 = vmatmul.f32.gmra.mxu3 %v2779_v22 }
 0x12f   : > { %v2802_v46 = vpop.f32.mrf.mxu2  ;;  %v2804_v48 = vpop.f32.mrf.mxu0 }
 0x131   : > { %v2808_v52 = vpop.f32.mrf.mxu1  ;;  %v2810_v53 = vpop.f32.mrf.mxu3 }
 0x132   : > { %3396 = vst [vmem:[#allocation9_spill] sm:$0xff] %v2810_v53  ;;  %1104 = vmatmul.f32.gmra.mxu0 %v2806_v49 }
 0x134   : > { %613 = vmatmul.f32.gmra.mxu1 %v2746_v29  ;;  %743 = vmatmul.f32.gmra.mxu2 %v2736_v14  ;;  %v1420_v29 = vld [vmem:[#allocation5 + $0x140] sm:$0xff] }
 0x135   : > { %1435 = vmatpush.msra.mxu2 %v1420_v29 }
 0x136   : > { %945 = vmatmul.f32.gmra.mxu3 %v2784_v3 }
 0x137   : > { %v2816_v54 = vpop.f32.mrf.mxu2  ;;  %v2818_v59 = vpop.f32.mrf.mxu0 }
 0x139   : > { %v2822_v63 = vpop.f32.mrf.mxu1  ;;  %v2824_v0 = vpop.f32.mrf.mxu3 }
 0x13a   : > { %3397 = vst [vmem:[#allocation10_spill] sm:$0xff] %v2824_v0  ;;  %1107 = vmatmul.f32.gmra.mxu0 %v2820_v61 }
 0x13c   : > { %616 = vmatmul.f32.gmra.mxu1 %v2758_v41  ;;  %746 = vmatmul.f32.gmra.mxu2 %v2748_v31  ;;  %v1744_v41 = vld [vmem:[#allocation5 + $0x440] sm:$0xff] }
 0x13d   : > { %1759 = vmatpush.msra.mxu0 %v1744_v41 }
 0x13e   : > { %948 = vmatmul.f32.gmra.mxu3 %v2789_v33 }
 0x13f   : > { %v2830_v2 = vpop.f32.mrf.mxu2  ;;  %v2832_v4 = vpop.f32.mrf.mxu0 }
 0x141   : > { %v2836_v10 = vpop.f32.mrf.mxu1  ;;  %v2838_v12 = vpop.f32.mrf.mxu3 }
 0x142   : > { %3399 = vst [vmem:[#allocation12_spill] sm:$0xff] %v2838_v12  ;;  %1110 = vmatmul.f32.gmra.mxu0 %v2834_v5  ;;  %v1579_v12 = vld [vmem:[#allocation5 + $0x2a8] sm:$0xff] }
 0x143   : > { %1600 = vmatpush.msra.mxu3 %v1579_v12 }
 0x144   : > { %619 = vmatmul.f32.gmra.mxu1 %v2770_v47  ;;  %749 = vmatmul.f32.gmra.mxu2 %v2760_v42  ;;  %v1419_v47 = vld [vmem:[#allocation5 + $0x138] sm:$0xff] }
 0x145   : > { %1436 = vmatpush.msra.mxu2 %v1419_v47 }
 0x146   : > { %951 = vmatmul.f32.gmra.mxu3 %v2794_v35 }
 0x147   : > { %v2844_v13 = vpop.f32.mrf.mxu2  ;;  %v2846_v16 = vpop.f32.mrf.mxu0 }
 0x149   : > { %v2850_v20 = vpop.f32.mrf.mxu1  ;;  %v2852_v21 = vpop.f32.mrf.mxu3 }
 0x14a   : > { %3401 = vst [vmem:[#allocation14_spill] sm:$0xff] %v2852_v21  ;;  %1113 = vmatmul.f32.gmra.mxu0 %v2848_v17 }
 0x14c   : > { %622 = vmatmul.f32.gmra.mxu1 %v2677_v57  ;;  %752 = vmatmul.f32.gmra.mxu2 %v2679_v58  ;;  %v1743_v57 = vld [vmem:[#allocation5 + $0x438] sm:$0xff] }
 0x14d   : > { %1760 = vmatpush.msra.mxu0 %v1743_v57 }
 0x14e   : > { %954 = vmatmul.f32.gmra.mxu3 %v2806_v49 }
 0x14f   : > { %v2858_v26 = vpop.f32.mrf.mxu2  ;;  %v2860_v28 = vpop.f32.mrf.mxu0 }
 0x151   : > { %v2864_v36 = vpop.f32.mrf.mxu1  ;;  %v2866_v38 = vpop.f32.mrf.mxu3 }
 0x152   : > { %3402 = vst [vmem:[#allocation15_spill] sm:$0xff] %v2866_v38  ;;  %1116 = vmatmul.f32.gmra.mxu0 %v2862_v30 }
 0x154   : > { %625 = vmatmul.f32.gmra.mxu1 %v2688_v7  ;;  %755 = vmatmul.f32.gmra.mxu2 %v2690_v8  ;;  %v1418_v7 = vld [vmem:[#allocation5 + $0x130] sm:$0xff] }
 0x155   : > { %1437 = vmatpush.msra.mxu2 %v1418_v7 }
 0x156   : > { %957 = vmatmul.f32.gmra.mxu3 %v2820_v61 }
 0x157   : > { %v2872_v51 = vpop.f32.mrf.mxu2  ;;  %v2874_v50 = vpop.f32.mrf.mxu0 }
 0x159   : > { %v2878_v29 = vpop.f32.mrf.mxu1  ;;  %v2880_v1 = vpop.f32.mrf.mxu3 }
 0x15a   : > { %3403 = vst [vmem:[#allocation16_spill] sm:$0xff] %v2880_v1  ;;  %1119 = vmatmul.f32.gmra.mxu0 %v2876_v9 }
 0x15c   : > { %628 = vmatmul.f32.gmra.mxu1 %v2700_v23  ;;  %758 = vmatmul.f32.gmra.mxu2 %v2702_v24  ;;  %v1742_v23 = vld [vmem:[#allocation5 + $0x430] sm:$0xff] }
 0x15d   : > { %1761 = vmatpush.msra.mxu0 %v1742_v23 }
 0x15e   : > { %960 = vmatmul.f32.gmra.mxu3 %v2834_v5 }
 0x15f   : > { %v2886_v41 = vpop.f32.mrf.mxu2  ;;  %v2888_v47 = vpop.f32.mrf.mxu0 }
 0x160   : > { %3404 = vst [vmem:[#allocation17_spill] sm:$0xff] %v2886_v41 }
 0x161   : > { %v2892_v57 = vpop.f32.mrf.mxu1  ;;  %v2894_v1 = vpop.f32.mrf.mxu3 }
 0x162   : > { %3405 = vst [vmem:[#allocation18_spill] sm:$0xff] %v2894_v1  ;;  %1122 = vmatmul.f32.gmra.mxu0 %v2890_v25 }
 0x164   : > { %631 = vmatmul.f32.gmra.mxu1 %v2712_v39  ;;  %761 = vmatmul.f32.gmra.mxu2 %v2714_v40  ;;  %v1417_v39 = vld [vmem:[#allocation5 + $0x128] sm:$0xff] }
 0x165   : > { %1438 = vmatpush.msra.mxu2 %v1417_v39  ;;  %v2922_v39 = vld [vmem:[#allocation2 + $0xd1] sm:$0xff] }
 0x166   : > { %963 = vmatmul.f32.gmra.mxu3 %v2848_v17 }
 0x167   : > { %v2900_v7 = vpop.f32.mrf.mxu2  ;;  %v2902_v38 = vpop.f32.mrf.mxu0 }
 0x168   : > { %3406 = vst [vmem:[#allocation19_spill] sm:$0xff] %v2900_v7  ;;  %v2913_v7 = vld [vmem:[#allocation2 + $0xc9] sm:$0xff] }
 0x169   : > { %v2906_v21 = vpop.f32.mrf.mxu3  ;;  %v587_v1 = vpop.f32.mrf.mxu1 }
 0x16a   : > { %3407 = vst [vmem:[#allocation20_spill] sm:$0xff] %v2906_v21  ;;  %1125 = vmatmul.f32.gmra.mxu0 %v2904_v6  ;;  %v588_v19 = vadd.f32 %v587_v1, %v2804_v48  ;;  %v1215_v21 = vld [vmem:[#allocation5 + $0x3a8] sm:$0xff] }
 0x16b   : > { %1236 = vmatpush.msra.mxu1 %v1215_v21  ;;  %v1741_v1 = vld [vmem:[#allocation5 + $0x428] sm:$0xff] }
 0x16c   : > { %634 = vmatmul.f32.gmra.mxu1 %v2724_v55  ;;  %764 = vmatmul.f32.gmra.mxu2 %v2726_v56 }
 0x16d   : > { %1762 = vmatpush.msra.mxu0 %v1741_v1  ;;  %v2931_v1 = vld [vmem:[#allocation2 + $0xd9] sm:$0xff] }
 0x16e   : > { %966 = vmatmul.f32.gmra.mxu3 %v2862_v30 }
 0x16f   : > { %v717_v0 = vpop.f32.mrf.mxu2  ;;  %v1081_v53 = vpop.f32.mrf.mxu0 }
 0x170   : > { %v813_v23 = vadd.f32 %v717_v0, %v588_v19 }
 0x171   : > { %v590_v17 = vpop.f32.mrf.mxu1  ;;  %v919_v41 = vpop.f32.mrf.mxu3 }
 0x172   : > { %v1015_v55 = vadd.f32 %v919_v41, %v813_v23  ;;  %1128 = vmatmul.f32.gmra.mxu0 %v2913_v7  ;;  %v591_v48 = vadd.f32 %v590_v17, %v2818_v59  ;;  %v1578_v17 = vld [vmem:[#allocation5 + $0x2a0] sm:$0xff] }
 0x173   : > { %1601 = vmatpush.msra.mxu3 %v1578_v17  ;;  %v2940_v17 = vld [vmem:[#allocation2 + $0xe1] sm:$0xff] }
 0x174   : > { %v2916_v5 = vadd.f32 %v1081_v53, %v1015_v55  ;;  %637 = vmatmul.f32.gmra.mxu1 %v2736_v14  ;;  %767 = vmatmul.f32.gmra.mxu2 %v2738_v15  ;;  %v1416_v14 = vld [vmem:[#allocation5 + $0x120] sm:$0xff] }
 0x175   : > { %1439 = vmatpush.msra.mxu2 %v1416_v14 }
 0x176   : > { %969 = vmatmul.f32.gmra.mxu3 %v2876_v9 }
 0x177   : > { %v720_v12 = vpop.f32.mrf.mxu2  ;;  %v1084_v0 = vpop.f32.mrf.mxu0 }
 0x178   : > { %v814_v21 = vadd.f32 %v720_v12, %v591_v48 }
 0x179   : > { %v593_v41 = vpop.f32.mrf.mxu1  ;;  %v922_v19 = vpop.f32.mrf.mxu3 }
 0x17a   : > { %v1016_v23 = vadd.f32 %v922_v19, %v814_v21  ;;  %1131 = vmatmul.f32.gmra.mxu0 %v2922_v39  ;;  %v594_v59 = vadd.f32 %v593_v41, %v2832_v4  ;;  %v1214_v21 = vld [vmem:[#allocation5 + $0x3a0] sm:$0xff] }
 0x17b   : > { %1237 = vmatpush.msra.mxu1 %v1214_v21  ;;  %v1740_v41 = vld [vmem:[#allocation5 + $0x420] sm:$0xff] }
 0x17c   : > { %v2925_v53 = vadd.f32 %v1084_v0, %v1016_v23  ;;  %640 = vmatmul.f32.gmra.mxu1 %v2748_v31  ;;  %770 = vmatmul.f32.gmra.mxu2 %v2750_v32 }
 0x17d   : > { %1763 = vmatpush.msra.mxu0 %v1740_v41  ;;  %v2949_v41 = vld [vmem:[#allocation2 + $0xf1] sm:$0xff] }
 0x17e   : > { %972 = vmatmul.f32.gmra.mxu3 %v2890_v25 }
 0x17f   : > { %v723_v55 = vpop.f32.mrf.mxu2  ;;  %v1087_v48 = vpop.f32.mrf.mxu0 }
 0x180   : > { %v815_v12 = vadd.f32 %v723_v55, %v594_v59 }
 0x181   : > { %v596_v0 = vpop.f32.mrf.mxu1  ;;  %v925_v19 = vpop.f32.mrf.mxu3 }
 0x182   : > { %v1017_v31 = vadd.f32 %v925_v19, %v815_v12  ;;  %1134 = vmatmul.f32.gmra.mxu0 %v2931_v1  ;;  %v597_v4 = vadd.f32 %v596_v0, %v2846_v16  ;;  %v1577_v0 = vld [vmem:[#allocation5 + $0x298] sm:$0xff] }
 0x183   : > { %1602 = vmatpush.msra.mxu3 %v1577_v0 }
 0x184   : > { %v2934_v23 = vadd.f32 %v1087_v48, %v1017_v31  ;;  %643 = vmatmul.f32.gmra.mxu1 %v2760_v42  ;;  %773 = vmatmul.f32.gmra.mxu2 %v2762_v44  ;;  %v1415_v42 = vld [vmem:[#allocation5 + $0x118] sm:$0xff] }
 0x185   : > { %1440 = vmatpush.msra.mxu2 %v1415_v42 }
 0x186   : > { %975 = vmatmul.f32.gmra.mxu3 %v2904_v6 }
 0x187   : > { %v726_v14 = vpop.f32.mrf.mxu2  ;;  %v1090_v59 = vpop.f32.mrf.mxu0 }
 0x188   : > { %v816_v55 = vadd.f32 %v726_v14, %v597_v4 }
 0x189   : > { %v599_v12 = vpop.f32.mrf.mxu1  ;;  %v928_v21 = vpop.f32.mrf.mxu3 }
 0x18a   : > { %v1018_v19 = vadd.f32 %v928_v21, %v816_v55  ;;  %1137 = vmatmul.f32.gmra.mxu0 %v2940_v17  ;;  %v600_v16 = vadd.f32 %v599_v12, %v2860_v28  ;;  %v1213_v55 = vld [vmem:[#allocation5 + $0x398] sm:$0xff] }
 0x18b   : > { %1238 = vmatpush.msra.mxu1 %v1213_v55  ;;  %v1739_v12 = vld [vmem:[#allocation5 + $0x418] sm:$0xff] }
 0x18c   : > { %v2943_v48 = vadd.f32 %v1090_v59, %v1018_v19  ;;  %646 = vmatmul.f32.gmra.mxu1 %v2679_v58  ;;  %776 = vmatmul.f32.gmra.mxu2 %v2681_v60 }
 0x18d   : > { %1764 = vmatpush.msra.mxu0 %v1739_v12  ;;  %v1212_v12 = vld [vmem:[#allocation5 + $0x390] sm:$0xff] }
 0x18e   : > { %978 = vmatmul.f32.gmra.mxu3 %v2913_v7  ;;  %1239 = vmatpush.msra.mxu1 %v1212_v12 }
 0x18f   : > { %v729_v31 = vpop.f32.mrf.mxu2  ;;  %v1093_v4 = vpop.f32.mrf.mxu0 }
 0x190   : > { %v817_v14 = vadd.f32 %v729_v31, %v600_v16  ;;  %v2958_v16 = vld [vmem:[#allocation2 + $0xf9] sm:$0xff] }
 0x191   : > { %v602_v59 = vpop.f32.mrf.mxu1  ;;  %v931_v21 = vpop.f32.mrf.mxu3 }
 0x192   : > { %v1019_v58 = vadd.f32 %v931_v21, %v817_v14  ;;  %1140 = vmatmul.f32.gmra.mxu0 %v2949_v41  ;;  %v603_v28 = vadd.f32 %v602_v59, %v2874_v50  ;;  %v1576_v50 = vld [vmem:[#allocation5 + $0x290] sm:$0xff] }
 0x193   : > { %1603 = vmatpush.msra.mxu3 %v1576_v50 }
 0x194   : > { %v2952_v60 = vadd.f32 %v1093_v4, %v1019_v58  ;;  %649 = vmatmul.f32.gmra.mxu1 %v2690_v8  ;;  %779 = vmatmul.f32.gmra.mxu2 %v2693_v11  ;;  %v1414_v8 = vld [vmem:[#allocation5 + $0x110] sm:$0xff] }
 0x195   : > { %1441 = vmatpush.msra.mxu2 %v1414_v8  ;;  %v2967_v58 = vld [vmem:[#allocation2 + $0x101] sm:$0xff] }
 0x196   : > { %981 = vmatmul.f32.gmra.mxu3 %v2922_v39 }
 0x197   : > { %v732_v19 = vpop.f32.mrf.mxu2  ;;  %v1096_v42 = vpop.f32.mrf.mxu0 }
 0x198   : > { %v818_v0 = vadd.f32 %v732_v19, %v603_v28 }
 0x199   : > { %v605_v31 = vpop.f32.mrf.mxu1  ;;  %v934_v14 = vpop.f32.mrf.mxu3 }
 0x19a   : > { %v1020_v55 = vadd.f32 %v934_v14, %v818_v0  ;;  %1143 = vmatmul.f32.gmra.mxu0 %v2958_v16  ;;  %v606_v11 = vadd.f32 %v605_v31, %v2888_v47  ;;  %v1738_v0 = vld [vmem:[#allocation5 + $0x410] sm:$0xff] }
 0x19b   : > { %1765 = vmatpush.msra.mxu0 %v1738_v0 }
 0x19c   : > { %v2961_v4 = vadd.f32 %v1096_v42, %v1020_v55  ;;  %652 = vmatmul.f32.gmra.mxu1 %v2702_v24  ;;  %782 = vmatmul.f32.gmra.mxu2 %v2705_v27  ;;  %v2976_v55 = vld [vmem:[#allocation2 + $0x109] sm:$0xff] }
 0x19e   : > { %984 = vmatmul.f32.gmra.mxu3 %v2931_v1 }
 0x19f   : > { %v735_v59 = vpop.f32.mrf.mxu2  ;;  %v1099_v21 = vpop.f32.mrf.mxu0 }
 0x1a0   : > { %v819_v28 = vadd.f32 %v735_v59, %v606_v11 }
 0x1a1   : > { %v608_v19 = vpop.f32.mrf.mxu1  ;;  %v937_v42 = vpop.f32.mrf.mxu3 }
 0x1a2   : > { %v1021_v24 = vadd.f32 %v937_v42, %v819_v28  ;;  %1146 = vmatmul.f32.gmra.mxu0 %v2967_v58  ;;  %v609_v47 = vadd.f32 %v608_v19, %v2902_v38  ;;  %v1575_v38 = vld [vmem:[#allocation5 + $0x288] sm:$0xff] }
 0x1a3   : > { %v2985_v19 = vld [vmem:[#allocation2 + $0x119] sm:$0xff]  ;;  %1604 = vmatpush.msra.mxu3 %v1575_v38 }
 0x1a4   : > { %v2970_v27 = vadd.f32 %v1099_v21, %v1021_v24  ;;  %655 = vmatmul.f32.gmra.mxu1 %v2714_v40  ;;  %785 = vmatmul.f32.gmra.mxu2 %v2717_v43  ;;  %v1413_v40 = vld [vmem:[#allocation5 + $0x108] sm:$0xff] }
 0x1a5   : > { %1442 = vmatpush.msra.mxu2 %v1413_v40  ;;  %v1211_v24 = vld [vmem:[#allocation5 + $0x388] sm:$0xff] }
 0x1a6   : > { %987 = vmatmul.f32.gmra.mxu3 %v2940_v17  ;;  %1240 = vmatpush.msra.mxu1 %v1211_v24 }
 0x1a7   : > { %v738_v31 = vpop.f32.mrf.mxu2  ;;  %v1102_v14 = vpop.f32.mrf.mxu0 }
 0x1a8   : > { %v820_v8 = vadd.f32 %v738_v31, %v609_v47  ;;  %v1737_v31 = vld [vmem:[#allocation5 + $0x408] sm:$0xff] }
 0x1a9   : > { %v611_v11 = vpop.f32.mrf.mxu1  ;;  %v940_v50 = vpop.f32.mrf.mxu3  ;;  %1766 = vmatpush.msra.mxu0 %v1737_v31 }
 0x1aa   : > { %v1022_v59 = vadd.f32 %v940_v50, %v820_v8  ;;  %1149 = vmatmul.f32.gmra.mxu0 %v2976_v55  ;;  %v612_v43 = vadd.f32 %v611_v11, %v2796_v37  ;;  %v2994_v11 = vld [vmem:[#allocation2 + $0x121] sm:$0xff] }
 0x1ac   : > { %v2979_v21 = vadd.f32 %v1102_v14, %v1022_v59  ;;  %658 = vmatmul.f32.gmra.mxu1 %v2726_v56  ;;  %788 = vmatmul.f32.gmra.mxu2 %v2729_v62 }
 0x1ae   : > { %990 = vmatmul.f32.gmra.mxu3 %v2949_v41 }
 0x1af   : > { %v741_v28 = vpop.f32.mrf.mxu2  ;;  %v1105_v12 = vpop.f32.mrf.mxu0 }
 0x1b0   : > { %v821_v42 = vadd.f32 %v741_v28, %v612_v43 }
 0x1b1   : > { %v614_v47 = vpop.f32.mrf.mxu1  ;;  %v943_v0 = vpop.f32.mrf.mxu3 }
 0x1b2   : > { %v1023_v56 = vadd.f32 %v943_v0, %v821_v42  ;;  %1152 = vmatmul.f32.gmra.mxu0 %v2985_v19  ;;  %v615_v37 = vadd.f32 %v614_v47, %v2808_v52  ;;  %v1574_v52 = vld [vmem:[#allocation5 + $0x280] sm:$0xff] }
 0x1b3   : > { %v3003_v42 = vld [vmem:[#allocation2 + $0x129] sm:$0xff]  ;;  %1605 = vmatpush.msra.mxu3 %v1574_v52 }
 0x1b4   : > { %v2988_v62 = vadd.f32 %v1105_v12, %v1023_v56  ;;  %661 = vmatmul.f32.gmra.mxu1 %v2738_v15  ;;  %791 = vmatmul.f32.gmra.mxu2 %v2741_v18  ;;  %v1412_v15 = vld [vmem:[#allocation5 + $0x100] sm:$0xff] }
 0x1b5   : > { %1443 = vmatpush.msra.mxu2 %v1412_v15  ;;  %v1210_v47 = vld [vmem:[#allocation5 + $0x380] sm:$0xff] }
 0x1b6   : > { %993 = vmatmul.f32.gmra.mxu3 %v2958_v16  ;;  %1241 = vmatpush.msra.mxu1 %v1210_v47 }
 0x1b7   : > { %v744_v14 = vpop.f32.mrf.mxu2  ;;  %v1108_v8 = vpop.f32.mrf.mxu0 }
 0x1b8   : > { %v822_v50 = vadd.f32 %v744_v14, %v615_v37  ;;  %v1736_v37 = vld [vmem:[#allocation5 + $0x400] sm:$0xff] }
 0x1b9   : > { %v617_v59 = vpop.f32.mrf.mxu1  ;;  %v946_v40 = vpop.f32.mrf.mxu3  ;;  %1767 = vmatpush.msra.mxu0 %v1736_v37 }
 0x1ba   : > { %v1024_v43 = vadd.f32 %v946_v40, %v822_v50  ;;  %1155 = vmatmul.f32.gmra.mxu0 %v2994_v11  ;;  %v618_v18 = vadd.f32 %v617_v59, %v2822_v63 }
 0x1bc   : > { %v2997_v38 = vadd.f32 %v1108_v8, %v1024_v43  ;;  %664 = vmatmul.f32.gmra.mxu1 %v2750_v32  ;;  %794 = vmatmul.f32.gmra.mxu2 %v2753_v34  ;;  %v3012_v8 = vld [vmem:[#allocation2 + $0x131] sm:$0xff]  ;;  %v420_v43 = vld [vmem:[#allocation2 + $0x168] sm:$0xff] }
 0x1be   : > { %996 = vmatmul.f32.gmra.mxu3 %v2967_v58 }
 0x1bf   : > { %v747_v28 = vpop.f32.mrf.mxu2  ;;  %v1111_v12 = vpop.f32.mrf.mxu0 }
 0x1c0   : > { %v823_v24 = vadd.f32 %v747_v28, %v618_v18  ;;  %v3019_v28 = vld [vmem:[#allocation2 + $0x141] sm:$0xff] }
 0x1c1   : > { %v620_v0 = vpop.f32.mrf.mxu1  ;;  %v949_v56 = vpop.f32.mrf.mxu3 }
 0x1c2   : > { %v1025_v32 = vadd.f32 %v949_v56, %v823_v24  ;;  %1158 = vmatmul.f32.gmra.mxu0 %v3003_v42  ;;  %v621_v63 = vadd.f32 %v620_v0, %v2836_v10  ;;  %v421_v0 = vld [vmem:[#allocation2 + $0x170] sm:$0xff] }
 0x1c4   : > { %v3006_v34 = vadd.f32 %v1111_v12, %v1025_v32  ;;  %667 = vmatmul.f32.gmra.mxu1 %v2762_v44  ;;  %797 = vmatmul.f32.gmra.mxu2 %v2765_v45  ;;  %v2346_v45 = vld [vmem:[#allocation2 + $0x118] sm:$0xff] }
 0x1c6   : > { %999 = vmatmul.f32.gmra.mxu3 %v2976_v55 }
 0x1c7   : > { %v750_v31 = vpop.f32.mrf.mxu2  ;;  %v1114_v14 = vpop.f32.mrf.mxu0 }
 0x1c8   : > { %v824_v50 = vadd.f32 %v750_v31, %v621_v63  ;;  %v2347_v63 = vld [vmem:[#allocation2 + $0x120] sm:$0xff] }
 0x1c9   : > { %v623_v59 = vpop.f32.mrf.mxu1  ;;  %v952_v40 = vpop.f32.mrf.mxu3 }
 0x1ca   : > { %v1026_v15 = vadd.f32 %v952_v40, %v824_v50  ;;  %1161 = vmatmul.f32.gmra.mxu0 %v3012_v8  ;;  %v624_v10 = vadd.f32 %v623_v59, %v2850_v20 }
 0x1cc   : > { %v3015_v44 = vadd.f32 %v1114_v14, %v1026_v15  ;;  %670 = vmatmul.f32.gmra.mxu1 %v2346_v45  ;;  %800 = vmatmul.f32.gmra.mxu2 %v420_v43  ;;  %v3026_v14 = vld [vmem:[#allocation2 + $0x149] sm:$0xff]  ;;  %v422_v43 = vld [vmem:[#allocation2 + $0x178] sm:$0xff] }
 0x1ce   : > { %1002 = vmatmul.f32.gmra.mxu3 %v2985_v19 }
 0x1cf   : > { %v753_v18 = vpop.f32.mrf.mxu2  ;;  %v1117_v52 = vpop.f32.mrf.mxu0 }
 0x1d0   : > { %v825_v12 = vadd.f32 %v753_v18, %v624_v10  ;;  %v2348_v10 = vld [vmem:[#allocation2 + $0x128] sm:$0xff] }
 0x1d1   : > { %v626_v24 = vpop.f32.mrf.mxu1  ;;  %v955_v47 = vpop.f32.mrf.mxu3 }
 0x1d2   : > { %v1027_v56 = vadd.f32 %v955_v47, %v825_v12  ;;  %1164 = vmatmul.f32.gmra.mxu0 %v3019_v28  ;;  %v627_v20 = vadd.f32 %v626_v24, %v2864_v36  ;;  %v3033_v12 = vld [vmem:[#allocation2 + $0x151] sm:$0xff] }
 0x1d4   : > { %v3022_v32 = vadd.f32 %v1117_v52, %v1027_v56  ;;  %673 = vmatmul.f32.gmra.mxu1 %v2347_v63  ;;  %803 = vmatmul.f32.gmra.mxu2 %v421_v0  ;;  %v423_v56 = vld [vmem:[#allocation2 + $0x180] sm:$0xff] }
 0x1d6   : > { %1005 = vmatmul.f32.gmra.mxu3 %v2994_v11 }
 0x1d7   : > { %v756_v37 = vpop.f32.mrf.mxu2  ;;  %v1120_v31 = vpop.f32.mrf.mxu0 }
 0x1d8   : > { %v826_v50 = vadd.f32 %v756_v37, %v627_v20  ;;  %v2349_v37 = vld [vmem:[#allocation2 + $0x130] sm:$0xff] }
 0x1d9   : > { %v629_v59 = vpop.f32.mrf.mxu1  ;;  %v958_v40 = vpop.f32.mrf.mxu3 }
 0x1da   : > { %v1028_v15 = vadd.f32 %v958_v40, %v826_v50  ;;  %1167 = vmatmul.f32.gmra.mxu0 %v3026_v14  ;;  %v630_v36 = vadd.f32 %v629_v59, %v2878_v29  ;;  %v3040_v59 = vld [vmem:[#allocation2 + $0x159] sm:$0xff] }
 0x1dc   : > { %v3029_v45 = vadd.f32 %v1120_v31, %v1028_v15  ;;  %676 = vmatmul.f32.gmra.mxu1 %v2348_v10  ;;  %806 = vmatmul.f32.gmra.mxu2 %v422_v43  ;;  %v1371_v10 = vld [vmem:[#allocation2 + $0x2] sm:$0xff] }
 0x1de   : > { %1008 = vmatmul.f32.gmra.mxu3 %v3003_v42 }
 0x1df   : > { %v759_v18 = vpop.f32.mrf.mxu2  ;;  %v1123_v52 = vpop.f32.mrf.mxu0 }
 0x1e0   : > { %v827_v24 = vadd.f32 %v759_v18, %v630_v36  ;;  %v1375_v18 = vld [vmem:[#allocation2 + $0x2a] sm:$0xff] }
 0x1e1   : > { %v632_v47 = vpop.f32.mrf.mxu1  ;;  %v961_v0 = vpop.f32.mrf.mxu3 }
 0x1e2   : > { %v1029_v63 = vadd.f32 %v961_v0, %v827_v24  ;;  %1170 = vmatmul.f32.gmra.mxu0 %v3033_v12  ;;  %v633_v29 = vadd.f32 %v632_v47, %v2892_v57  ;;  %v3047_v0 = vld [vmem:[#allocation2 + $0x52] sm:$0xff] }
 0x1e4   : > { %v3036_v20 = vadd.f32 %v1123_v52, %v1029_v63  ;;  %679 = vmatmul.f32.gmra.mxu1 %v2349_v37  ;;  %809 = vmatmul.f32.gmra.mxu2 %v423_v56 }
 0x1e6   : > { %1011 = vmatmul.f32.gmra.mxu3 %v3012_v8 }
 0x1e7   : > { %v762_v31 = vpop.f32.mrf.mxu2  ;;  %v1126_v50 = vpop.f32.mrf.mxu0 }
 0x1e8   : > { %v828_v40 = vadd.f32 %v762_v31, %v633_v29  ;;  %v1372_v29 = vld [vmem:[#allocation2 + $0xa] sm:$0xff] }
 0x1e9   : > { %v635_v43 = vpop.f32.mrf.mxu1  ;;  %v964_v15 = vpop.f32.mrf.mxu3 }
 0x1ea   : > { %v1030_v36 = vadd.f32 %v964_v15, %v828_v40  ;;  %1173 = vmatmul.f32.gmra.mxu0 %v3040_v59  ;;  %v636_v57 = vadd.f32 %v635_v43, %v2802_v46  ;;  %v1376_v40 = vld [vmem:[#allocation2 + $0x32] sm:$0xff]  ;;  %v3054_v15 = vld [vmem:[#allocation2 + $0x5a] sm:$0xff] }
 0x1ec   : > { %v3043_v52 = vadd.f32 %v1126_v50, %v1030_v36  ;;  %1242 = vmatmul.f32.vlgmr.msra.gmra.mxu1 %v2779_v22  ;;  %1444 = vmatmul.f32.vlgmr.msra.gmra.mxu2 %v1371_v10 }
 0x1ee   : > { %1606 = vmatmul.f32.vlgmr.msra.gmra.mxu3 %v1375_v18 }
 0x1ef   : > { %v765_v24 = vpop.f32.mrf.mxu2  ;;  %v1129_v47 = vpop.f32.mrf.mxu0 }
 0x1f0   : > { %v829_v56 = vadd.f32 %v765_v24, %v636_v57  ;;  %v1373_v24 = vld [vmem:[#allocation2 + $0x12] sm:$0xff] }
 0x1f1   : > { %v638_v63 = vpop.f32.mrf.mxu1  ;;  %v967_v37 = vpop.f32.mrf.mxu3 }
 0x1f2   : > { %v1031_v31 = vadd.f32 %v967_v37, %v829_v56  ;;  %1768 = vmatmul.f32.vlgmr.msra.gmra.mxu0 %v3047_v0  ;;  %v639_v22 = vadd.f32 %v638_v63, %v2816_v54  ;;  %v1377_v37 = vld [vmem:[#allocation2 + $0x3a] sm:$0xff] }
 0x1f4   : > { %v3050_v50 = vadd.f32 %v1129_v47, %v1031_v31  ;;  %1245 = vmatmul.f32.gmra.mxu1 %v2784_v3  ;;  %1447 = vmatmul.f32.gmra.mxu2 %v1372_v29  ;;  %v3061_v29 = vld [vmem:[#allocation2 + $0x62] sm:$0xff] }
 0x1f6   : > { %3408 = vst [vmem:[#allocation21_spill] sm:$0xff] %v3050_v50  ;;  %1609 = vmatmul.f32.gmra.mxu3 %v1376_v40  ;;  %v1374_v50 = vld [vmem:[#allocation2 + $0x1a] sm:$0xff] }
 0x1f7   : > { %v768_v46 = vpop.f32.mrf.mxu2  ;;  %v1132_v43 = vpop.f32.mrf.mxu0 }
 0x1f8   : > { %v830_v10 = vadd.f32 %v768_v46, %v639_v22 }
 0x1f9   : > { %v641_v36 = vpop.f32.mrf.mxu1  ;;  %v970_v57 = vpop.f32.mrf.mxu3 }
 0x1fa   : > { %v1032_v56 = vadd.f32 %v970_v57, %v830_v10  ;;  %1771 = vmatmul.f32.gmra.mxu0 %v3054_v15  ;;  %v642_v3 = vadd.f32 %v641_v36, %v2830_v2  ;;  %v1378_v57 = vld [vmem:[#allocation2 + $0x42] sm:$0xff] }
 0x1fc   : > { %v3057_v47 = vadd.f32 %v1132_v43, %v1032_v56  ;;  %1248 = vmatmul.f32.gmra.mxu1 %v2789_v33  ;;  %1450 = vmatmul.f32.gmra.mxu2 %v1373_v24  ;;  %v3068_v24 = vld [vmem:[#allocation2 + $0x6a] sm:$0xff] }
 0x1fe   : > { %3409 = vst [vmem:[#allocation22_spill] sm:$0xff] %v3057_v47  ;;  %1612 = vmatmul.f32.gmra.mxu3 %v1377_v37 }
 0x1ff   : > { %v771_v54 = vpop.f32.mrf.mxu2  ;;  %v1135_v63 = vpop.f32.mrf.mxu0 }
 0x200   : > { %v831_v31 = vadd.f32 %v771_v54, %v642_v3 }
 0x201   : > { %v644_v22 = vpop.f32.mrf.mxu1  ;;  %v973_v46 = vpop.f32.mrf.mxu3 }
 0x202   : > { %v1033_v10 = vadd.f32 %v973_v46, %v831_v31  ;;  %1774 = vmatmul.f32.gmra.mxu0 %v3061_v29  ;;  %v645_v33 = vadd.f32 %v644_v22, %v2844_v13 }
 0x204   : > { %v3064_v43 = vadd.f32 %v1135_v63, %v1033_v10  ;;  %1251 = vmatmul.f32.gmra.mxu1 %v2794_v35  ;;  %1453 = vmatmul.f32.gmra.mxu2 %v1374_v50  ;;  %v3076_v63 = vld [vmem:[#allocation2 + $0x7a] sm:$0xff] }
 0x206   : > { %1615 = vmatmul.f32.gmra.mxu3 %v1378_v57 }
 0x207   : > { %v774_v2 = vpop.f32.mrf.mxu2  ;;  %v1138_v36 = vpop.f32.mrf.mxu0 }
 0x208   : > { %v832_v56 = vadd.f32 %v774_v2, %v645_v33 }
 0x209   : > { %v647_v3 = vpop.f32.mrf.mxu1  ;;  %v976_v54 = vpop.f32.mrf.mxu3 }
 0x20a   : > { %v1034_v47 = vadd.f32 %v976_v54, %v832_v56  ;;  %1777 = vmatmul.f32.gmra.mxu0 %v3068_v24  ;;  %v648_v35 = vadd.f32 %v647_v3, %v2858_v26 }
 0x20c   : > { %v3071_v31 = vadd.f32 %v1138_v36, %v1034_v47  ;;  %1254 = vmatmul.f32.gmra.mxu1 %v2806_v49  ;;  %1456 = vmatmul.f32.gmra.mxu2 %v1375_v18  ;;  %v3084_v47 = vld [vmem:[#allocation2 + $0x82] sm:$0xff] }
 0x20e   : > { %1618 = vmatmul.f32.gmra.mxu3 %v3047_v0 }
 0x20f   : > { %v777_v13 = vpop.f32.mrf.mxu2  ;;  %v1141_v50 = vpop.f32.mrf.mxu0 }
 0x210   : > { %v833_v22 = vadd.f32 %v777_v13, %v648_v35  ;;  %v3410_v13 = vld [vmem:[#allocation11_spill] sm:$0xff] }
 0x211   : > { %v650_v46 = vpop.f32.mrf.mxu1  ;;  %v979_v10 = vpop.f32.mrf.mxu3 }
 0x212   : > { %v1035_v33 = vadd.f32 %v979_v10, %v833_v22  ;;  %1780 = vmatmul.f32.gmra.mxu0 %v3076_v63  ;;  %v651_v49 = vadd.f32 %v650_v46, %v2872_v51  ;;  %v3092_v22 = vld [vmem:[#allocation2 + $0x8a] sm:$0xff] }
 0x214   : > { %v3079_v2 = vadd.f32 %v1141_v50, %v1035_v33  ;;  %1257 = vmatmul.f32.gmra.mxu1 %v2820_v61  ;;  %1459 = vmatmul.f32.gmra.mxu2 %v1376_v40  ;;  %v3411_v61 = vld [vmem:[#allocation17_spill] sm:$0xff] }
 0x216   : > { %1621 = vmatmul.f32.gmra.mxu3 %v3054_v15 }
 0x217   : > { %v780_v26 = vpop.f32.mrf.mxu2  ;;  %v1144_v18 = vpop.f32.mrf.mxu0 }
 0x218   : > { %v834_v36 = vadd.f32 %v780_v26, %v651_v49 }
 0x219   : > { %v653_v56 = vpop.f32.mrf.mxu1  ;;  %v982_v3 = vpop.f32.mrf.mxu3 }
 0x21a   : > { %v1036_v54 = vadd.f32 %v982_v3, %v834_v36  ;;  %1783 = vmatmul.f32.gmra.mxu0 %v3084_v47  ;;  %v654_v40 = vadd.f32 %v653_v56, %v3411_v61 }
 0x21c   : > { %v3087_v35 = vadd.f32 %v1144_v18, %v1036_v54  ;;  %1260 = vmatmul.f32.gmra.mxu1 %v3410_v13  ;;  %1462 = vmatmul.f32.gmra.mxu2 %v1377_v37  ;;  %v3412_v18 = vld [vmem:[#allocation13_spill] sm:$0xff]  ;;  %v3413_v37 = vld [vmem:[#allocation19_spill] sm:$0xff] }
 0x21d   : > { %v3100_v54 = vld [vmem:[#allocation2 + $0x92] sm:$0xff] }
 0x21e   : > { %1624 = vmatmul.f32.gmra.mxu3 %v3061_v29 }
 0x21f   : > { %v783_v51 = vpop.f32.mrf.mxu2  ;;  %v1147_v50 = vpop.f32.mrf.mxu0 }
 0x220   : > { %v835_v46 = vadd.f32 %v783_v51, %v654_v40 }
 0x221   : > { %v656_v10 = vpop.f32.mrf.mxu1  ;;  %v985_v33 = vpop.f32.mrf.mxu3 }
 0x222   : > { %v1037_v49 = vadd.f32 %v985_v33, %v835_v46  ;;  %1786 = vmatmul.f32.gmra.mxu0 %v3092_v22  ;;  %v657_v36 = vadd.f32 %v656_v10, %v3413_v37 }
 0x224   : > { %v3095_v26 = vadd.f32 %v1147_v50, %v1037_v49  ;;  %1263 = vmatmul.f32.gmra.mxu1 %v3412_v18  ;;  %1465 = vmatmul.f32.gmra.mxu2 %v1378_v57  ;;  %v3414_v57 = vld [vmem:[#allocation9_spill] sm:$0xff]  ;;  %v3109_v49 = vld [vmem:[#allocation2 + $0xa2] sm:$0xff] }
 0x226   : > { %1627 = vmatmul.f32.gmra.mxu3 %v3068_v24 }
 0x227   : > { %v786_v56 = vpop.f32.mrf.mxu2  ;;  %v1150_v3 = vpop.f32.mrf.mxu0 }
 0x228   : > { %v836_v13 = vadd.f32 %v786_v56, %v657_v36 }
 0x229   : > { %v659_v61 = vpop.f32.mrf.mxu1  ;;  %v988_v40 = vpop.f32.mrf.mxu3 }
 0x22a   : > { %v1038_v51 = vadd.f32 %v988_v40, %v836_v13  ;;  %1789 = vmatmul.f32.gmra.mxu0 %v3100_v54  ;;  %v660_v50 = vadd.f32 %v659_v61, %v3414_v57  ;;  %v3118_v40 = vld [vmem:[#allocation2 + $0xaa] sm:$0xff] }
 0x22c   : > { %v3103_v46 = vadd.f32 %v1150_v3, %v1038_v51  ;;  %1266 = vmatmul.f32.gmra.mxu1 %v2862_v30  ;;  %1468 = vmatmul.f32.gmra.mxu2 %v3047_v0  ;;  %v3415_v30 = vld [vmem:[#allocation10_spill] sm:$0xff] }
 0x22e   : > { %1630 = vmatmul.f32.gmra.mxu3 %v3076_v63 }
 0x22f   : > { %v789_v10 = vpop.f32.mrf.mxu2  ;;  %v1153_v33 = vpop.f32.mrf.mxu0 }
 0x230   : > { %v837_v18 = vadd.f32 %v789_v10, %v660_v50 }
 0x231   : > { %v662_v37 = vpop.f32.mrf.mxu1  ;;  %v991_v36 = vpop.f32.mrf.mxu3 }
 0x232   : > { %v1039_v56 = vadd.f32 %v991_v36, %v837_v18  ;;  %1792 = vmatmul.f32.gmra.mxu0 %v3109_v49  ;;  %v663_v0 = vadd.f32 %v662_v37, %v3415_v30  ;;  %v3127_v36 = vld [vmem:[#allocation2 + $0xb2] sm:$0xff] }
 0x234   : > { %v3112_v3 = vadd.f32 %v1153_v33, %v1039_v56  ;;  %1269 = vmatmul.f32.gmra.mxu1 %v2876_v9  ;;  %1471 = vmatmul.f32.gmra.mxu2 %v3054_v15  ;;  %v3416_v9 = vld [vmem:[#allocation12_spill] sm:$0xff] }
 0x236   : > { %1633 = vmatmul.f32.gmra.mxu3 %v3084_v47 }
 0x237   : > { %v792_v13 = vpop.f32.mrf.mxu2  ;;  %v1156_v61 = vpop.f32.mrf.mxu0 }
 0x238   : > { %v838_v51 = vadd.f32 %v792_v13, %v663_v0 }
 0x239   : > { %v665_v57 = vpop.f32.mrf.mxu1  ;;  %v994_v50 = vpop.f32.mrf.mxu3 }
 0x23a   : > { %v1040_v10 = vadd.f32 %v994_v50, %v838_v51  ;;  %1795 = vmatmul.f32.gmra.mxu0 %v3118_v40  ;;  %v666_v15 = vadd.f32 %v665_v57, %v3416_v9  ;;  %v3136_v50 = vld [vmem:[#allocation2 + $0xba] sm:$0xff] }
 0x23c   : > { %v3121_v33 = vadd.f32 %v1156_v61, %v1040_v10  ;;  %1272 = vmatmul.f32.gmra.mxu1 %v2890_v25  ;;  %1474 = vmatmul.f32.gmra.mxu2 %v3061_v29  ;;  %v3417_v25 = vld [vmem:[#allocation14_spill] sm:$0xff] }
 0x23e   : > { %1636 = vmatmul.f32.gmra.mxu3 %v3092_v22 }
 0x23f   : > { %v795_v18 = vpop.f32.mrf.mxu2  ;;  %v1159_v37 = vpop.f32.mrf.mxu0 }
 0x240   : > { %v839_v56 = vadd.f32 %v795_v18, %v666_v15 }
 0x241   : > { %v668_v30 = vpop.f32.mrf.mxu1  ;;  %v997_v0 = vpop.f32.mrf.mxu3 }
 0x242   : > { %v1041_v13 = vadd.f32 %v997_v0, %v839_v56  ;;  %1798 = vmatmul.f32.gmra.mxu0 %v3127_v36  ;;  %v669_v29 = vadd.f32 %v668_v30, %v3417_v25  ;;  %v3145_v0 = vld [vmem:[#allocation2 + $0xca] sm:$0xff] }
 0x244   : > { %v3130_v61 = vadd.f32 %v1159_v37, %v1041_v13  ;;  %1275 = vmatmul.f32.gmra.mxu1 %v2904_v6  ;;  %1477 = vmatmul.f32.gmra.mxu2 %v3068_v24  ;;  %v3418_v6 = vld [vmem:[#allocation15_spill] sm:$0xff] }
 0x246   : > { %1639 = vmatmul.f32.gmra.mxu3 %v3100_v54 }
 0x247   : > { %v798_v51 = vpop.f32.mrf.mxu2  ;;  %v1162_v57 = vpop.f32.mrf.mxu0 }
 0x248   : > { %v840_v10 = vadd.f32 %v798_v51, %v669_v29 }
 0x249   : > { %v671_v9 = vpop.f32.mrf.mxu1  ;;  %v1000_v15 = vpop.f32.mrf.mxu3 }
 0x24a   : > { %v1042_v18 = vadd.f32 %v1000_v15, %v840_v10  ;;  %1801 = vmatmul.f32.gmra.mxu0 %v3136_v50  ;;  %v672_v24 = vadd.f32 %v671_v9, %v3418_v6  ;;  %v3154_v15 = vld [vmem:[#allocation2 + $0xd2] sm:$0xff] }
 0x24c   : > { %v3139_v37 = vadd.f32 %v1162_v57, %v1042_v18  ;;  %1278 = vmatmul.f32.gmra.mxu1 %v2913_v7  ;;  %1480 = vmatmul.f32.gmra.mxu2 %v3076_v63  ;;  %v3419_v7 = vld [vmem:[#allocation16_spill] sm:$0xff] }
 0x24e   : > { %1642 = vmatmul.f32.gmra.mxu3 %v3109_v49 }
 0x24f   : > { %v801_v56 = vpop.f32.mrf.mxu2  ;;  %v1165_v30 = vpop.f32.mrf.mxu0 }
 0x250   : > { %v841_v13 = vadd.f32 %v801_v56, %v672_v24 }
 0x251   : > { %v674_v25 = vpop.f32.mrf.mxu1  ;;  %v1003_v29 = vpop.f32.mrf.mxu3 }
 0x252   : > { %v1043_v51 = vadd.f32 %v1003_v29, %v841_v13  ;;  %1804 = vmatmul.f32.gmra.mxu0 %v3145_v0  ;;  %v675_v63 = vadd.f32 %v674_v25, %v3419_v7  ;;  %v3163_v29 = vld [vmem:[#allocation2 + $0xda] sm:$0xff] }
 0x254   : > { %v3148_v57 = vadd.f32 %v1165_v30, %v1043_v51  ;;  %1281 = vmatmul.f32.gmra.mxu1 %v2922_v39  ;;  %1483 = vmatmul.f32.gmra.mxu2 %v3084_v47  ;;  %v3420_v39 = vld [vmem:[#allocation18_spill] sm:$0xff] }
 0x256   : > { %1645 = vmatmul.f32.gmra.mxu3 %v3118_v40 }
 0x257   : > { %v804_v10 = vpop.f32.mrf.mxu2  ;;  %v1168_v9 = vpop.f32.mrf.mxu0 }
 0x258   : > { %v842_v18 = vadd.f32 %v804_v10, %v675_v63 }
 0x259   : > { %v677_v6 = vpop.f32.mrf.mxu1  ;;  %v1006_v24 = vpop.f32.mrf.mxu3 }
 0x25a   : > { %v1044_v56 = vadd.f32 %v1006_v24, %v842_v18  ;;  %1807 = vmatmul.f32.gmra.mxu0 %v3154_v15  ;;  %v678_v47 = vadd.f32 %v677_v6, %v3420_v39  ;;  %v3172_v24 = vld [vmem:[#allocation2 + $0xe2] sm:$0xff] }
 0x25c   : > { %v3157_v30 = vadd.f32 %v1168_v9, %v1044_v56  ;;  %1284 = vmatmul.f32.gmra.mxu1 %v2931_v1  ;;  %1486 = vmatmul.f32.gmra.mxu2 %v3092_v22  ;;  %v3421_v1 = vld [vmem:[#allocation20_spill] sm:$0xff] }
 0x25e   : > { %1648 = vmatmul.f32.gmra.mxu3 %v3127_v36 }
 0x25f   : > { %v807_v13 = vpop.f32.mrf.mxu2  ;;  %v1171_v25 = vpop.f32.mrf.mxu0 }
 0x260   : > { %v843_v51 = vadd.f32 %v807_v13, %v678_v47 }
 0x261   : > { %v680_v7 = vpop.f32.mrf.mxu1  ;;  %v1009_v63 = vpop.f32.mrf.mxu3 }
 0x262   : > { %v1045_v10 = vadd.f32 %v1009_v63, %v843_v51  ;;  %1810 = vmatmul.f32.gmra.mxu0 %v3163_v29  ;;  %v681_v22 = vadd.f32 %v680_v7, %v3421_v1  ;;  %v3181_v7 = vld [vmem:[#allocation2 + $0xf2] sm:$0xff] }
 0x264   : > { %v3166_v9 = vadd.f32 %v1171_v25, %v1045_v10  ;;  %1287 = vmatmul.f32.gmra.mxu1 %v2940_v17  ;;  %1489 = vmatmul.f32.gmra.mxu2 %v3100_v54 }
 0x266   : > { %1651 = vmatmul.f32.gmra.mxu3 %v3136_v50 }
 0x267   : > { %v810_v18 = vpop.f32.mrf.mxu2  ;;  %v1174_v6 = vpop.f32.mrf.mxu0 }
 0x268   : > { %v844_v56 = vadd.f32 %v810_v18, %v681_v22  ;;  %v3186_v18 = vld [vmem:[%s3384_s2] ss:$0 sm:$0xff] }
 0x269   : > { %v1012_v39 = vpop.f32.mrf.mxu3  ;;  %v1243_v47 = vpop.f32.mrf.mxu1 }
 0x26a   : > { %v1046_v13 = vadd.f32 %v1012_v39, %v844_v56  ;;  %1813 = vmatmul.f32.gmra.mxu0 %v3172_v24  ;;  %v1339_v17 = vadd.f32 %v1243_v47, %v2916_v5  ;;  %v3194_v39 = vld [vmem:[#allocation2 + $0xfa] sm:$0xff] }
 0x26c   : > { %v3175_v25 = vadd.f32 %v1174_v6, %v1046_v13  ;;  %1290 = vmatmul.f32.gmra.mxu1 %v2949_v41  ;;  %1492 = vmatmul.f32.gmra.mxu2 %v3109_v49 }
 0x26e   : > { %1654 = vmatmul.f32.gmra.mxu3 %v3145_v0 }
 0x26f   : > { %v1445_v54 = vpop.f32.mrf.mxu2  ;;  %v1769_v51 = vpop.f32.mrf.mxu0 }
 0x270   : > { %v1541_v63 = vadd.f32 %v1445_v54, %v1339_v17 }
 0x271   : > { %v1246_v10 = vpop.f32.mrf.mxu1  ;;  %v1607_v1 = vpop.f32.mrf.mxu3 }
 0x272   : > { %v1703_v22 = vadd.f32 %v1607_v1, %v1541_v63  ;;  %1816 = vmatmul.f32.gmra.mxu0 %v3181_v7  ;;  %v1340_v5 = vadd.f32 %v1246_v10, %v2925_v53 }
 0x274   : > { %v1865_v41 = vadd.f32 %v1769_v51, %v1703_v22  ;;  %1293 = vmatmul.f32.gmra.mxu1 %v2958_v16  ;;  %1495 = vmatmul.f32.gmra.mxu2 %v3118_v40  ;;  %v3203_v22 = vld [vmem:[#allocation2 + $0x102] sm:$0xff] }
 0x276   : > { %v1901_v49 = vadd.f32 %v3186_v18, %v1865_v41  ;;  %1657 = vmatmul.f32.gmra.mxu3 %v3154_v15 }
 0x277   : > { %v1448_v6 = vpop.f32.mrf.mxu2  ;;  %v1772_v56 = vpop.f32.mrf.mxu0 }
 0x278   : > { %vm1933_vm0 = vcmp.ge.f32.partialorder %v1901_v49, 0.0  ;;  %v1965_v47 = vmul.f32 0.01, %v1901_v49  ;;  %v1542_v13 = vadd.f32 %v1448_v6, %v1340_v5 }
 0x279   : > { %v1249_v17 = vpop.f32.mrf.mxu1  ;;  %v1610_v54 = vpop.f32.mrf.mxu3 }
 0x27a   : > { %v1997_v51 = vsel %vm1933_vm0, %v1901_v49, %v1965_v47  ;;  %v1704_v16 = vadd.f32 %v1610_v54, %v1542_v13  ;;  %1819 = vmatmul.f32.gmra.mxu0 %v3194_v39  ;;  %v1341_v53 = vadd.f32 %v1249_v17, %v2934_v23  ;;  %v3212_v54 = vld [vmem:[#allocation2 + $0x10a] sm:$0xff] }
 0x27b   : > { %2029 = vst [vmem:[%s2629_s12] sm:$0xff] %v1997_v51 }
 0x27c   : > { %v1866_v40 = vadd.f32 %v1772_v56, %v1704_v16  ;;  %1296 = vmatmul.f32.gmra.mxu1 %v2967_v58  ;;  %1498 = vmatmul.f32.gmra.mxu2 %v3127_v36 }
 0x27e   : > { %v1902_v63 = vadd.f32 %v3186_v18, %v1866_v40  ;;  %1660 = vmatmul.f32.gmra.mxu3 %v3163_v29 }
 0x27f   : > { %v1451_v10 = vpop.f32.mrf.mxu2  ;;  %v1775_v1 = vpop.f32.mrf.mxu0 }
 0x280   : > { %vm1934_vm1 = vcmp.ge.f32.partialorder %v1902_v63, 0.0  ;;  %v1966_v41 = vmul.f32 0.01, %v1902_v63  ;;  %v1543_v5 = vadd.f32 %v1451_v10, %v1341_v53 }
 0x281   : > { %v1252_v49 = vpop.f32.mrf.mxu1  ;;  %v1613_v6 = vpop.f32.mrf.mxu3 }
 0x282   : > { %v1998_v56 = vsel %vm1934_vm1, %v1902_v63, %v1966_v41  ;;  %v1705_v58 = vadd.f32 %v1613_v6, %v1543_v5  ;;  %1822 = vmatmul.f32.gmra.mxu0 %v3203_v22  ;;  %v1342_v23 = vadd.f32 %v1252_v49, %v2943_v48  ;;  %v3221_v5 = vld [vmem:[#allocation2 + $0x11a] sm:$0xff] }
 0x283   : > { %2030 = vst [vmem:[%s2629_s12 + $0x8] sm:$0xff] %v1998_v56 }
 0x284   : > { %v1867_v36 = vadd.f32 %v1775_v1, %v1705_v58  ;;  %1299 = vmatmul.f32.gmra.mxu1 %v2976_v55  ;;  %1501 = vmatmul.f32.gmra.mxu2 %v3136_v50 }
 0x286   : > { %v1903_v47 = vadd.f32 %v3186_v18, %v1867_v36  ;;  %1663 = vmatmul.f32.gmra.mxu3 %v3172_v24 }
 0x287   : > { %v1454_v13 = vpop.f32.mrf.mxu2  ;;  %v1778_v17 = vpop.f32.mrf.mxu0 }
 0x288   : > { %vm1935_vm2 = vcmp.ge.f32.partialorder %v1903_v47, 0.0  ;;  %v1967_v51 = vmul.f32 0.01, %v1903_v47  ;;  %v1544_v16 = vadd.f32 %v1454_v13, %v1342_v23 }
 0x289   : > { %v1255_v40 = vpop.f32.mrf.mxu1  ;;  %v1616_v53 = vpop.f32.mrf.mxu3 }
 0x28a   : > { %v1999_v63 = vsel %vm1935_vm2, %v1903_v47, %v1967_v51  ;;  %v1706_v55 = vadd.f32 %v1616_v53, %v1544_v16  ;;  %1825 = vmatmul.f32.gmra.mxu0 %v3212_v54  ;;  %v1343_v48 = vadd.f32 %v1255_v40, %v2952_v60 }
 0x28b   : > { %2031 = vst [vmem:[%s2629_s12 + $0x10] sm:$0xff] %v1999_v63 }
 0x28c   : > { %v1868_v50 = vadd.f32 %v1778_v17, %v1706_v55  ;;  %1302 = vmatmul.f32.gmra.mxu1 %v2985_v19  ;;  %1504 = vmatmul.f32.gmra.mxu2 %v3145_v0  ;;  %v3230_v17 = vld [vmem:[#allocation2 + $0x122] sm:$0xff] }
 0x28e   : > { %v1904_v10 = vadd.f32 %v3186_v18, %v1868_v50  ;;  %1666 = vmatmul.f32.gmra.mxu3 %v3181_v7 }
 0x28f   : > { %v1457_v1 = vpop.f32.mrf.mxu2  ;;  %v1781_v41 = vpop.f32.mrf.mxu0 }
 0x290   : > { %vm1936_vm3 = vcmp.ge.f32.partialorder %v1904_v10, 0.0  ;;  %v1968_v49 = vmul.f32 0.01, %v1904_v10  ;;  %v1545_v6 = vadd.f32 %v1457_v1, %v1343_v48 }
 0x291   : > { %v1258_v56 = vpop.f32.mrf.mxu1  ;;  %v1619_v58 = vpop.f32.mrf.mxu3 }
 0x292   : > { %v2000_v36 = vsel %vm1936_vm3, %v1904_v10, %v1968_v49  ;;  %v1707_v19 = vadd.f32 %v1619_v58, %v1545_v6  ;;  %1828 = vmatmul.f32.gmra.mxu0 %v3221_v5  ;;  %v1344_v60 = vadd.f32 %v1258_v56, %v2961_v4  ;;  %v3239_v10 = vld [vmem:[#allocation2 + $0x12a] sm:$0xff] }
 0x293   : > { %2032 = vst [vmem:[%s2629_s12 + $0x18] sm:$0xff] %v2000_v36 }
 0x294   : > { %v1869_v0 = vadd.f32 %v1781_v41, %v1707_v19  ;;  %1305 = vmatmul.f32.gmra.mxu1 %v2994_v11  ;;  %1507 = vmatmul.f32.gmra.mxu2 %v3154_v15 }
 0x296   : > { %v1905_v23 = vadd.f32 %v3186_v18, %v1869_v0  ;;  %1669 = vmatmul.f32.gmra.mxu3 %v3194_v39  ;;  %v3248_v0 = vld [vmem:[#allocation2 + $0x132] sm:$0xff] }
 0x297   : > { %v1460_v47 = vpop.f32.mrf.mxu2  ;;  %v1784_v13 = vpop.f32.mrf.mxu0 }
 0x298   : > { %vm1937_vm4 = vcmp.ge.f32.partialorder %v1905_v23, 0.0  ;;  %v1969_v51 = vmul.f32 0.01, %v1905_v23  ;;  %v1546_v16 = vadd.f32 %v1460_v47, %v1344_v60 }
 0x299   : > { %v1261_v40 = vpop.f32.mrf.mxu1  ;;  %v1622_v53 = vpop.f32.mrf.mxu3 }
 0x29a   : > { %v2001_v63 = vsel %vm1937_vm4, %v1905_v23, %v1969_v51  ;;  %v1708_v11 = vadd.f32 %v1622_v53, %v1546_v16  ;;  %1831 = vmatmul.f32.gmra.mxu0 %v3230_v17  ;;  %v1345_v4 = vadd.f32 %v1261_v40, %v2970_v27 }
 0x29b   : > { %2033 = vst [vmem:[%s2629_s12 + $0x20] sm:$0xff] %v2001_v63  ;;  %v3257_v63 = vld [vmem:[#allocation2 + $0x142] sm:$0xff] }
 0x29c   : > { %v1870_v15 = vadd.f32 %v1784_v13, %v1708_v11  ;;  %1308 = vmatmul.f32.gmra.mxu1 %v3003_v42  ;;  %1510 = vmatmul.f32.gmra.mxu2 %v3163_v29 }
 0x29e   : > { %v1906_v55 = vadd.f32 %v3186_v18, %v1870_v15  ;;  %1672 = vmatmul.f32.gmra.mxu3 %v3203_v22 }
 0x29f   : > { %v1463_v50 = vpop.f32.mrf.mxu2  ;;  %v1787_v48 = vpop.f32.mrf.mxu0 }
 0x2a0   : > { %vm1938_vm5 = vcmp.ge.f32.partialorder %v1906_v55, 0.0  ;;  %v1970_v1 = vmul.f32 0.01, %v1906_v55  ;;  %v1547_v41 = vadd.f32 %v1463_v50, %v1345_v4 }
 0x2a1   : > { %v1264_v49 = vpop.f32.mrf.mxu1  ;;  %v1625_v6 = vpop.f32.mrf.mxu3 }
 0x2a2   : > { %v2002_v56 = vsel %vm1938_vm5, %v1906_v55, %v1970_v1  ;;  %v1709_v42 = vadd.f32 %v1625_v6, %v1547_v41  ;;  %1834 = vmatmul.f32.gmra.mxu0 %v3239_v10  ;;  %v1346_v27 = vadd.f32 %v1264_v49, %v2979_v21  ;;  %v3266_v49 = vld [vmem:[#allocation2 + $0x14a] sm:$0xff] }
 0x2a3   : > { %2034 = vst [vmem:[%s2629_s12 + $0x28] sm:$0xff] %v2002_v56 }
 0x2a4   : > { %v1871_v29 = vadd.f32 %v1787_v48, %v1709_v42  ;;  %1311 = vmatmul.f32.gmra.mxu1 %v3012_v8  ;;  %1513 = vmatmul.f32.gmra.mxu2 %v3172_v24 }
 0x2a6   : > { %v1907_v58 = vadd.f32 %v3186_v18, %v1871_v29  ;;  %1675 = vmatmul.f32.gmra.mxu3 %v3212_v54 }
 0x2a7   : > { %v1466_v36 = vpop.f32.mrf.mxu2  ;;  %v1790_v19 = vpop.f32.mrf.mxu0 }
 0x2a8   : > { %vm1939_vm6 = vcmp.ge.f32.partialorder %v1907_v58, 0.0  ;;  %v1971_v60 = vmul.f32 0.01, %v1907_v58  ;;  %v1548_v23 = vadd.f32 %v1466_v36, %v1346_v27 }
 0x2a9   : > { %v1267_v47 = vpop.f32.mrf.mxu1  ;;  %v1628_v13 = vpop.f32.mrf.mxu3 }
 0x2aa   : > { %v2003_v51 = vsel %vm1939_vm6, %v1907_v58, %v1971_v60  ;;  %v1710_v8 = vadd.f32 %v1628_v13, %v1548_v23  ;;  %1837 = vmatmul.f32.gmra.mxu0 %v3248_v0  ;;  %v1347_v21 = vadd.f32 %v1267_v47, %v2988_v62  ;;  %v3275_v60 = vld [vmem:[#allocation2 + $0x152] sm:$0xff] }
 0x2ab   : > { %2035 = vst [vmem:[%s2629_s12 + $0x30] sm:$0xff] %v2003_v51 }
 0x2ac   : > { %v1872_v24 = vadd.f32 %v1790_v19, %v1710_v8  ;;  %1314 = vmatmul.f32.gmra.mxu1 %v3019_v28  ;;  %1516 = vmatmul.f32.gmra.mxu2 %v3181_v7 }
 0x2ae   : > { %v1908_v16 = vadd.f32 %v3186_v18, %v1872_v24  ;;  %1678 = vmatmul.f32.gmra.mxu3 %v3221_v5 }
 0x2af   : > { %v1469_v40 = vpop.f32.mrf.mxu2  ;;  %v1793_v53 = vpop.f32.mrf.mxu0 }
 0x2b0   : > { %vm1940_vm7 = vcmp.ge.f32.partialorder %v1908_v16, 0.0  ;;  %v1972_v11 = vmul.f32 0.01, %v1908_v16  ;;  %v1549_v15 = vadd.f32 %v1469_v40, %v1347_v21  ;;  %v3284_v40 = vld [vmem:[#allocation2 + $0x15a] sm:$0xff] }
 0x2b1   : > { %v1270_v4 = vpop.f32.mrf.mxu1  ;;  %v1631_v55 = vpop.f32.mrf.mxu3 }
 0x2b2   : > { %v2004_v50 = vsel %vm1940_vm7, %v1908_v16, %v1972_v11  ;;  %v1711_v28 = vadd.f32 %v1631_v55, %v1549_v15  ;;  %1840 = vmatmul.f32.gmra.mxu0 %v3257_v63  ;;  %v1348_v62 = vadd.f32 %v1270_v4, %v2997_v38  ;;  %v881_v55 = vld [vmem:[#allocation2 + $0x169] sm:$0xff] }
 0x2b3   : > { %2036 = vst [vmem:[%s2629_s12 + $0x38] sm:$0xff] %v2004_v50 }
 0x2b4   : > { %v1873_v7 = vadd.f32 %v1793_v53, %v1711_v28  ;;  %1317 = vmatmul.f32.gmra.mxu1 %v3026_v14  ;;  %1519 = vmatmul.f32.gmra.mxu2 %v3194_v39 }
 0x2b6   : > { %v1909_v48 = vadd.f32 %v3186_v18, %v1873_v7  ;;  %1681 = vmatmul.f32.gmra.mxu3 %v3230_v17 }
 0x2b7   : > { %v1472_v1 = vpop.f32.mrf.mxu2  ;;  %v1796_v41 = vpop.f32.mrf.mxu0 }
 0x2b8   : > { %vm1941_vm8 = vcmp.ge.f32.partialorder %v1909_v48, 0.0  ;;  %v1973_v6 = vmul.f32 0.01, %v1909_v48  ;;  %v1550_v56 = vadd.f32 %v1472_v1, %v1348_v62 }
 0x2b9   : > { %v1273_v42 = vpop.f32.mrf.mxu1  ;;  %v1634_v29 = vpop.f32.mrf.mxu3 }
 0x2ba   : > { %v2005_v27 = vsel %vm1941_vm8, %v1909_v48, %v1973_v6  ;;  %v1712_v14 = vadd.f32 %v1634_v29, %v1550_v56  ;;  %1843 = vmatmul.f32.gmra.mxu0 %v3266_v49  ;;  %v1349_v38 = vadd.f32 %v1273_v42, %v3006_v34  ;;  %v1407_v48 = vld [vmem:[#allocation2 + $0x16a] sm:$0xff] }
 0x2bb   : > { %2037 = vst [vmem:[%s2629_s12 + $0x40] sm:$0xff] %v2005_v27  ;;  %v882_v42 = vld [vmem:[#allocation2 + $0x171] sm:$0xff] }
 0x2bc   : > { %v1874_v39 = vadd.f32 %v1796_v41, %v1712_v14  ;;  %1320 = vmatmul.f32.gmra.mxu1 %v3033_v12  ;;  %1522 = vmatmul.f32.gmra.mxu2 %v3203_v22 }
 0x2be   : > { %v1910_v58 = vadd.f32 %v3186_v18, %v1874_v39  ;;  %1684 = vmatmul.f32.gmra.mxu3 %v3239_v10 }
 0x2bf   : > { %v1475_v36 = vpop.f32.mrf.mxu2  ;;  %v1799_v19 = vpop.f32.mrf.mxu0 }
 0x2c0   : > { %vm1942_vm9 = vcmp.ge.f32.partialorder %v1910_v58, 0.0  ;;  %v1974_v23 = vmul.f32 0.01, %v1910_v58  ;;  %v1551_v47 = vadd.f32 %v1475_v36, %v1349_v38  ;;  %v1408_v38 = vld [vmem:[#allocation2 + $0x172] sm:$0xff] }
 0x2c1   : > { %v1276_v13 = vpop.f32.mrf.mxu1  ;;  %v1637_v51 = vpop.f32.mrf.mxu3 }
 0x2c2   : > { %v2006_v8 = vsel %vm1942_vm9, %v1910_v58, %v1974_v23  ;;  %v1713_v12 = vadd.f32 %v1637_v51, %v1551_v47  ;;  %1846 = vmatmul.f32.gmra.mxu0 %v3275_v60  ;;  %v1350_v34 = vadd.f32 %v1276_v13, %v3015_v44  ;;  %v883_v47 = vld [vmem:[#allocation2 + $0x179] sm:$0xff] }
 0x2c3   : > { %2038 = vst [vmem:[%s2629_s12 + $0x48] sm:$0xff] %v2006_v8 }
 0x2c4   : > { %v1875_v22 = vadd.f32 %v1799_v19, %v1713_v12  ;;  %1323 = vmatmul.f32.gmra.mxu1 %v3040_v59  ;;  %1525 = vmatmul.f32.gmra.mxu2 %v3212_v54 }
 0x2c6   : > { %v1911_v24 = vadd.f32 %v3186_v18, %v1875_v22  ;;  %1687 = vmatmul.f32.gmra.mxu3 %v3248_v0  ;;  %v1409_v22 = vld [vmem:[#allocation2 + $0x17a] sm:$0xff] }
 0x2c7   : > { %v1478_v21 = vpop.f32.mrf.mxu2  ;;  %v1802_v16 = vpop.f32.mrf.mxu0 }
 0x2c8   : > { %vm1943_vm10 = vcmp.ge.f32.partialorder %v1911_v24, 0.0  ;;  %v1975_v53 = vmul.f32 0.01, %v1911_v24  ;;  %v1552_v11 = vadd.f32 %v1478_v21, %v1350_v34 }
 0x2c9   : > { %v1279_v15 = vpop.f32.mrf.mxu1  ;;  %v1640_v4 = vpop.f32.mrf.mxu3 }
 0x2ca   : > { %v2007_v59 = vsel %vm1943_vm10, %v1911_v24, %v1975_v53  ;;  %v1714_v50 = vadd.f32 %v1640_v4, %v1552_v11  ;;  %1849 = vmatmul.f32.gmra.mxu0 %v3284_v40  ;;  %v1351_v54 = vadd.f32 %v1279_v15, %v3022_v32  ;;  %v884_v53 = vld [vmem:[#allocation2 + $0x181] sm:$0xff] }
 0x2cb   : > { %2039 = vst [vmem:[%s2629_s12 + $0x50] sm:$0xff] %v2007_v59  ;;  %v1410_v59 = vld [vmem:[#allocation2 + $0x182] sm:$0xff] }
 0x2cc   : > { %v1876_v44 = vadd.f32 %v1802_v16, %v1714_v50  ;;  %1326 = vmatmul.f32.gmra.mxu1 %v881_v55  ;;  %1528 = vmatmul.f32.gmra.mxu2 %v3221_v5 }
 0x2ce   : > { %v1912_v28 = vadd.f32 %v3186_v18, %v1876_v44  ;;  %1690 = vmatmul.f32.gmra.mxu3 %v3257_v63 }
 0x2cf   : > { %v1481_v7 = vpop.f32.mrf.mxu2  ;;  %v1805_v62 = vpop.f32.mrf.mxu0 }
 0x2d0   : > { %vm1944_vm11 = vcmp.ge.f32.partialorder %v1912_v28, 0.0  ;;  %v1976_v1 = vmul.f32 0.01, %v1912_v28  ;;  %v1553_v41 = vadd.f32 %v1481_v7, %v1351_v54 }
 0x2d1   : > { %v1282_v6 = vpop.f32.mrf.mxu1  ;;  %v1643_v56 = vpop.f32.mrf.mxu3 }
 0x2d2   : > { %v2008_v29 = vsel %vm1944_vm11, %v1912_v28, %v1976_v1  ;;  %v1715_v27 = vadd.f32 %v1643_v56, %v1553_v41  ;;  %1852 = vmatmul.f32.gmra.mxu0 %v1407_v48  ;;  %v1352_v32 = vadd.f32 %v1282_v6, %v3029_v45  ;;  %v3422_v48 = vld [vmem:[#allocation21_spill] sm:$0xff] }
 0x2d3   : > { %2040 = vst [vmem:[%s2629_s12 + $0x58] sm:$0xff] %v2008_v29 }
 0x2d4   : > { %v1877_v5 = vadd.f32 %v1805_v62, %v1715_v27  ;;  %1329 = vmatmul.f32.gmra.mxu1 %v882_v42  ;;  %1531 = vmatmul.f32.gmra.mxu2 %v3230_v17 }
 0x2d6   : > { %v1913_v63 = vadd.f32 %v3186_v18, %v1877_v5  ;;  %1693 = vmatmul.f32.gmra.mxu3 %v3266_v49 }
 0x2d7   : > { %v1484_v14 = vpop.f32.mrf.mxu2  ;;  %v1808_v39 = vpop.f32.mrf.mxu0 }
 0x2d8   : > { %vm1945_vm12 = vcmp.ge.f32.partialorder %v1913_v63, 0.0  ;;  %v1977_v58 = vmul.f32 0.01, %v1913_v63  ;;  %v1554_v36 = vadd.f32 %v1484_v14, %v1352_v32 }
 0x2d9   : > { %v1285_v19 = vpop.f32.mrf.mxu1  ;;  %v1646_v23 = vpop.f32.mrf.mxu3 }
 0x2da   : > { %v2009_v13 = vsel %vm1945_vm12, %v1913_v63, %v1977_v58  ;;  %v1716_v51 = vadd.f32 %v1646_v23, %v1554_v36  ;;  %1855 = vmatmul.f32.gmra.mxu0 %v1408_v38  ;;  %v1353_v45 = vadd.f32 %v1285_v19, %v3036_v20  ;;  %v3423_v63 = vld [vmem:[#allocation22_spill] sm:$0xff] }
 0x2db   : > { %2041 = vst [vmem:[%s2629_s12 + $0x60] sm:$0xff] %v2009_v13 }
 0x2dc   : > { %v1878_v17 = vadd.f32 %v1808_v39, %v1716_v51  ;;  %1332 = vmatmul.f32.gmra.mxu1 %v883_v47  ;;  %1534 = vmatmul.f32.gmra.mxu2 %v3239_v10 }
 0x2de   : > { %v1914_v49 = vadd.f32 %v3186_v18, %v1878_v17  ;;  %1696 = vmatmul.f32.gmra.mxu3 %v3275_v60 }
 0x2df   : > { %v1487_v8 = vpop.f32.mrf.mxu2  ;;  %v1811_v12 = vpop.f32.mrf.mxu0 }
 0x2e0   : > { %vm1946_vm13 = vcmp.ge.f32.partialorder %v1914_v49, 0.0  ;;  %v1978_v34 = vmul.f32 0.01, %v1914_v49  ;;  %v1555_v24 = vadd.f32 %v1487_v8, %v1353_v45 }
 0x2e1   : > { %v1288_v21 = vpop.f32.mrf.mxu1  ;;  %v1649_v16 = vpop.f32.mrf.mxu3 }
 0x2e2   : > { %v2010_v11 = vsel %vm1946_vm13, %v1914_v49, %v1978_v34  ;;  %v1717_v15 = vadd.f32 %v1649_v16, %v1555_v24  ;;  %1858 = vmatmul.f32.gmra.mxu0 %v1409_v22  ;;  %v1354_v20 = vadd.f32 %v1288_v21, %v3043_v52 }
 0x2e3   : > { %2042 = vst [vmem:[%s2629_s12 + $0x68] sm:$0xff] %v2010_v11 }
 0x2e4   : > { %v1879_v10 = vadd.f32 %v1811_v12, %v1717_v15  ;;  %1335 = vmatmul.f32.gmra.mxu1 %v884_v53  ;;  %1537 = vmatmul.f32.gmra.mxu2 %v3248_v0 }
 0x2e6   : > { %v1915_v60 = vadd.f32 %v3186_v18, %v1879_v10  ;;  %1699 = vmatmul.f32.gmra.mxu3 %v3284_v40 }
 0x2e7   : > { %v1490_v4 = vpop.f32.mrf.mxu2  ;;  %v1814_v55 = vpop.f32.mrf.mxu0 }
 0x2e8   : > { %vm1947_vm14 = vcmp.ge.f32.partialorder %v1915_v60, 0.0  ;;  %v1979_v50 = vmul.f32 0.01, %v1915_v60  ;;  %v1556_v44 = vadd.f32 %v1490_v4, %v1354_v20 }
 0x2e9   : > { %v1291_v54 = vpop.f32.mrf.mxu1  ;;  %v1652_v28 = vpop.f32.mrf.mxu3 }
 0x2ea   : > { %v2011_v7 = vsel %vm1947_vm14, %v1915_v60, %v1979_v50  ;;  %v1718_v62 = vadd.f32 %v1652_v28, %v1556_v44  ;;  %1861 = vmatmul.f32.gmra.mxu0 %v1410_v59  ;;  %v1355_v52 = vadd.f32 %v1291_v54, %v3422_v48 }
 0x2eb   : > { %2043 = vst [vmem:[%s2629_s12 + $0x70] sm:$0xff] %v2011_v7 }
 0x2ec   : > { %v1880_v0 = vadd.f32 %v1814_v55, %v1718_v62 }
 0x2ee   : > { %v1916_v1 = vadd.f32 %v3186_v18, %v1880_v0 }
 0x2ef   : > { %v1493_v41 = vpop.f32.mrf.mxu2  ;;  %v1817_v40 = vpop.f32.mrf.mxu0 }
 0x2f0   : > { %vm1948_vm15 = vcmp.ge.f32.partialorder %v1916_v1, 0.0  ;;  %v1980_v6 = vmul.f32 0.01, %v1916_v1  ;;  %v1557_v56 = vadd.f32 %v1493_v41, %v1355_v52 }
 0x2f1   : > { %v1294_v42 = vpop.f32.mrf.mxu1  ;;  %v1655_v29 = vpop.f32.mrf.mxu3 }
 0x2f2   : > { %v2012_v27 = vsel %vm1948_vm15, %v1916_v1, %v1980_v6  ;;  %v1719_v5 = vadd.f32 %v1655_v29, %v1557_v56  ;;  %v1356_v14 = vadd.f32 %v1294_v42, %v3423_v63 }
 0x2f3   : > { %2044 = vst [vmem:[%s2629_s12 + $0x78] sm:$0xff] %v2012_v27 }
 0x2f4   : > { %v1881_v32 = vadd.f32 %v1817_v40, %v1719_v5 }
 0x2f6   : > { %v1917_v39 = vadd.f32 %v3186_v18, %v1881_v32 }
 0x2f7   : > { %v1496_v38 = vpop.f32.mrf.mxu2  ;;  %v1820_v58 = vpop.f32.mrf.mxu0 }
 0x2f8   : > { %vm1949_vm0 = vcmp.ge.f32.partialorder %v1917_v39, 0.0  ;;  %v1981_v36 = vmul.f32 0.01, %v1917_v39  ;;  %v1558_v19 = vadd.f32 %v1496_v38, %v1356_v14 }
 0x2f9   : > { %v1297_v23 = vpop.f32.mrf.mxu1  ;;  %v1658_v47 = vpop.f32.mrf.mxu3 }
 0x2fa   : > { %v2013_v13 = vsel %vm1949_vm0, %v1917_v39, %v1981_v36  ;;  %v1720_v51 = vadd.f32 %v1658_v47, %v1558_v19  ;;  %v1357_v45 = vadd.f32 %v1297_v23, %v3064_v43 }
 0x2fb   : > { %2045 = vst [vmem:[%s2629_s12 + $0x80] sm:$0xff] %v2013_v13 }
 0x2fc   : > { %v1882_v17 = vadd.f32 %v1820_v58, %v1720_v51 }
 0x2fe   : > { %v1918_v49 = vadd.f32 %v3186_v18, %v1882_v17 }
 0x2ff   : > { %v1499_v8 = vpop.f32.mrf.mxu2  ;;  %v1823_v12 = vpop.f32.mrf.mxu0 }
 0x300   : > { %vm1950_vm1 = vcmp.ge.f32.partialorder %v1918_v49, 0.0  ;;  %v1982_v22 = vmul.f32 0.01, %v1918_v49  ;;  %v1559_v34 = vadd.f32 %v1499_v8, %v1357_v45 }
 0x301   : > { %v1300_v24 = vpop.f32.mrf.mxu1  ;;  %v1661_v21 = vpop.f32.mrf.mxu3 }
 0x302   : > { %v2014_v16 = vsel %vm1950_vm1, %v1918_v49, %v1982_v22  ;;  %v1721_v53 = vadd.f32 %v1661_v21, %v1559_v34  ;;  %v1358_v15 = vadd.f32 %v1300_v24, %v3071_v31 }
 0x303   : > { %2046 = vst [vmem:[%s2629_s12 + $0x88] sm:$0xff] %v2014_v16 }
 0x304   : > { %v1883_v11 = vadd.f32 %v1823_v12, %v1721_v53 }
 0x306   : > { %v1919_v10 = vadd.f32 %v3186_v18, %v1883_v11 }
 0x307   : > { %v1502_v20 = vpop.f32.mrf.mxu2  ;;  %v1826_v43 = vpop.f32.mrf.mxu0 }
 0x308   : > { %vm1951_vm2 = vcmp.ge.f32.partialorder %v1919_v10, 0.0  ;;  %v1983_v60 = vmul.f32 0.01, %v1919_v10  ;;  %v1560_v4 = vadd.f32 %v1502_v20, %v1358_v15 }
 0x309   : > { %v1303_v55 = vpop.f32.mrf.mxu1  ;;  %v1664_v59 = vpop.f32.mrf.mxu3 }
 0x30a   : > { %v2015_v50 = vsel %vm1951_vm2, %v1919_v10, %v1983_v60  ;;  %v1722_v44 = vadd.f32 %v1664_v59, %v1560_v4  ;;  %v1359_v28 = vadd.f32 %v1303_v55, %v3079_v2 }
 0x30b   : > { %2047 = vst [vmem:[%s2629_s12 + $0x90] sm:$0xff] %v2015_v50 }
 0x30c   : > { %v1884_v54 = vadd.f32 %v1826_v43, %v1722_v44 }
 0x30e   : > { %v1920_v7 = vadd.f32 %v3186_v18, %v1884_v54 }
 0x30f   : > { %v1505_v62 = vpop.f32.mrf.mxu2  ;;  %v1829_v31 = vpop.f32.mrf.mxu0 }
 0x310   : > { %vm1952_vm3 = vcmp.ge.f32.partialorder %v1920_v7, 0.0  ;;  %v1984_v0 = vmul.f32 0.01, %v1920_v7  ;;  %v1561_v48 = vadd.f32 %v1505_v62, %v1359_v28 }
 0x311   : > { %v1306_v52 = vpop.f32.mrf.mxu1  ;;  %v1667_v1 = vpop.f32.mrf.mxu3 }
 0x312   : > { %v2016_v41 = vsel %vm1952_vm3, %v1920_v7, %v1984_v0  ;;  %v1723_v40 = vadd.f32 %v1667_v1, %v1561_v48  ;;  %v1360_v56 = vadd.f32 %v1306_v52, %v3087_v35 }
 0x313   : > { %2048 = vst [vmem:[%s2629_s12 + $0x98] sm:$0xff] %v2016_v41 }
 0x314   : > { %v1885_v6 = vadd.f32 %v1829_v31, %v1723_v40 }
 0x316   : > { %v1921_v42 = vadd.f32 %v3186_v18, %v1885_v6 }
 0x317   : > { %v1508_v29 = vpop.f32.mrf.mxu2  ;;  %v1832_v2 = vpop.f32.mrf.mxu0 }
 0x318   : > { %vm1953_vm4 = vcmp.ge.f32.partialorder %v1921_v42, 0.0  ;;  %v1985_v27 = vmul.f32 0.01, %v1921_v42  ;;  %v1562_v5 = vadd.f32 %v1508_v29, %v1360_v56 }
 0x319   : > { %v1309_v32 = vpop.f32.mrf.mxu1  ;;  %v1670_v63 = vpop.f32.mrf.mxu3 }
 0x31a   : > { %v2017_v14 = vsel %vm1953_vm4, %v1921_v42, %v1985_v27  ;;  %v1724_v39 = vadd.f32 %v1670_v63, %v1562_v5  ;;  %v1361_v58 = vadd.f32 %v1309_v32, %v3095_v26 }
 0x31b   : > { %2049 = vst [vmem:[%s2629_s12 + $0xa0] sm:$0xff] %v2017_v14 }
 0x31c   : > { %v1886_v38 = vadd.f32 %v1832_v2, %v1724_v39 }
 0x31e   : > { %v1922_v36 = vadd.f32 %v3186_v18, %v1886_v38 }
 0x31f   : > { %v1511_v19 = vpop.f32.mrf.mxu2  ;;  %v1835_v35 = vpop.f32.mrf.mxu0 }
 0x320   : > { %vm1954_vm5 = vcmp.ge.f32.partialorder %v1922_v36, 0.0  ;;  %v1986_v23 = vmul.f32 0.01, %v1922_v36  ;;  %v1563_v47 = vadd.f32 %v1511_v19, %v1361_v58 }
 0x321   : > { %v1312_v13 = vpop.f32.mrf.mxu1  ;;  %v1673_v51 = vpop.f32.mrf.mxu3 }
 0x322   : > { %v2018_v17 = vsel %vm1954_vm5, %v1922_v36, %v1986_v23  ;;  %v1725_v45 = vadd.f32 %v1673_v51, %v1563_v47  ;;  %v1362_v8 = vadd.f32 %v1312_v13, %v3103_v46 }
 0x323   : > { %2050 = vst [vmem:[%s2629_s12 + $0xa8] sm:$0xff] %v2018_v17 }
 0x324   : > { %v1887_v49 = vadd.f32 %v1835_v35, %v1725_v45 }
 0x326   : > { %v1923_v12 = vadd.f32 %v3186_v18, %v1887_v49 }
 0x327   : > { %v1514_v22 = vpop.f32.mrf.mxu2  ;;  %v1838_v26 = vpop.f32.mrf.mxu0 }
 0x328   : > { %vm1955_vm6 = vcmp.ge.f32.partialorder %v1923_v12, 0.0  ;;  %v1987_v34 = vmul.f32 0.01, %v1923_v12  ;;  %v1564_v24 = vadd.f32 %v1514_v22, %v1362_v8 }
 0x329   : > { %v1315_v21 = vpop.f32.mrf.mxu1  ;;  %v1676_v16 = vpop.f32.mrf.mxu3 }
 0x32a   : > { %v2019_v53 = vsel %vm1955_vm6, %v1923_v12, %v1987_v34  ;;  %v1726_v11 = vadd.f32 %v1676_v16, %v1564_v24  ;;  %v1363_v10 = vadd.f32 %v1315_v21, %v3112_v3 }
 0x32b   : > { %2051 = vst [vmem:[%s2629_s12 + $0xb0] sm:$0xff] %v2019_v53 }
 0x32c   : > { %v1888_v15 = vadd.f32 %v1838_v26, %v1726_v11 }
 0x32e   : > { %v1924_v20 = vadd.f32 %v3186_v18, %v1888_v15 }
 0x32f   : > { %v1517_v43 = vpop.f32.mrf.mxu2  ;;  %v1841_v46 = vpop.f32.mrf.mxu0 }
 0x330   : > { %vm1956_vm7 = vcmp.ge.f32.partialorder %v1924_v20, 0.0  ;;  %v1988_v60 = vmul.f32 0.01, %v1924_v20  ;;  %v1565_v4 = vadd.f32 %v1517_v43, %v1363_v10 }
 0x331   : > { %v1318_v55 = vpop.f32.mrf.mxu1  ;;  %v1679_v59 = vpop.f32.mrf.mxu3 }
 0x332   : > { %v2020_v50 = vsel %vm1956_vm7, %v1924_v20, %v1988_v60  ;;  %v1727_v44 = vadd.f32 %v1679_v59, %v1565_v4  ;;  %v1364_v28 = vadd.f32 %v1318_v55, %v3121_v33 }
 0x333   : > { %2052 = vst [vmem:[%s2629_s12 + $0xb8] sm:$0xff] %v2020_v50 }
 0x334   : > { %v1889_v54 = vadd.f32 %v1841_v46, %v1727_v44 }
 0x336   : > { %v1925_v7 = vadd.f32 %v3186_v18, %v1889_v54 }
 0x337   : > { %v1520_v62 = vpop.f32.mrf.mxu2  ;;  %v1844_v3 = vpop.f32.mrf.mxu0 }
 0x338   : > { %vm1957_vm8 = vcmp.ge.f32.partialorder %v1925_v7, 0.0  ;;  %v1989_v31 = vmul.f32 0.01, %v1925_v7  ;;  %v1566_v0 = vadd.f32 %v1520_v62, %v1364_v28 }
 0x339   : > { %v1321_v48 = vpop.f32.mrf.mxu1  ;;  %v1682_v52 = vpop.f32.mrf.mxu3 }
 0x33a   : > { %v2021_v1 = vsel %vm1957_vm8, %v1925_v7, %v1989_v31  ;;  %v1728_v41 = vadd.f32 %v1682_v52, %v1566_v0  ;;  %v1365_v6 = vadd.f32 %v1321_v48, %v3130_v61 }
 0x33b   : > { %2053 = vst [vmem:[%s2629_s12 + $0xc0] sm:$0xff] %v2021_v1 }
 0x33c   : > { %v1890_v40 = vadd.f32 %v1844_v3, %v1728_v41 }
 0x33e   : > { %v1926_v56 = vadd.f32 %v3186_v18, %v1890_v40 }
 0x33f   : > { %v1523_v42 = vpop.f32.mrf.mxu2  ;;  %v1847_v33 = vpop.f32.mrf.mxu0 }
 0x340   : > { %vm1958_vm9 = vcmp.ge.f32.partialorder %v1926_v56, 0.0  ;;  %v1990_v29 = vmul.f32 0.01, %v1926_v56  ;;  %v1567_v2 = vadd.f32 %v1523_v42, %v1365_v6 }
 0x341   : > { %v1324_v27 = vpop.f32.mrf.mxu1  ;;  %v1685_v5 = vpop.f32.mrf.mxu3 }
 0x342   : > { %v2022_v32 = vsel %vm1958_vm9, %v1926_v56, %v1990_v29  ;;  %v1729_v63 = vadd.f32 %v1685_v5, %v1567_v2  ;;  %v1366_v39 = vadd.f32 %v1324_v27, %v3139_v37 }
 0x343   : > { %2054 = vst [vmem:[%s2629_s12 + $0xc8] sm:$0xff] %v2022_v32 }
 0x344   : > { %v1891_v14 = vadd.f32 %v1847_v33, %v1729_v63 }
 0x346   : > { %v1927_v38 = vadd.f32 %v3186_v18, %v1891_v14 }
 0x347   : > { %v1526_v58 = vpop.f32.mrf.mxu2  ;;  %v1850_v61 = vpop.f32.mrf.mxu0 }
 0x348   : > { %vm1959_vm10 = vcmp.ge.f32.partialorder %v1927_v38, 0.0  ;;  %v1991_v36 = vmul.f32 0.01, %v1927_v38  ;;  %v1568_v19 = vadd.f32 %v1526_v58, %v1366_v39 }
 0x349   : > { %v1327_v35 = vpop.f32.mrf.mxu1  ;;  %v1688_v23 = vpop.f32.mrf.mxu3 }
 0x34a   : > { %v2023_v47 = vsel %vm1959_vm10, %v1927_v38, %v1991_v36  ;;  %v1730_v13 = vadd.f32 %v1688_v23, %v1568_v19  ;;  %v1367_v17 = vadd.f32 %v1327_v35, %v3148_v57 }
 0x34b   : > { %2055 = vst [vmem:[%s2629_s12 + $0xd0] sm:$0xff] %v2023_v47 }
 0x34c   : > { %v1892_v51 = vadd.f32 %v1850_v61, %v1730_v13 }
 0x34e   : > { %v1928_v45 = vadd.f32 %v3186_v18, %v1892_v51 }
 0x34f   : > { %v1529_v49 = vpop.f32.mrf.mxu2  ;;  %v1853_v37 = vpop.f32.mrf.mxu0 }
 0x350   : > { %vm1960_vm11 = vcmp.ge.f32.partialorder %v1928_v45, 0.0  ;;  %v1992_v8 = vmul.f32 0.01, %v1928_v45  ;;  %v1569_v12 = vadd.f32 %v1529_v49, %v1367_v17 }
 0x351   : > { %v1330_v22 = vpop.f32.mrf.mxu1  ;;  %v1691_v26 = vpop.f32.mrf.mxu3 }
 0x352   : > { %v2024_v34 = vsel %vm1960_vm11, %v1928_v45, %v1992_v8  ;;  %v1731_v24 = vadd.f32 %v1691_v26, %v1569_v12  ;;  %v1368_v16 = vadd.f32 %v1330_v22, %v3157_v30 }
 0x353   : > { %2056 = vst [vmem:[%s2629_s12 + $0xd8] sm:$0xff] %v2024_v34 }
 0x354   : > { %v1893_v21 = vadd.f32 %v1853_v37, %v1731_v24 }
 0x356   : > { %v1929_v53 = vadd.f32 %v3186_v18, %v1893_v21 }
 0x357   : > { %v1532_v11 = vpop.f32.mrf.mxu2  ;;  %v1856_v57 = vpop.f32.mrf.mxu0 }
 0x358   : > { %vm1961_vm12 = vcmp.ge.f32.partialorder %v1929_v53, 0.0  ;;  %v1993_v15 = vmul.f32 0.01, %v1929_v53  ;;  %v1570_v10 = vadd.f32 %v1532_v11, %v1368_v16 }
 0x359   : > { %v1333_v20 = vpop.f32.mrf.mxu1  ;;  %v1694_v43 = vpop.f32.mrf.mxu3 }
 0x35a   : > { %v2025_v46 = vsel %vm1961_vm12, %v1929_v53, %v1993_v15  ;;  %v1732_v60 = vadd.f32 %v1694_v43, %v1570_v10  ;;  %v1369_v55 = vadd.f32 %v1333_v20, %v3166_v9 }
 0x35b   : > { %2057 = vst [vmem:[%s2629_s12 + $0xe0] sm:$0xff] %v2025_v46 }
 0x35c   : > { %v1894_v4 = vadd.f32 %v1856_v57, %v1732_v60 }
 0x35e   : > { %v1930_v59 = vadd.f32 %v3186_v18, %v1894_v4 }
 0x35f   : > { %v1535_v50 = vpop.f32.mrf.mxu2  ;;  %v1859_v30 = vpop.f32.mrf.mxu0 }
 0x360   : > { %vm1962_vm13 = vcmp.ge.f32.partialorder %v1930_v59, 0.0  ;;  %v1994_v44 = vmul.f32 0.01, %v1930_v59  ;;  %v1571_v54 = vadd.f32 %v1535_v50, %v1369_v55 }
 0x361   : > { %v1697_v28 = vpop.f32.mrf.mxu3  ;;  %v1336_v3 = vpop.f32.mrf.mxu1 }
 0x362   : > { %v2026_v7 = vsel %vm1962_vm13, %v1930_v59, %v1994_v44  ;;  %v1733_v62 = vadd.f32 %v1697_v28, %v1571_v54  ;;  %v1370_v0 = vadd.f32 %v1336_v3, %v3175_v25 }
 0x363   : > { %2058 = vst [vmem:[%s2629_s12 + $0xe8] sm:$0xff] %v2026_v7 }
 0x364   : > { %v1895_v31 = vadd.f32 %v1859_v30, %v1733_v62 }
 0x366   : > { %v1931_v48 = vadd.f32 %v3186_v18, %v1895_v31 }
 0x367   : > { %v1538_v9 = vpop.f32.mrf.mxu2  ;;  %v1862_v40 = vpop.f32.mrf.mxu0 }
 0x368   : > { %vm1963_vm14 = vcmp.ge.f32.partialorder %v1931_v48, 0.0  ;;  %v1995_v52 = vmul.f32 0.01, %v1931_v48  ;;  %v1572_v1 = vadd.f32 %v1538_v9, %v1370_v0 }
 0x369   : > { %v1700_v41 = vpop.f32.mrf.mxu3 }
 0x36a   : > { %v2027_v6 = vsel %vm1963_vm14, %v1931_v48, %v1995_v52  ;;  %v1734_v56 = vadd.f32 %v1700_v41, %v1572_v1 }
 0x36b   : > { %2059 = vst [vmem:[%s2629_s12 + $0xf0] sm:$0xff] %v2027_v6 }
 0x36c   : > { %v1896_v42 = vadd.f32 %v1862_v40, %v1734_v56 }
 0x36e   : > { %v1932_v33 = vadd.f32 %v3186_v18, %v1896_v42 }
 0x370   : > { %vm1964_vm15 = vcmp.ge.f32.partialorder %v1932_v33, 0.0  ;;  %v1996_v29 = vmul.f32 0.01, %v1932_v33 }
 0x372   : > { %v2028_v2 = vsel %vm1964_vm15, %v1932_v33, %v1996_v29 }
 0x373   : > { %2060 = vst [vmem:[%s2629_s12 + $0xf8] sm:$0xff] %v2028_v2 }
 0x374 PF: > { %s17_s19 = sadd.s32 1, %s2480_s19   ;;  %s3424_s12 = smov %s2456_s13 }
 0x375   : > { %p14_p6 = scmp.ge.s32.totalorder %s17_s19, 10   ;;  %s3425_s13 = smov %s2460_s14 }
 0x376   : > { %s3426_s14 = smov %s2596_s28  ;;  %s3427_s15 = smov %s2472_s17 }
 0x377   : > { %s3428_s16 = smov %s2476_s18  ;;  %s3429_s17 = smov %s3432_s4 }
 0x378   : > { %s3430_s18 = smov %s3436_s5  ;;  %16 = sbr.rel (!%p14_p6) target bundleno = 8 (0x8), region = 97 }
 0x37d   :  { %2093 = vsyncpa [#allocation4], 1 }
 0x37e   :  { %2095 = vsyncpa [#allocation4 + $0x1], 1 }
 0x37f   :  { %2096 = vsyncpa [#allocation6], 1 }

</bundles_post_ra>
